<compile_context>
chip_gen: v6e
topology: v6e:2x2x1
jax: 0.10.0
libtpu: 0.0.40
codegen_flags: <defaults>
</compile_context>

<pallas_src>
import functools

import jax
import jax.numpy as jnp
from jax import lax
from jax.experimental import pallas as pl
from jax.experimental.pallas import tpu as pltpu

_PADL = 8  # sublane-aligned left zero-pad of the conv2 intermediate


def _double_conv_kernel(xcol_ref, w1_ref, b1_ref, w2_ref, b2_ref, o_ref, hpad_ref,
                        *, h_real, n_h):
    """One (batch, row-strip) tile per grid step.

    xcol_ref: (1, TH+2, W, 9*Cin)   conv1 im2col rows for this strip + 2 halo rows (bf16)
    w1_ref  : (9*Cin, Cpad)         conv1 weights, BN1 scale folded in (bf16)
    b1_ref  : (1, Cpad)             folded BN1 shift incl. conv1 bias (f32)
    w2_ref  : (9*Cpad, Cpad)        conv2 weights, BN2 scale folded in (bf16)
    b2_ref  : (1, Cpad)             folded BN2 shift incl. conv2 bias (f32)
    o_ref   : (1, TH, W, Cpad)      output strip (bf16)
    hpad_ref: (1, TH+2, W+16, Cpad) VMEM scratch: W-padded intermediate (bf16)
    """
    _, THp, W, K1 = xcol_ref.shape          # THp = TH + 2
    TH = THp - 2
    Cpad = o_ref.shape[-1]
    M = TH * W

    # ---- conv1 (BN1 scale folded into w1): single MXU matmul, f32 accumulation ----
    xcol = xcol_ref[...].reshape(THp * W, K1)
    acc1 = jnp.dot(xcol, w1_ref[...], preferred_element_type=jnp.float32)
    h1 = jnp.maximum(acc1 + b1_ref[...], 0.0)                    # (THp*W, Cpad)
    h1 = h1.reshape(1, THp, W, Cpad).astype(hpad_ref.dtype)

    # Zero h1 rows that fall outside the real image: the top/bottom halo rows of edge
    # tiles and any H-padding rows.  These act as conv2's zero padding in H.
    tile_h = pl.program_id(0) % n_h
    row0 = tile_h * TH - 1                                        # global row of local row 0
    local = lax.broadcasted_iota(jnp.int32, (1, THp, 1, 1), 1)
    grow = row0 + local
    valid = jnp.logical_and(grow >= 0, grow < h_real)
    h1 = jnp.where(valid, h1, jnp.zeros_like(h1))

    # ---- W-padded intermediate in VMEM scratch (data at sublane-aligned offset) ----
    # Borders are re-zeroed every step: scratch is per-core and a "parallel" grid axis
    # may be sharded across TensorCores, so a step-0-only init would be unsafe.
    zpad = jnp.zeros((1, THp, _PADL, Cpad), dtype=hpad_ref.dtype)
    hpad_ref[:, :, 0:_PADL, :] = zpad
    hpad_ref[:, :, _PADL + W:_PADL + W + _PADL, :] = zpad
    hpad_ref[:, :, _PADL:_PADL + W, :] = h1                       # aligned interior store

    # ---- conv2: shift-and-accumulate over kernel rows, K = 3*Cpad per matmul ----
    acc2 = jnp.zeros((M, Cpad), jnp.float32)
    for ky in range(3):
        taps = [hpad_ref[:, ky:ky + TH, (_PADL - 1) + kx:(_PADL - 1) + kx + W, :]
                .reshape(M, Cpad) for kx in range(3)]
        patch = jnp.concatenate(taps, axis=1)                     # (M, 3*Cpad)
        acc2 = acc2 + jnp.dot(
            patch, w2_ref[ky * 3 * Cpad:(ky + 1) * 3 * Cpad, :],
            preferred_element_type=jnp.float32)

    # ---- BN2 shift + ReLU, bf16 store ----
    out = jnp.maximum(acc2 + b2_ref[...], 0.0)
    o_ref[...] = out.reshape(1, TH, W, Cpad).astype(o_ref.dtype)


def _est_step_vmem(th, w, k1, cpad):
    """Rough per-grid-step VMEM footprint (bytes) used to size the row tile."""
    thp = th + 2
    m, mp = th * w, thp * w
    return (2 * thp * w * k1 * 2              # input strip (double-buffered, bf16)
            + 2 * m * cpad * 2                # output block (double-buffered, bf16)
            + thp * (w + 2 * _PADL) * cpad * 2  # padded intermediate scratch (bf16)
            + m * 3 * cpad * 2                # per-row conv2 patch temporary (bf16)
            + m * cpad * 4 + mp * cpad * 4    # f32 accumulators
            + 2 * (k1 * cpad + 9 * cpad * cpad) * 2)  # weights (double-buffered, bf16)


def double_conv_pallas(x_nchw, params, *, tile_h=None):
    """inconv / double_conv forward. Input NCHW float32, output NCHW float32."""
    w1, b1, g1, be1, m1, v1, w2, b2, g2, be2, m2, v2 = params
    eps = 1e-5

    N, Cin, H, W = x_nchw.shape
    Cout = w1.shape[-1]
    Cpad = ((Cout + 127) // 128) * 128        # lane-dense channel padding
    K1 = 9 * Cin

    # ---- fold BN (eval mode): scale -> conv weights (f32), bias+shift -> per-channel b ----
    scale1 = g1 / jnp.sqrt(v1 + eps)
    shift1 = be1 + (b1 - m1) * scale1
    scale2 = g2 / jnp.sqrt(v2 + eps)
    shift2 = be2 + (b2 - m2) * scale2

    def pad_c(v):
        return jnp.pad(v, (0, Cpad - Cout)).reshape(1, Cpad).astype(jnp.float32)

    t1 = pad_c(shift1)
    t2 = pad_c(shift2)

    w1f = w1.astype(jnp.float32) * scale1[None, None, None, :]
    w1p = jnp.pad(w1f, ((0, 0), (0, 0), (0, 0), (0, Cpad - Cout)))
    w1p = w1p.reshape(K1, Cpad).astype(jnp.bfloat16)

    w2f = w2.astype(jnp.float32) * scale2[None, None, None, :]
    w2p = jnp.pad(w2f, ((0, 0), (0, 0), (0, Cpad - Cout), (0, Cpad - Cout)))
    w2p = w2p.reshape(9 * Cpad, Cpad).astype(jnp.bfloat16)

    # ---- per-generation VMEM budget ----
    try:
        vmem_cap = int(pltpu.get_tpu_info().vmem_capacity_bytes)
    except Exception:
        vmem_cap = 64 * 1024 * 1024
    vmem_limit = min((vmem_cap * 3) // 4, 112 * 1024 * 1024)

    # ---- row-tile height: keep the MXU M dim fed, stay inside the VMEM budget ----
    if tile_h is None:
        tile_h = max(8, -(-2048 // W))        # target M = TH*W ~= 2048
    TH = max(1, min(H, tile_h))
    while TH > 1 and _est_step_vmem(TH, W, K1, Cpad) > (vmem_limit * 3) // 5:
        TH = max(1, TH // 2)
    n_h = -(-H // TH)                         # cdiv
    Hp = n_h * TH

    # ---- NCHW -> NHWC bf16, conv1 im2col built in XLA ----
    x = jnp.transpose(x_nchw, (0, 2, 3, 1)).astype(jnp.bfloat16)
    xp = jnp.pad(x, ((0, 0), (1, 1), (1, 1), (0, 0)))
    xcol = jnp.concatenate(
        [xp[:, ky:ky + H, kx:kx + W, :] for ky in range(3) for kx in range(3)],
        axis=-1)                                                  # (N, H, W, 9*Cin)

    # Pre-materialize (TH+2)-row overlapping strips so every BlockSpec is a plain
    # non-overlapping block.  Row 0 of strip h is global h1-row h*TH - 1.
    xcolp = jnp.pad(xcol, ((0, 0), (1, Hp - H + 1), (0, 0), (0, 0)))
    strips = jnp.stack([xcolp[:, h * TH:h * TH + TH + 2] for h in range(n_h)], axis=1)
    strips = strips.reshape(N * n_h, TH + 2, W, K1)

    kernel = functools.partial(_double_conv_kernel, h_real=H, n_h=n_h)

    out = pl.pallas_call(
        kernel,
        out_shape=jax.ShapeDtypeStruct((N * n_h, TH, W, Cpad), jnp.bfloat16),
        grid_spec=pltpu.PrefetchScalarGridSpec(
            num_scalar_prefetch=0,
            grid=(N * n_h,),
            in_specs=[
                pl.BlockSpec((1, TH + 2, W, K1), lambda t: (t, 0, 0, 0)),
                pl.BlockSpec((K1, Cpad), lambda t: (0, 0)),
                pl.BlockSpec((1, Cpad), lambda t: (0, 0)),
                pl.BlockSpec((9 * Cpad, Cpad), lambda t: (0, 0)),
                pl.BlockSpec((1, Cpad), lambda t: (0, 0)),
            ],
            out_specs=pl.BlockSpec((1, TH, W, Cpad), lambda t: (t, 0, 0, 0)),
            scratch_shapes=[pltpu.VMEM((1, TH + 2, W + 2 * _PADL, Cpad), jnp.bfloat16)],
        ),
        compiler_params=pltpu.CompilerParams(
            dimension_semantics=("parallel",),
            vmem_limit_bytes=int(vmem_limit),
        ),
    )(strips, w1p, t1, w2p, t2)

    # Reassemble strips, drop H / channel padding, NHWC -> NCHW f32.
    out = out.reshape(N, Hp, W, Cpad)[:, :H, :, :Cout]
    return jnp.transpose(out, (0, 3, 1, 2)).astype(jnp.float32)


def _reference(x_nchw, params):
    """Pure-JAX reference (lax.conv, f32) with the same folded-BN eval semantics."""
    w1, b1, g1, be1, m1, v1, w2, b2, g2, be2, m2, v2 = params
    eps = 1e-5
    scale1 = g1 / jnp.sqrt(v1 + eps)
    shift1 = be1 + (b1 - m1) * scale1
    scale2 = g2 / jnp.sqrt(v2 + eps)
    shift2 = be2 + (b2 - m2) * scale2

    dn = lax.conv_dimension_numbers(x_nchw.shape, (1, 1, 3, 3),
                                    ("NCHW", "OIHW", "NCHW"))
    w1_oihw = jnp.transpose(w1, (3, 2, 0, 1))   # HWIO -> OIHW
    w2_oihw = jnp.transpose(w2, (3, 2, 0, 1))

    z1 = lax.conv_general_dilated(x_nchw, w1_oihw, (1, 1), "SAME",
                                  dimension_numbers=dn)
    h1 = jnp.maximum(z1 * scale1[None, :, None, None]
                     + shift1[None, :, None, None], 0.0)
    z2 = lax.conv_general_dilated(h1, w2_oihw, (1, 1), "SAME",
                                  dimension_numbers=dn)
    return jnp.maximum(z2 * scale2[None, :, None, None]
                       + shift2[None, :, None, None], 0.0)


def _init_params(key, in_ch, out_ch):
    ks = jax.random.split(key, 8)
    w1 = 0.1 * jax.random.normal(ks[0], (3, 3, in_ch, out_ch), jnp.float32)   # HWIO
    b1 = 0.1 * jax.random.normal(ks[1], (out_ch,), jnp.float32)
    g1 = 1.0 + 0.1 * jax.random.normal(ks[2], (out_ch,), jnp.float32)
    be1 = 0.1 * jax.random.normal(ks[3], (out_ch,), jnp.float32)
    m1 = 0.05 * jax.random.normal(ks[4], (out_ch,), jnp.float32)
    v1 = 1.0 + 0.1 * jax.random.uniform(ks[5], (out_ch,), jnp.float32)

    w2 = 0.1 * jax.random.normal(ks[6], (3, 3, out_ch, out_ch), jnp.float32)  # HWIO
    b2 = 0.1 * jax.random.normal(ks[7], (out_ch,), jnp.float32)
    g2 = 1.0 + 0.05 * jnp.cos(jnp.arange(out_ch, dtype=jnp.float32))
    be2 = 0.05 * jnp.sin(jnp.arange(out_ch, dtype=jnp.float32))
    m2 = 0.02 * jnp.arange(out_ch, dtype=jnp.float32)
    v2 = 1.0 + 0.03 * jnp.arange(out_ch, dtype=jnp.float32)
    return (w1, b1, g1, be1, m1, v1, w2, b2, g2, be2, m2, v2)


if __name__ == "__main__":
    N, Cin, Cout, H, W = 2, 4, 8, 16, 16
    key = jax.random.PRNGKey(0)
    kx, kp = jax.random.split(key)
    x = jax.random.normal(kx, (N, Cin, H, W), jnp.float32)   # PyTorch-style NCHW
    params = _init_params(kp, Cin, Cout)

    out = double_conv_pallas(x, params)
    out = jax.block_until_ready(out)

    ref = _reference(x, params)
    assert out.shape == (N, Cout, H, W), out.shape
    max_err = float(jnp.max(jnp.abs(out - ref)))
    # bf16 MXU inputs / bf16 intermediate + output (f32 accumulation) -> loose tolerance.
    assert max_err < 5e-2, max_err

    print("KERNEL_OK")
</pallas_src>

<mosaic_0001>
module attributes {stable_mosaic.version = 11 : i64} {
  func.func @_double_conv_kernel(%arg0: i32, %arg1: memref<1x18x16x36xbf16, #tpu.memory_space<vmem>>, %arg2: memref<36x128xbf16, #tpu.memory_space<vmem>>, %arg3: memref<1x128xf32, #tpu.memory_space<vmem>>, %arg4: memref<1152x128xbf16, #tpu.memory_space<vmem>>, %arg5: memref<1x128xf32, #tpu.memory_space<vmem>>, %arg6: memref<1x16x16x128xbf16, #tpu.memory_space<vmem>>, %arg7: memref<1x18x32x128xbf16, #tpu.memory_space<vmem>>) attributes {dimension_semantics = [#tpu.dimension_semantics<parallel>], iteration_bounds = array<i64: 2>, scalar_prefetch = 0 : i64, scratch_operands = 1 : i64, tpu.core_type = #tpu.core_type<tc>, window_params = [{transform_indices = @transform_0, window_bounds = array<i64: 1, 18, 16, 36>}, {pipeline_mode = #tpu.pipeline_mode<synchronous>, transform_indices = @transform_1, window_bounds = array<i64: 36, 128>}, {pipeline_mode = #tpu.pipeline_mode<synchronous>, transform_indices = @transform_2, window_bounds = array<i64: 1, 128>}, {pipeline_mode = #tpu.pipeline_mode<synchronous>, transform_indices = @transform_3, window_bounds = array<i64: 1152, 128>}, {pipeline_mode = #tpu.pipeline_mode<synchronous>, transform_indices = @transform_4, window_bounds = array<i64: 1, 128>}, {transform_indices = @transform_5, window_bounds = array<i64: 1, 16, 16, 128>}]} {
    %c0 = arith.constant 0 : index
    %c0_0 = arith.constant 0 : index
    %c0_1 = arith.constant 0 : index
    %c0_2 = arith.constant 0 : index
    %0 = vector.load %arg1[%c0, %c0_0, %c0_1, %c0_2] : memref<1x18x16x36xbf16, #tpu.memory_space<vmem>>, vector<1x18x16x36xbf16>
    %1 = vector.shape_cast %0 : vector<1x18x16x36xbf16> to vector<288x36xbf16>
    %c0_3 = arith.constant 0 : index
    %c0_4 = arith.constant 0 : index
    %2 = vector.load %arg2[%c0_3, %c0_4] : memref<36x128xbf16, #tpu.memory_space<vmem>>, vector<36x128xbf16>
    %cst = arith.constant dense<0.000000e+00> : vector<288x128xf32>
    %3 = tpu.matmul %1, %2, %cst {dimension_numbers = #tpu.dot_dimension_numbers<[1], [0], [0], [1], [0, 0, 1, 1], [], []>} : vector<288x36xbf16>, vector<36x128xbf16>, vector<288x128xf32> -> vector<288x128xf32>
    %c0_5 = arith.constant 0 : index
    %c0_6 = arith.constant 0 : index
    %4 = vector.load %arg3[%c0_5, %c0_6] : memref<1x128xf32, #tpu.memory_space<vmem>>, vector<1x128xf32>
    %5 = vector.broadcast %4 : vector<1x128xf32> to vector<288x128xf32>
    %6 = arith.addf %3, %5 : vector<288x128xf32>
    %cst_7 = arith.constant 0.000000e+00 : f32
    %7 = vector.broadcast %cst_7 : f32 to vector<288x128xf32>
    %8 = arith.maximumf %6, %7 : vector<288x128xf32>
    %9 = vector.shape_cast %8 : vector<288x128xf32> to vector<1x18x16x128xf32>
    %10 = arith.truncf %9 : vector<1x18x16x128xf32> to vector<1x18x16x128xbf16>
    %c1_i32 = arith.constant 1 : i32
    %c0_i32 = arith.constant 0 : i32
    %11 = arith.cmpi eq, %c1_i32, %c0_i32 : i32
    %c1_i32_8 = arith.constant 1 : i32
    %12 = arith.select %11, %c1_i32_8, %c1_i32 : i32
    %13 = arith.remsi %arg0, %12 : i32
    %c0_i32_9 = arith.constant 0 : i32
    %14 = arith.cmpi ne, %13, %c0_i32_9 : i32
    %c0_i32_10 = arith.constant 0 : i32
    %15 = arith.cmpi slt, %13, %c0_i32_10 : i32
    %c0_i32_11 = arith.constant 0 : i32
    %16 = arith.cmpi slt, %12, %c0_i32_11 : i32
    %17 = arith.xori %15, %16 : i1
    %18 = arith.andi %17, %14 : i1
    %19 = arith.addi %13, %12 : i32
    %20 = arith.select %18, %19, %13 : i32
    %c16_i32 = arith.constant 16 : i32
    %21 = arith.muli %20, %c16_i32 : i32
    %c1_i32_12 = arith.constant 1 : i32
    %22 = arith.subi %21, %c1_i32_12 : i32
    %23 = tpu.iota {dimensions = array<i32: 1>} : vector<1x18x1x1xi32>
    %24 = vector.broadcast %22 : i32 to vector<1x18x1x1xi32>
    %25 = arith.addi %24, %23 : vector<1x18x1x1xi32>
    %c0_i32_13 = arith.constant 0 : i32
    %26 = vector.broadcast %c0_i32_13 : i32 to vector<1x18x1x1xi32>
    %27 = arith.cmpi sge, %25, %26 : vector<1x18x1x1xi32>
    %c16_i32_14 = arith.constant 16 : i32
    %28 = vector.broadcast %c16_i32_14 : i32 to vector<1x18x1x1xi32>
    %29 = arith.cmpi slt, %25, %28 : vector<1x18x1x1xi32>
    %30 = arith.andi %27, %29 : vector<1x18x1x1xi1>
    %cst_15 = arith.constant 0.000000e+00 : bf16
    %31 = vector.broadcast %cst_15 : bf16 to vector<1x18x16x128xbf16>
    %32 = vector.shape_cast %30 : vector<1x18x1x1xi1> to vector<1x18x1x1xi1>
    %33 = vector.broadcast %32 : vector<1x18x1x1xi1> to vector<1x18x16x128xi1>
    %34 = arith.select %33, %10, %31 : vector<1x18x16x128xi1>, vector<1x18x16x128xbf16>
    %cst_16 = arith.constant 0.000000e+00 : bf16
    %35 = vector.broadcast %cst_16 : bf16 to vector<1x18x8x128xbf16>
    %c0_17 = arith.constant 0 : index
    %c0_18 = arith.constant 0 : index
    %c0_19 = arith.constant 0 : index
    %c0_20 = arith.constant 0 : index
    %36 = vector.load %arg7[%c0_17, %c0_18, %c0_19, %c0_20] : memref<1x18x32x128xbf16, #tpu.memory_space<vmem>>, vector<1x18x8x128xbf16>
    tpu.vector_store %arg7[%c0_17, %c0_18, %c0_19, %c0_20], %35 {strides = array<i32>} : memref<1x18x32x128xbf16, #tpu.memory_space<vmem>>, vector<1x18x8x128xbf16>,
    %c0_21 = arith.constant 0 : index
    %c0_22 = arith.constant 0 : index
    %c24 = arith.constant 24 : index
    %c0_23 = arith.constant 0 : index
    %37 = vector.load %arg7[%c0_21, %c0_22, %c24, %c0_23] : memref<1x18x32x128xbf16, #tpu.memory_space<vmem>>, vector<1x18x8x128xbf16>
    tpu.vector_store %arg7[%c0_21, %c0_22, %c24, %c0_23], %35 {strides = array<i32>} : memref<1x18x32x128xbf16, #tpu.memory_space<vmem>>, vector<1x18x8x128xbf16>,
    %c0_24 = arith.constant 0 : index
    %c0_25 = arith.constant 0 : index
    %c8 = arith.constant 8 : index
    %c0_26 = arith.constant 0 : index
    %38 = vector.load %arg7[%c0_24, %c0_25, %c8, %c0_26] : memref<1x18x32x128xbf16, #tpu.memory_space<vmem>>, vector<1x18x16x128xbf16>
    tpu.vector_store %arg7[%c0_24, %c0_25, %c8, %c0_26], %34 {strides = array<i32>} : memref<1x18x32x128xbf16, #tpu.memory_space<vmem>>, vector<1x18x16x128xbf16>,
    %cst_27 = arith.constant 0.000000e+00 : f32
    %39 = vector.broadcast %cst_27 : f32 to vector<256x128xf32>
    %c0_28 = arith.constant 0 : index
    %c0_29 = arith.constant 0 : index
    %c7 = arith.constant 7 : index
    %c0_30 = arith.constant 0 : index
    %40 = vector.load %arg7[%c0_28, %c0_29, %c7, %c0_30] : memref<1x18x32x128xbf16, #tpu.memory_space<vmem>>, vector<1x16x16x128xbf16>
    %41 = vector.shape_cast %40 : vector<1x16x16x128xbf16> to vector<256x128xbf16>
    %c0_31 = arith.constant 0 : index
    %c0_32 = arith.constant 0 : index
    %c8_33 = arith.constant 8 : index
    %c0_34 = arith.constant 0 : index
    %42 = vector.load %arg7[%c0_31, %c0_32, %c8_33, %c0_34] : memref<1x18x32x128xbf16, #tpu.memory_space<vmem>>, vector<1x16x16x128xbf16>
    %43 = vector.shape_cast %42 : vector<1x16x16x128xbf16> to vector<256x128xbf16>
    %c0_35 = arith.constant 0 : index
    %c0_36 = arith.constant 0 : index
    %c9 = arith.constant 9 : index
    %c0_37 = arith.constant 0 : index
    %44 = vector.load %arg7[%c0_35, %c0_36, %c9, %c0_37] : memref<1x18x32x128xbf16, #tpu.memory_space<vmem>>, vector<1x16x16x128xbf16>
    %45 = vector.shape_cast %44 : vector<1x16x16x128xbf16> to vector<256x128xbf16>
    %46 = tpu.concatenate %41, %43, %45 in 1 : vector<256x128xbf16>, vector<256x128xbf16>, vector<256x128xbf16> -> vector<256x384xbf16>
    %c0_38 = arith.constant 0 : index
    %c0_39 = arith.constant 0 : index
    %47 = vector.load %arg4[%c0_38, %c0_39] : memref<1152x128xbf16, #tpu.memory_space<vmem>>, vector<384x128xbf16>
    %cst_40 = arith.constant dense<0.000000e+00> : vector<256x128xf32>
    %48 = tpu.matmul %46, %47, %cst_40 {dimension_numbers = #tpu.dot_dimension_numbers<[1], [0], [0], [1], [0, 0, 1, 1], [], []>} : vector<256x384xbf16>, vector<384x128xbf16>, vector<256x128xf32> -> vector<256x128xf32>
    %49 = arith.addf %39, %48 : vector<256x128xf32>
    %c0_41 = arith.constant 0 : index
    %c1 = arith.constant 1 : index
    %c7_42 = arith.constant 7 : index
    %c0_43 = arith.constant 0 : index
    %50 = vector.load %arg7[%c0_41, %c1, %c7_42, %c0_43] : memref<1x18x32x128xbf16, #tpu.memory_space<vmem>>, vector<1x16x16x128xbf16>
    %51 = vector.shape_cast %50 : vector<1x16x16x128xbf16> to vector<256x128xbf16>
    %c0_44 = arith.constant 0 : index
    %c1_45 = arith.constant 1 : index
    %c8_46 = arith.constant 8 : index
    %c0_47 = arith.constant 0 : index
    %52 = vector.load %arg7[%c0_44, %c1_45, %c8_46, %c0_47] : memref<1x18x32x128xbf16, #tpu.memory_space<vmem>>, vector<1x16x16x128xbf16>
    %53 = vector.shape_cast %52 : vector<1x16x16x128xbf16> to vector<256x128xbf16>
    %c0_48 = arith.constant 0 : index
    %c1_49 = arith.constant 1 : index
    %c9_50 = arith.constant 9 : index
    %c0_51 = arith.constant 0 : index
    %54 = vector.load %arg7[%c0_48, %c1_49, %c9_50, %c0_51] : memref<1x18x32x128xbf16, #tpu.memory_space<vmem>>, vector<1x16x16x128xbf16>
    %55 = vector.shape_cast %54 : vector<1x16x16x128xbf16> to vector<256x128xbf16>
    %56 = tpu.concatenate %51, %53, %55 in 1 : vector<256x128xbf16>, vector<256x128xbf16>, vector<256x128xbf16> -> vector<256x384xbf16>
    %c384 = arith.constant 384 : index
    %c0_52 = arith.constant 0 : index
    %57 = vector.load %arg4[%c384, %c0_52] : memref<1152x128xbf16, #tpu.memory_space<vmem>>, vector<384x128xbf16>
    %cst_53 = arith.constant dense<0.000000e+00> : vector<256x128xf32>
    %58 = tpu.matmul %56, %57, %cst_53 {dimension_numbers = #tpu.dot_dimension_numbers<[1], [0], [0], [1], [0, 0, 1, 1], [], []>} : vector<256x384xbf16>, vector<384x128xbf16>, vector<256x128xf32> -> vector<256x128xf32>
    %59 = arith.addf %49, %58 : vector<256x128xf32>
    %c0_54 = arith.constant 0 : index
    %c2 = arith.constant 2 : index
    %c7_55 = arith.constant 7 : index
    %c0_56 = arith.constant 0 : index
    %60 = vector.load %arg7[%c0_54, %c2, %c7_55, %c0_56] : memref<1x18x32x128xbf16, #tpu.memory_space<vmem>>, vector<1x16x16x128xbf16>
    %61 = vector.shape_cast %60 : vector<1x16x16x128xbf16> to vector<256x128xbf16>
    %c0_57 = arith.constant 0 : index
    %c2_58 = arith.constant 2 : index
    %c8_59 = arith.constant 8 : index
    %c0_60 = arith.constant 0 : index
    %62 = vector.load %arg7[%c0_57, %c2_58, %c8_59, %c0_60] : memref<1x18x32x128xbf16, #tpu.memory_space<vmem>>, vector<1x16x16x128xbf16>
    %63 = vector.shape_cast %62 : vector<1x16x16x128xbf16> to vector<256x128xbf16>
    %c0_61 = arith.constant 0 : index
    %c2_62 = arith.constant 2 : index
    %c9_63 = arith.constant 9 : index
    %c0_64 = arith.constant 0 : index
    %64 = vector.load %arg7[%c0_61, %c2_62, %c9_63, %c0_64] : memref<1x18x32x128xbf16, #tpu.memory_space<vmem>>, vector<1x16x16x128xbf16>
    %65 = vector.shape_cast %64 : vector<1x16x16x128xbf16> to vector<256x128xbf16>
    %66 = tpu.concatenate %61, %63, %65 in 1 : vector<256x128xbf16>, vector<256x128xbf16>, vector<256x128xbf16> -> vector<256x384xbf16>
    %c768 = arith.constant 768 : index
    %c0_65 = arith.constant 0 : index
    %67 = vector.load %arg4[%c768, %c0_65] : memref<1152x128xbf16, #tpu.memory_space<vmem>>, vector<384x128xbf16>
    %cst_66 = arith.constant dense<0.000000e+00> : vector<256x128xf32>
    %68 = tpu.matmul %66, %67, %cst_66 {dimension_numbers = #tpu.dot_dimension_numbers<[1], [0], [0], [1], [0, 0, 1, 1], [], []>} : vector<256x384xbf16>, vector<384x128xbf16>, vector<256x128xf32> -> vector<256x128xf32>
    %69 = arith.addf %59, %68 : vector<256x128xf32>
    %c0_67 = arith.constant 0 : index
    %c0_68 = arith.constant 0 : index
    %70 = vector.load %arg5[%c0_67, %c0_68] : memref<1x128xf32, #tpu.memory_space<vmem>>, vector<1x128xf32>
    %71 = vector.broadcast %70 : vector<1x128xf32> to vector<256x128xf32>
    %72 = arith.addf %69, %71 : vector<256x128xf32>
    %cst_69 = arith.constant 0.000000e+00 : f32
    %73 = vector.broadcast %cst_69 : f32 to vector<256x128xf32>
    %74 = arith.maximumf %72, %73 : vector<256x128xf32>
    %75 = vector.shape_cast %74 : vector<256x128xf32> to vector<1x16x16x128xf32>
    %76 = arith.truncf %75 : vector<1x16x16x128xf32> to vector<1x16x16x128xbf16>
    %c0_70 = arith.constant 0 : index
    %c0_71 = arith.constant 0 : index
    %c0_72 = arith.constant 0 : index
    %c0_73 = arith.constant 0 : index
    %77 = vector.load %arg6[%c0_70, %c0_71, %c0_72, %c0_73] : memref<1x16x16x128xbf16, #tpu.memory_space<vmem>>, vector<1x16x16x128xbf16>
    tpu.vector_store %arg6[%c0_70, %c0_71, %c0_72, %c0_73], %76 {strides = array<i32>} : memref<1x16x16x128xbf16, #tpu.memory_space<vmem>>, vector<1x16x16x128xbf16>,
    return
  }
  func.func @transform_0(%arg0: i32) -> (i32, i32, i32, i32) {
    %c0_i32 = arith.constant 0 : i32
    %c0_i32_0 = arith.constant 0 : i32
    %c0_i32_1 = arith.constant 0 : i32
    %c0_i32_2 = arith.constant 0 : i32
    return %arg0, %c0_i32, %c0_i32_0, %c0_i32_1 : i32, i32, i32, i32
  }
  func.func @transform_1(%arg0: i32) -> (i32, i32) {
    %c0_i32 = arith.constant 0 : i32
    %c0_i32_0 = arith.constant 0 : i32
    %c0_i32_1 = arith.constant 0 : i32
    return %c0_i32, %c0_i32_0 : i32, i32
  }
  func.func @transform_2(%arg0: i32) -> (i32, i32) {
    %c0_i32 = arith.constant 0 : i32
    %c0_i32_0 = arith.constant 0 : i32
    %c0_i32_1 = arith.constant 0 : i32
    return %c0_i32, %c0_i32_0 : i32, i32
  }
  func.func @transform_3(%arg0: i32) -> (i32, i32) {
    %c0_i32 = arith.constant 0 : i32
    %c0_i32_0 = arith.constant 0 : i32
    %c0_i32_1 = arith.constant 0 : i32
    return %c0_i32, %c0_i32_0 : i32, i32
  }
  func.func @transform_4(%arg0: i32) -> (i32, i32) {
    %c0_i32 = arith.constant 0 : i32
    %c0_i32_0 = arith.constant 0 : i32
    %c0_i32_1 = arith.constant 0 : i32
    return %c0_i32, %c0_i32_0 : i32, i32
  }
  func.func @transform_5(%arg0: i32) -> (i32, i32, i32, i32) {
    %c0_i32 = arith.constant 0 : i32
    %c0_i32_0 = arith.constant 0 : i32
    %c0_i32_1 = arith.constant 0 : i32
    %c0_i32_2 = arith.constant 0 : i32
    return %arg0, %c0_i32, %c0_i32_0, %c0_i32_1 : i32, i32, i32, i32
  }
}

</mosaic_0001>

<bundles_post_ra>
// kernel: tpu_custom_call.1
= control target key start
LH: loop header
LB: loop body
LE: loop exit
PB: predicated region body
PF: predicated region fallthrough
CT: control target
= control target key end

     0   :  { %10 = vsyncpa [#allocation4], 0  ;;  %s9501_s0 = inlined_call_operand.hbm [shape: bf16[2,18,16,36], index: 0, kind: input, shape index: {}]   ;;  %s9502_s1 = inlined_call_operand.hbm [shape: bf16[36,128], index: 1, kind: input, shape index: {}]   ;;  %s9503_s2 = inlined_call_operand.vmem [shape: f32[1,128], index: 2, kind: input, shape index: {}]   ;;  %s9504_s3 = inlined_call_operand.hbm [shape: bf16[1152,128], index: 3, kind: input, shape index: {}]   ;;  %s9505_s4 = inlined_call_operand.vmem [shape: f32[1,128], index: 4, kind: input, shape index: {}]   ;;  %s9506_s5 = inlined_call_operand.hbm [shape: bf16[2,16,16,128], index: 5, kind: output, shape index: {}]  }
   0x1   :  { %12 = vsyncpa [#allocation4 + $0x1], 0 }
   0x2   :  { %13 = vsyncpa [#allocation7], 0 }
   0x3   :  { %14 = vsyncpa [#allocation5], 0 }
   0x4   :  { %16 = vsyncpa [#allocation5 + $0x1], 0  ;;  %s7013_s18 = smov 0   ;;  %s7015_s19 = smov 0  }
   0x5   :  { %s7017_s20 = smov 0   ;;  %s7019_s21 = smov 0  }
   0x6 LB: > { %s7034_s22 = sadd.s32 4294967295, %s6972_s21   ;;  %s5443_s23 = sadd.s32 4294967294, %s6972_s21   ;;  %s6972_s21 = sphi %s7019_s21, %s9726_s21   ;;  %s6968_s20 = sphi %s7017_s20, %s9725_s20   ;;  %s6964_s19 = sphi %s7015_s19, %s9724_s19   ;;  %s6960_s18 = sphi %s7013_s18, %s9723_s18  }
   0x7   : > { %p42_p0 = scmp.ne.s32.totalorder %s6964_s19, %s6960_s18  ;;  %p9508_p1 = scmp.eq.s32.totalorder %s7034_s22, 0 }
   0x8   : > { %p150_p2 = scmp.eq.s32.totalorder %s7034_s22, 1  ;;  %p156_p3 = scmp.eq.s32.totalorder %s5443_s23, 1 }
   0x9   : > { %p7043_p4 = por %p9508_p1, %p42_p0  ;;  %p5444_p5 = scmp.ge.s32.totalorder %s6972_s21, 1 }
   0xa   : > { %p7048_p6 = por %p156_p3, %p42_p0  ;;  %p163_p7 = scmp.lt.s32.totalorder %s6972_s21, 3 }
   0xb   : > { %s9576_s24 = scalar_select %p7043_p4, 1, 0 }
   0xc   : > { %s9577_s25 = scalar_select %p7048_p6, 1, 0 }
   0xd   : > { %p7053_p8 = pnand %p5444_p5, %p163_p7  ;;  %s6974_s27 = smov [#allocation6]  }
   0xe   : > { %s175_s28 = sshll.u32 %s6974_s27, 4  ;;  %s6975_s30 = smov [#allocation8]   ;;  %s176_s28 = int_to_ptr.vmem [resolvable:$true] %s175_s28 }
   0xf   : > { %s9578_s26 = scalar_select %p7053_p8, 1, 0 }
  0x10   : > { %p6622_p9 = pneg %p7053_p8  ;;  %s191_s6 = sshll.u32 %s6975_s30, 4  ;;  %s192_s6 = int_to_ptr.vmem [resolvable:$true] %s191_s6 }
  0x11   : > { %s6835_s7 = scalar_lea.vmem %s176_s28, 320  ;;  %p6843_p5 = scmp.lt.s32.totalorder %s176_s28, %s176_s28 }
  0x12   : > { %p7062_p11 = pnand %p6622_p9, %p9508_p1  ;;  %p6836_p13 = scmp.ne.s32.totalorder %s176_s28, %s6835_s7 }
  0x13   : > { %p6844_p7 = scmp.lt.s32.totalorder %s6835_s7, %s6835_s7 }
  0x14   : > { %p6826_p12 = pneg %p7062_p11 }
  0x15   : > { %p6845_p10 = por %p6844_p7, %p6843_p5 }
  0x16   : > { %p6838_p0 = pnand %p6836_p13, %p6826_p12 }
  0x18   : > { %p6839_p3 = pneg %p6838_p0 }
  0x1a   : > { %p6846_p9 = pnand %p6845_p10, %p6839_p3 }
  0x1c   : > { %6849 = shalt.err (!%p6846_p9)
}
  0x1d   : > { %s9507_s8 = smov 64   ;;  %s6977_s9 = smov 4  }
  0x1e   : > { %6625 = dma.hbm_to_vmem [thread:$0]  (!%p7062_p11), %s9502_s1, 320, %s176_s28, [#allocation7], %s9507_s8, %s9507_s8, %s6977_s9  }
  0x1f   : > { %s6861_s12 = scalar_lea.vmem %s192_s6, 9216  ;;  %p6869_p10 = scmp.lt.s32.totalorder %s192_s6, %s192_s6 }
  0x20   : > { %p6862_p13 = scmp.ne.s32.totalorder %s192_s6, %s6861_s12  ;;  %p6870_p3 = scmp.lt.s32.totalorder %s6861_s12, %s6861_s12 }
  0x22   : > { %p6864_p0 = pnand %p6862_p13, %p6826_p12  ;;  %p6871_p7 = por %p6870_p3, %p6869_p10 }
  0x24   : > { %p6865_p5 = pneg %p6864_p0 }
  0x26   : > { %p6872_p9 = pnand %p6871_p7, %p6865_p5 }
  0x28   : > { %6875 = shalt.err (!%p6872_p9)
}
  0x29   : > { %6628 = dma.hbm_to_vmem [thread:$0]  (!%p7062_p11), %s9504_s3, 9216, %s192_s6, [#allocation7], %s9507_s8, %s9507_s8, %s6977_s9  }
  0x2a   : > { %s7091_s15 = sadd.s32 1, %s6972_s21   ;;  %s29_s16 = sadd.s32 1, %s6968_s20 }
  0x2b   : > { %s26_s17 = ssub.s32 %s6972_s21, %s7091_s15  ;;  %p36_p12 = scmp.ne.s32.totalorder %s6968_s20, %s6964_s19 }
  0x2c   : > { %p27_p13 = scmp.eq.s32.totalorder %s26_s17, 0  ;;  %p37_p0 = scmp.eq.s32.totalorder %s6972_s21, 0 }
  0x2d   : > { %p7101_p5 = por %p150_p2, %p36_p12  ;;  %p6639_p10 = scmp.lt.s32.totalorder %s6972_s21, 2 }
  0x2e   : > { %s7107_s27 = scalar_select %p27_p13, %s6968_s20, %s29_s16  }
  0x2f   : > { %s9580_s23 = scalar_select %p7101_p5, 1, 0 }
  0x30   : > { %p38_p3 = por %p37_p0, %p36_p12  ;;  %s208_s28 = sand.u32 1, %s6968_s20  }
  0x31   : > { %s6607_s29 = smul.u32 144, %s208_s28  ;;  %s7122_s14 = scalar_lea.sflag [#allocation4], %s208_s28 }
  0x32   : > { %s6608_s30 = smul.u32 2304, %s6972_s21  ;;  %p7111_p11 = pnand %p6639_p10, %p38_p3 }
  0x33   : > { %s212_s12 = scalar_lea.vmem [#allocation3], %s6607_s29 }
  0x34   : > { %s7118_s11 = scalar_lea.hbm %s9501_s0, %s6608_s30  ;;  %s219_s13 = sshll.u32 %s212_s12, 4  ;;  %s7120_s13 = int_to_ptr.vmem [resolvable:$true] %s219_s13 }
  0x35   : > { %s6876_s16 = scalar_lea.hbm %s7118_s11, 2304  ;;  %p6878_p7 = pneg %p7111_p11 }
  0x36   : > { %p6877_p2 = scmp.ne.s32.totalorder %s7118_s11, %s6876_s16  ;;  %s6881_s30 = scalar_lea.hbm %s9501_s0, 4608 }
  0x37   : > { %p6882_p13 = scmp.lt.s32.totalorder %s7118_s11, %s9501_s0  ;;  %p6883_p0 = scmp.lt.s32.totalorder %s6881_s30, %s6876_s16 }
  0x38   : > { %p6879_p9 = pnand %p6878_p7, %p6877_p2 }
  0x39   : > { %p6884_p10 = por %p6883_p0, %p6882_p13 }
  0x3a   : > { %p6880_p12 = pneg %p6879_p9 }
  0x3c   : > { %p6885_p3 = pnand %p6884_p10, %p6880_p12 }
  0x3e   : > { %6888 = shalt.err (!%p6885_p3)
}
  0x3f   : > { %s6889_s28 = scalar_lea.vmem %s7120_s13, 2304  ;;  %s6978_s29 = smov [#allocation3]  }
  0x40   : > { %p6890_p1 = scmp.ne.s32.totalorder %s7120_s13, %s6889_s28  ;;  %s6894_s12 = sshll.u32 %s6978_s29, 4  ;;  %s6895_s12 = int_to_ptr.vmem [resolvable:$false] %s6894_s12 }
  0x41   : > { %s6896_s17 = scalar_lea.vmem %s6895_s12, 4608  ;;  %p6897_p9 = scmp.lt.s32.totalorder %s7120_s13, %s6895_s12 }
  0x42   : > { %p6892_p6 = pnand %p6890_p1, %p6878_p7  ;;  %p6898_p5 = scmp.lt.s32.totalorder %s6896_s17, %s6889_s28 }
  0x44   : > { %p6893_p2 = pneg %p6892_p6  ;;  %p6899_p4 = por %p6898_p5, %p6897_p9 }
  0x46   : > { %p6900_p8 = pnand %p6899_p4, %p6893_p2 }
  0x48   : > { %6903 = shalt.err (!%p6900_p8)
}
  0x49   : > { %s9582_s8 = smov 64   ;;  %p9583_p1 = scmp.ne.s32.totalorder %s9578_s26, 0 }
  0x4a   : > { %6632 = dma.hbm_to_vmem [thread:$0]  (!%p7111_p11), %s7118_s11, 2304, %s7120_s13, %s7122_s14, %s9582_s8, %s9582_s8, %s6977_s9  }
  0x4b   : > { %231 = sbr.rel (%p9583_p1) target bundleno = 923 (0x39b), region = 40 }
  0x50   : > { %s7149_s16 = sand.u32 1, %s6964_s19   ;;  %p9584_p4 = scmp.ne.s32.totalorder %s9576_s24, 0 }
  0x51   : > { %s6609_s7 = smul.u32 144, %s7149_s16  ;;  %s234_s30 = scalar_lea.sflag [#allocation4], %s7149_s16 }
  0x53   : > { %s7153_s10 = scalar_lea.vmem [#allocation3], %s6609_s7 }
  0x54   : > { %6947 = dma.done.wait (%p9584_p4), %s234_s30, 2304  }
  0x55   : > { %6949 = vsyncadd (%p9584_p4), %s234_s30, 4294964992  ;;  %p9585_p6 = scmp.eq.s32.totalorder %s7034_s22, 0 }
  0x57   : > { %6951 = dma.done.wait (%p9585_p6), [#allocation7], 9536   ;;  %p9586_p8 = pmov %p9585_p6 }
  0x58   : > { %vm481_vm0 = vcmask 1041408   ;;  %v6682_v0 = vld [vmem:[#allocation6 + $0x10] ss:$0 sps:$4 sm:$0x33]   ;;  %v6683_v1 = vld [vmem:[#allocation6 + $0x8] sm:$0xff]   ;;  %vm426_vm1 = vcmask 293888  }
  0x59   : > { %6953 = vsyncadd (%p9586_p8), [#allocation7], 4294957760  ;;  %6606 = vmatprep.subr.msk.bf16.mxu0 %vm481_vm0, %v6682_v0  ;;  %v483_v2 = vsel %vm481_vm0, %v6682_v0, 0  ;;  %v6685_v3 = vld [vmem:[%s7153_s10] sm:$0xff]   ;;  %v6686_v5 = vld [vmem:[%s7153_s10 + $0x8] sm:$0xff]   ;;  %v6979_v34 = vmov 0  }
  0x5a   : > { %6421 = vmatpush3.bf16.msra.mxu0 %v483_v2  ;;  %v6684_v4 = vld [vmem:[#allocation6] sm:$0xff]   ;;  %6426 = vmatprep.mubr.msk.bf16.mxu0 %vm426_vm1, %v6685_v3  ;;  %v6688_v7 = vld [vmem:[%s7153_s10 + $0x18] sm:$0xff]   ;;  %v6690_v11 = vld [vmem:[%s7153_s10 + $0x28] sm:$0xff]   ;;  %735 = vst [vmem:[#allocation2 + $0x10] sm:$0xf] %v6979_v34  ;;  %s5452_s11 = sshll.u32 %s7149_s16, 7 }
  0x5b   : > { %6422 = vmatprep.subr.bf16.mxu0 %v6683_v1  ;;  %v6687_v6 = vld [vmem:[%s7153_s10 + $0x10] sm:$0xff]   ;;  %v6689_v8 = vld [vmem:[%s7153_s10 + $0x20] sm:$0xff]   ;;  %v6692_v13 = vld [vmem:[%s7153_s10 + $0x38] sm:$0xff]   ;;  %734 = vst [vmem:[#allocation2] sm:$0xf] %v6979_v34  ;;  %s9377_s13 = scalar_lea.vmem [#allocation9], %s5452_s11 }
  0x5c   : > { %v6703_v9 = vld [vmem:[#allocation8 + $0x138] sm:$0xff]   ;;  %v6705_v24 = vld [vmem:[#allocation8 + $0x130] sm:$0xff]   ;;  %v6707_v26 = vld [vmem:[#allocation8 + $0x128] sm:$0xff]   ;;  %736 = vst [vmem:[#allocation2 + $0x20] sm:$0xf] %v6979_v34  ;;  %s5895_s14 = sshll.u32 %s7034_s22, 11 }
  0x5d   : > { %v6704_v10 = vld [vmem:[#allocation8 + $0xf8] sm:$0xff]   ;;  %6012 = vmatprep.subr.bf16.mxu1 %v6703_v9  ;;  %v6706_v25 = vld [vmem:[#allocation8 + $0xf0] sm:$0xff]   ;;  %v6708_v27 = vld [vmem:[#allocation8 + $0xe8] sm:$0xff]   ;;  %737 = vst [vmem:[#allocation2 + $0x30] sm:$0xf] %v6979_v34  ;;  %s5351_s28 = sshll.u32 %s9377_s13, 4  ;;  %s9455_s17 = scalar_lea.hbm %s9506_s5, %s5895_s14  ;;  %s9457_s28 = int_to_ptr.vmem [resolvable:$true] %s5351_s28 }
  0x5e   : > { %6423 = vmatpush3.bf16.msra.mxu0 %v6683_v1  ;;  %6013 = vmatpush3.bf16.msra.mxu1 %v6704_v10  ;;  %v6691_v12 = vld [vmem:[%s7153_s10 + $0x30] sm:$0xff]   ;;  %v6693_v14 = vld [vmem:[%s7153_s10 + $0x40] sm:$0xff]   ;;  %v6694_v15 = vld [vmem:[%s7153_s10 + $0x48] sm:$0xff]   ;;  %738 = vst [vmem:[#allocation2 + $0x40] sm:$0xf] %v6979_v34  ;;  %v5493_v10 = vcombine.low %v6979_v34, %v6979_v34  ;;  %s5338_s8 = scalar_lea.sflag [#allocation5], %s7149_s16 }
  0x5f   : > { %6424 = vmatprep.subr.bf16.mxu0 %v6684_v4  ;;  %v6695_v16 = vld [vmem:[%s7153_s10 + $0x50] sm:$0xff]   ;;  %v6696_v17 = vld [vmem:[%s7153_s10 + $0x58] sm:$0xff]   ;;  %v6697_v18 = vld [vmem:[%s7153_s10 + $0x60] sm:$0xff]   ;;  %6014 = vmatprep.subr.bf16.mxu1 %v6705_v24  ;;  %739 = vst [vmem:[#allocation2 + $0x50] sm:$0xf] %v6979_v34  ;;  %s6904_s7 = scalar_lea.vmem %s9457_s28, 2048 }
  0x60   : > { %v6698_v19 = vld [vmem:[%s7153_s10 + $0x68] sm:$0xff]   ;;  %v6699_v20 = vld [vmem:[%s7153_s10 + $0x70] sm:$0xff]   ;;  %v6700_v21 = vld [vmem:[%s7153_s10 + $0x78] sm:$0xff]   ;;  %740 = vst [vmem:[#allocation2 + $0x60] sm:$0xf] %v6979_v34  ;;  %p6905_p5 = scmp.ne.s32.totalorder %s9457_s28, %s6904_s7  ;;  %p9720_p11 = scmp.ne.s32.totalorder %s9580_s23, 0 }
  0x61   : > { %v6701_v22 = vld [vmem:[%s7153_s10 + $0x80] sm:$0xff]   ;;  %v6702_v23 = vld [vmem:[%s7153_s10 + $0x88] sm:$0xff]   ;;  %741 = vst [vmem:[#allocation2 + $0x70] sm:$0xf] %v6979_v34  ;;  %742 = vst [vmem:[#allocation2 + $0x80] sm:$0xf] %v6979_v34 }
  0x62   : > { %6425 = vmatpush3.bf16.msra.mxu0 %v6684_v4  ;;  %6015 = vmatpush3.bf16.msra.mxu1 %v6706_v25  ;;  %v6709_v28 = vld [vmem:[#allocation8 + $0x120] sm:$0xff]   ;;  %v6710_v29 = vld [vmem:[#allocation8 + $0x178] sm:$0xff]   ;;  %v6713_v32 = vld [vmem:[#allocation8 + $0x170] sm:$0xff]   ;;  %743 = vst [vmem:[#allocation2 + $0x90] sm:$0xf] %v6979_v34  ;;  %p6906_p7 = pnand %p6905_p5, %p9720_p11  ;;  %s6980_s22 = smov [#allocation9]  }
  0x63   : > { %6016 = vmatprep.subr.bf16.mxu1 %v6707_v26  ;;  %v6711_v30 = vld [vmem:[#allocation8 + $0xe0] sm:$0xff]   ;;  %6462 = vmatprep.subr.bf16.mxu0 %v6710_v29  ;;  %v6712_v31 = vld [vmem:[#allocation8 + $0x118] sm:$0xff]   ;;  %744 = vst [vmem:[#allocation2 + $0xa0] sm:$0xf] %v6979_v34  ;;  %745 = vst [vmem:[#allocation2 + $0xb0] sm:$0xf] %v6979_v34 }
  0x64   : > { %v6714_v33 = vld [vmem:[#allocation8 + $0xd8] sm:$0xff]   ;;  %746 = vst [vmem:[#allocation2 + $0xc0] sm:$0xf] %v6979_v34  ;;  %747 = vst [vmem:[#allocation2 + $0xd0] sm:$0xf] %v6979_v34  ;;  %v6715_v35 = vld [vmem:[#allocation8 + $0x110] sm:$0xff]   ;;  %p6907_p12 = pneg %p6906_p7 }
  0x65   : > { %6427 = vmatmul.mubr.msk.bf16.vlgmr.msra.gmra.mxu0 %vm426_vm1, %v6686_v5  ;;  %748 = vst [vmem:[#allocation2 + $0xe0] sm:$0xf] %v6979_v34  ;;  %749 = vst [vmem:[#allocation2 + $0xf0] sm:$0xf] %v6979_v34  ;;  %v6716_v36 = vld [vmem:[#allocation8 + $0x168] sm:$0xff]   ;;  %v6717_v37 = vld [vmem:[#allocation8 + $0xd0] sm:$0xff]  }
  0x66   : > { %6430 = vmatprep.mubr.msk.bf16.mxu0 %vm426_vm1, %v6687_v6  ;;  %6017 = vmatpush3.bf16.msra.mxu1 %v6708_v27  ;;  %750 = vst [vmem:[#allocation2 + $0x100] sm:$0xf] %v6979_v34  ;;  %751 = vst [vmem:[#allocation2 + $0x110] sm:$0xf] %v6979_v34  ;;  %v6718_v38 = vld [vmem:[#allocation8 + $0x108] sm:$0xff]   ;;  %v6719_v39 = vld [vmem:[#allocation8 + $0x160] sm:$0xff]  }
  0x67   : > { %6018 = vmatprep.subr.bf16.mxu1 %v6709_v28  ;;  %6463 = vmatpush3.bf16.msra.mxu0 %v6710_v29  ;;  %752 = vst [vmem:[#allocation2 + $0xc] sm:$0xf] %v6979_v34  ;;  %753 = vst [vmem:[#allocation2 + $0x1c] sm:$0xf] %v6979_v34  ;;  %v6720_v40 = vld [vmem:[#allocation8 + $0xc8] sm:$0xff]   ;;  %v6722_v41 = vld [vmem:[#allocation8 + $0x100] sm:$0xff]  }
  0x68   : > { %754 = vst [vmem:[#allocation2 + $0x2c] sm:$0xf] %v6979_v34  ;;  %755 = vst [vmem:[#allocation2 + $0x3c] sm:$0xf] %v6979_v34  ;;  %6464 = vmatprep.subr.bf16.mxu0 %v6713_v32  ;;  %v6723_v42 = vld [vmem:[#allocation8 + $0x158] sm:$0xff]   ;;  %v6724_v43 = vld [vmem:[#allocation8 + $0xc0] sm:$0xff]  }
  0x69   : > { %756 = vst [vmem:[#allocation2 + $0x4c] sm:$0xf] %v6979_v34  ;;  %757 = vst [vmem:[#allocation2 + $0x5c] sm:$0xf] %v6979_v34  ;;  %v6725_v44 = vld [vmem:[#allocation8 + $0x150] sm:$0xff]   ;;  %v6728_v45 = vld [vmem:[#allocation8 + $0x148] sm:$0xff]  }
  0x6a   : > { %6019 = vmatpush3.bf16.msra.mxu1 %v6711_v30  ;;  %758 = vst [vmem:[#allocation2 + $0x6c] sm:$0xf] %v6979_v34  ;;  %759 = vst [vmem:[#allocation2 + $0x7c] sm:$0xf] %v6979_v34  ;;  %v7235_v46 = vld [vmem:[#allocation8 + $0xb8] sm:$0xff]   ;;  %v6729_v47 = vld [vmem:[#allocation8 + $0x140] sm:$0xff]  }
  0x6b   : > { %760 = vst [vmem:[#allocation2 + $0x8c] sm:$0xf] %v6979_v34  ;;  %761 = vst [vmem:[#allocation2 + $0x9c] sm:$0xf] %v6979_v34  ;;  %6020 = vmatprep.subr.bf16.mxu1 %v6712_v31  ;;  %6465 = vmatpush3.bf16.msra.mxu0 %v6713_v32  ;;  %v6737_v48 = vld [vmem:[#allocation8 + $0x78] sm:$0xff]   ;;  %s6908_s30 = sshll.u32 %s6980_s22, 4  ;;  %s6909_s30 = int_to_ptr.vmem [resolvable:$false] %s6908_s30 }
  0x6c   : > { %762 = vst [vmem:[#allocation2 + $0xac] sm:$0xf] %v6979_v34  ;;  %763 = vst [vmem:[#allocation2 + $0xbc] sm:$0xf] %v6979_v34  ;;  %6466 = vmatprep.subr.bf16.mxu0 %v6716_v36  ;;  %v1851_v49 = vld [vmem:[#allocation2 + $0x10] sm:$0x8]  ;;  %p6911_p13 = scmp.lt.s32.totalorder %s9457_s28, %s6909_s30 }
  0x6d   : > { %6431 = vmatmul.mubr.msk.bf16.gmra.mxu0 %vm426_vm1, %v6688_v7  ;;  %764 = vst [vmem:[#allocation2 + $0xcc] sm:$0xf] %v6979_v34  ;;  %765 = vst [vmem:[#allocation2 + $0xdc] sm:$0xf] %v6979_v34  ;;  %v1900_v51 = vshrl.u32 %v1851_v49, 16  ;;  %s6910_s10 = scalar_lea.vmem %s6909_s30, 4096 }
  0x6e   : > { %6434 = vmatprep.mubr.msk.bf16.mxu0 %vm426_vm1, %v6689_v8  ;;  %766 = vst [vmem:[#allocation2 + $0xec] sm:$0xf] %v6979_v34  ;;  %767 = vst [vmem:[#allocation2 + $0xfc] sm:$0xf] %v6979_v34  ;;  %6021 = vmatpush3.bf16.msra.mxu1 %v6714_v33  ;;  %v2251_v50 = vld [vmem:[#allocation2 + $0x1c] sm:$0x1]  ;;  %p6912_p0 = scmp.lt.s32.totalorder %s6910_s10, %s6904_s7 }
  0x6f   : > { %768 = vst [vmem:[#allocation2 + $0x10c] sm:$0xf] %v6979_v34  ;;  %769 = vst [vmem:[#allocation2 + $0x11c] sm:$0xf] %v6979_v34  ;;  %6022 = vmatprep.subr.bf16.mxu1 %v6715_v35  ;;  %6467 = vmatpush3.bf16.msra.mxu0 %v6716_v36  ;;  %v2277_v52 = vshll.u32 %v2251_v50, 16  ;;  %v7238_v58 = vrot.slane %v1900_v51, 11 }
  0x70   : > { %6468 = vmatprep.subr.bf16.mxu0 %v6719_v39  ;;  %v1854_v53 = vld [vmem:[#allocation2 + $0x20] sm:$0x8]  ;;  %v2253_v54 = vld [vmem:[#allocation2 + $0x3c] sm:$0x1]  ;;  %v1857_v55 = vld [vmem:[#allocation2 + $0x30] sm:$0x8]  ;;  %p6913_p10 = por %p6912_p0, %p6911_p13 }
  0x71   : > { %v2252_v56 = vld [vmem:[#allocation2 + $0x2c] sm:$0x1]  ;;  %v2255_v57 = vld [vmem:[#allocation2 + $0x5c] sm:$0x1]  ;;  %v7240_v59 = vrot.slane %v2277_v52, 5  ;;  %v1922_v60 = vshrl.u32 %v1854_v53, 16 }
  0x72   : > { %6023 = vmatpush3.bf16.msra.mxu1 %v6717_v37  ;;  %v2305_v61 = vshll.u32 %v2253_v54, 16  ;;  %v1944_v62 = vshrl.u32 %v1857_v55, 16  ;;  %v1860_v63 = vld [vmem:[#allocation2 + $0x40] sm:$0x8]  ;;  %v2291_v0 = vshll.u32 %v2252_v56, 16  ;;  %v2333_v2 = vshll.u32 %v2255_v57, 16  ;;  %p6914_p3 = pnand %p6913_p10, %p6907_p12 }
  0x73   : > { %6024 = vmatprep.subr.bf16.mxu1 %v6718_v38  ;;  %6469 = vmatpush3.bf16.msra.mxu0 %v6719_v39  ;;  %v2254_v1 = vld [vmem:[#allocation2 + $0x4c] sm:$0x1]  ;;  %v1863_v3 = vld [vmem:[#allocation2 + $0x50] sm:$0x8]  ;;  %v2257_v5 = vld [vmem:[#allocation2 + $0x7c] sm:$0x1] }
  0x74   : > { %6470 = vmatprep.subr.bf16.mxu0 %v6723_v42  ;;  %v2256_v4 = vld [vmem:[#allocation2 + $0x6c] sm:$0x1]  ;;  %v1866_v7 = vld [vmem:[#allocation2 + $0x60] sm:$0x8]  ;;  %v2259_v8 = vld [vmem:[#allocation2 + $0x9c] sm:$0x1] }
  0x75   : > { %6435 = vmatmul.mubr.msk.bf16.gmra.mxu0 %vm426_vm1, %v6690_v11  ;;  %v2258_v6 = vld [vmem:[#allocation2 + $0x8c] sm:$0x1]  ;;  %v1869_v9 = vld [vmem:[#allocation2 + $0x70] sm:$0x8]  ;;  %v5494_v11 = vcombine.high %v6979_v34, %v6979_v34  ;;  %896 = vst [vmem:[#allocation2 + $0x4] sm:$0xf] %v5493_v10 }
  0x76   : > { %6438 = vmatprep.mubr.msk.bf16.mxu0 %vm426_vm1, %v6691_v12  ;;  %6025 = vmatpush3.bf16.msra.mxu1 %v6720_v40  ;;  %v2319_v12 = vshll.u32 %v2254_v1, 16  ;;  %930 = vst [vmem:[#allocation2 + $0x114] sm:$0xf] %v5493_v10  ;;  %v7248_v24 = vrot.slane %v2305_v61, 5  ;;  %v7250_v25 = vrot.slane %v1944_v62, 11  ;;  %v7252_v29 = vrot.slane %v2291_v0, 5 }
  0x77   : > { %6026 = vmatprep.subr.bf16.mxu1 %v6722_v41  ;;  %6471 = vmatpush3.bf16.msra.mxu0 %v6723_v42  ;;  %897 = vst [vmem:[#allocation2 + $0x8] sm:$0xf] %v5494_v11  ;;  %931 = vst [vmem:[#allocation2 + $0x118] sm:$0xf] %v5494_v11  ;;  %v1872_v28 = vld [vmem:[#allocation2 + $0x80] sm:$0x8] }
  0x78   : > { %6472 = vmatprep.subr.bf16.mxu0 %v6725_v44  ;;  %v7254_v30 = vrot.slane %v2319_v12, 5  ;;  %v7256_v31 = vrot.slane %v2333_v2, 5  ;;  %v7263_v33 = vld [vmem:[%s9503_s2] ss:$0 sm:$0xff]  ;;  %v2054_v41 = vshrl.u32 %v1872_v28, 16 }
  0x79   : > { %v1875_v42 = vld [vmem:[#allocation2 + $0x90] sm:$0x8]  ;;  %vm980_vm2 = vsmask.f32 256  ;;  %vm981_vm3 = vsmask.f32 4368 }
  0x7a   : > { %6027 = vmatpush3.bf16.msra.mxu1 %v6724_v43  ;;  %v2264_v49 = vld [vmem:[#allocation2 + $0xec] sm:$0x1]  ;;  %v2265_v53 = vld [vmem:[#allocation2 + $0xfc] sm:$0x1]  ;;  %v932_v56 = vld [vmem:[#allocation2] sm:$0x8] }
  0x7b   : > { %6473 = vmatpush3.bf16.msra.mxu0 %v6725_v44  ;;  %6510 = vmatprep.subr.bf16.mxu1 %v7235_v46  ;;  %v7290_v61 = vrot.slane %v2054_v41, 11  ;;  %v935_v0 = vld [vmem:[#allocation2 + $0x10] sm:$0x8]  ;;  %v2459_v2 = vshll.u32 %v2264_v49, 16  ;;  %vm1351_vm4 = vsmask.f32 3328  ;;  %vm7317_vm6 = vmor %vm980_vm2, %vm981_vm3 }
  0x7c   : > { %6474 = vmatprep.subr.bf16.mxu0 %v6728_v45  ;;  %v7283_v50 = vld [vmem:[#allocation2 + $0x4] sm:$0xf]  ;;  %vm1352_vm5 = vsmask.f32 7440 }
  0x7d   : > { %6439 = vmatmul.mubr.msk.bf16.gmra.mxu0 %vm426_vm1, %v6692_v13  ;;  %v1966_v13 = vshrl.u32 %v1860_v63, 16  ;;  %v989_v54 = vshrl.u32 %v7283_v50, 16  ;;  %v2076_v63 = vshrl.u32 %v1875_v42, 16  ;;  %vm7354_vm7 = vmor %vm1351_vm4, %vm1352_vm5 }
  0x7e   : > { %6442 = vmatprep.mubr.msk.bf16.mxu0 %vm426_vm1, %v6693_v14  ;;  %v2260_v14 = vld [vmem:[#allocation2 + $0xac] sm:$0x1]  ;;  %v7285_v51 = vld [vmem:[#allocation2 + $0x8] sm:$0xf] }
  0x7f   : > { %6475 = vmatpush3.bf16.msra.mxu0 %v6728_v45  ;;  %v2403_v26 = vshll.u32 %v2260_v14, 16  ;;  %v7258_v32 = vrot.slane %v1966_v13, 11  ;;  %v2262_v45 = vld [vmem:[#allocation2 + $0xcc] sm:$0x1]  ;;  %v998_v55 = vshrl.u32 %v7285_v51, 16  ;;  %v9512_v13 = vshll.u32 %v7285_v51, 16 }
  0x80   : > { %6476 = vmatprep.subr.bf16.mxu0 %v6729_v47  ;;  %v938_v14 = vld [vmem:[#allocation2 + $0x20] sm:$0x8] }
  0x81   : > { %v7279_v43 = vrot.slane %v2403_v26, 5  ;;  %v1000_v12 = vrot.slane %v998_v55, 7  ;;  %v7301_v26 = vrot.slane %v2459_v2, 5 }
  0x83   : > { %6477 = vmatpush3.bf16.msra.mxu0 %v6729_v47  ;;  %v2263_v47 = vld [vmem:[#allocation2 + $0xdc] sm:$0x1] }
  0x84   : > { %6148 = vmatprep.subr.bf16.mxu0 %v6737_v48  ;;  %v2445_v62 = vshll.u32 %v2263_v47, 16  ;;  %v1028_v47 = vshrl.u32 %v938_v14, 16 }
  0x85   : > { %6443 = vmatmul.mubr.msk.bf16.gmra.mxu0 %vm426_vm1, %v6694_v15  ;;  %v2261_v15 = vld [vmem:[#allocation2 + $0xbc] sm:$0x1] }
  0x86   : > { %6446 = vmatprep.mubr.msk.bf16.mxu0 %vm426_vm1, %v6695_v16  ;;  %v2347_v16 = vshll.u32 %v2256_v4, 16  ;;  %v2417_v27 = vshll.u32 %v2261_v15, 16  ;;  %v1878_v4 = vld [vmem:[#allocation2 + $0xa0] sm:$0x8] }
  0x88   : > { %v7265_v34 = vrot.slane %v2347_v16, 5  ;;  %v7281_v44 = vrot.slane %v2417_v27, 5  ;;  %v7295_v16 = vrot.slane %v2076_v63, 11  ;;  %v1881_v27 = vld [vmem:[#allocation2 + $0xb0] sm:$0x8] }
  0x89   : > { %v2120_v63 = vshrl.u32 %v1881_v27, 16 }
  0x8d   : > { %6447 = vmatmul.mubr.msk.bf16.gmra.mxu0 %vm426_vm1, %v6696_v17  ;;  %v1988_v17 = vshrl.u32 %v1863_v3, 16  ;;  %v2266_v3 = vld [vmem:[#allocation2 + $0x10c] sm:$0x1] }
  0x8e   : > { %6450 = vmatprep.mubr.msk.bf16.mxu0 %vm426_vm1, %v6697_v18  ;;  %v2361_v18 = vshll.u32 %v2257_v5, 16 }
  0x8f   : > { %v7267_v35 = vrot.slane %v1988_v17, 11  ;;  %v2487_v17 = vshll.u32 %v2266_v3, 16 }
  0x90   : > { %v7269_v36 = vrot.slane %v2361_v18, 5  ;;  %v2098_v18 = vshrl.u32 %v1878_v4, 16  ;;  %v7321_v4 = vrot.slane %v989_v54, 4 }
  0x92   : > { %9589 = vst [vmem:[#allocation13_spill] sm:$0xff] %v7321_v4 }
  0x95   : > { %6451 = vmatmul.mubr.msk.bf16.gmra.mxu0 %vm426_vm1, %v6698_v19  ;;  %v2375_v19 = vshll.u32 %v2258_v6, 16  ;;  %v2473_v6 = vshll.u32 %v2265_v53, 16  ;;  %v1003_v53 = vor.u32 %v9512_v13, %v1000_v12 }
  0x96   : > { %6454 = vmatprep.mubr.msk.bf16.mxu0 %vm426_vm1, %v6699_v20  ;;  %v7246_v20 = vrot.slane %v1922_v60, 11  ;;  %v2431_v60 = vshll.u32 %v2262_v45, 16 }
  0x97   : > { %v7271_v37 = vrot.slane %v2375_v19, 5  ;;  %v1006_v19 = vshrl.u32 %v935_v0, 16  ;;  %v7303_v41 = vrot.slane %v2473_v6, 5 }
  0x99   : > { %v7312_v0 = vrot.slane %v1006_v19, 11 }
  0x9d   : > { %6455 = vmatmul.mubr.msk.bf16.gmra.mxu0 %vm426_vm1, %v6700_v21  ;;  %v2010_v21 = vshrl.u32 %v1866_v7, 16  ;;  %v991_v7 = vrot.slane %v989_v54, 7  ;;  %v1884_v54 = vld [vmem:[#allocation2 + $0xc0] sm:$0x8] }
  0x9e   : > { %6458 = vmatprep.mubr.msk.bf16.mxu0 %vm426_vm1, %v6701_v22  ;;  %v2389_v22 = vshll.u32 %v2259_v8, 16  ;;  %v992_v8 = vshll.u32 %v7283_v50, 16  ;;  %v2142_v27 = vshrl.u32 %v1884_v54, 16 }
  0x9f   : > { %v7273_v38 = vrot.slane %v2010_v21, 11 }
  0xa0   : > { %v7275_v39 = vrot.slane %v2389_v22, 5  ;;  %v7297_v22 = vrot.slane %v2431_v60, 5  ;;  %v994_v42 = vor.u32 %v992_v8, %v991_v7  ;;  %v7308_v60 = vrot.slane %v2487_v17, 5 }
  0xa5   : > { %6459 = vmatmul.mubr.msk.bf16.gmra.mxu0 %vm426_vm1, %v6702_v23  ;;  %v2032_v23 = vshrl.u32 %v1869_v9, 16  ;;  %v984_v9 = vshrl.u32 %v932_v56, 16  ;;  %v941_v56 = vld [vmem:[#allocation2 + $0x30] sm:$0x8] }
  0xa7   : > { %v7277_v40 = vrot.slane %v2032_v23, 11  ;;  %v7299_v23 = vrot.slane %v2445_v62, 5  ;;  %v5529_v45 = vrot.slane %v984_v9, 11  ;;  %v7310_v62 = vrot.slane %v2098_v18, 11 }
  0xa9   : > { %v995_v9 = vsel %vm7317_vm6, %v5529_v45, %v994_v42 }
 0x125   : > { %v6428_v48 = vpop.f32.mrf.mxu0 }
 0x126   : > { %v528_v52 = vadd.f32 %v6428_v48, %v7263_v33 }
 0x127   : > { %v519_v57 = vpop.f32.mrf.mxu0 }
 0x128   : > { %v664_v1 = vmax.f32 %v528_v52, 0.0  ;;  %v996_v52 = vrot.slane %v991_v7, 4  ;;  %v7325_v7 = vrot.slane %v998_v55, 4 }
 0x129   : > { %v6429_v5 = vpop.f32.mrf.mxu0 }
 0x12a   : > { %v5831_v10 = vpack.c.bf16 %v664_v1, %v664_v1  ;;  %v531_v11 = vadd.f32 %v6429_v5, %v7263_v33  ;;  %v7323_v5 = vrot.slane %v992_v8, 5  ;;  %9591 = vst [vmem:[#allocation15_spill] sm:$0xff] %v7325_v7  ;;  %v1004_v17 = vsel %vm7317_vm6, %v996_v52, %v1003_v53 }
 0x12b   : > { %v522_v15 = vpop.f32.mrf.mxu0  ;;  %v7341_v52 = vcombine.low %v995_v9, %v1004_v17 }
 0x12c   : > { %898 = vst [vmem:[#allocation2 + $0x14] sm:$0xf] %v5831_v10  ;;  %v665_v21 = vmax.f32 %v531_v11, 0.0  ;;  %9590 = vst [vmem:[#allocation14_spill] sm:$0xff] %v7323_v5  ;;  %v7329_v10 = vrot.slane %v1028_v47, 11  ;;  %v1050_v11 = vshrl.u32 %v941_v56, 16 }
 0x12d   : > { %v6432_v28 = vpop.f32.mrf.mxu0 }
 0x12e   : > { %v5832_v48 = vpack.c.bf16 %v665_v21, %v665_v21  ;;  %v544_v49 = vadd.f32 %v6432_v28, %v7263_v33  ;;  %v7338_v21 = vrot.slane %v2120_v63, 11  ;;  %v7344_v56 = vrot.slane %v1050_v11, 11 }
 0x12f   : > { %v535_v57 = vpop.f32.mrf.mxu0 }
 0x130   : > { %899 = vst [vmem:[#allocation2 + $0x18] sm:$0xf] %v5832_v48  ;;  %v668_v1 = vmax.f32 %v544_v49, 0.0  ;;  %v536_v2 = vadd.f32 %v7263_v33, %v535_v57  ;;  %9592 = vst [vmem:[#allocation16_spill] sm:$0xff] %v7344_v56 }
 0x131   : > { %v6433_v6 = vpop.f32.mrf.mxu0 }
 0x132   : > { %v5835_v12 = vpack.c.bf16 %v668_v1, %v668_v1  ;;  %v666_v14 = vmax.f32 %v536_v2, 0.0  ;;  %v547_v15 = vadd.f32 %v6433_v6, %v7263_v33 }
 0x133   : > { %v538_v18 = vpop.f32.mrf.mxu0  ;;  %v1852_v8 = vld [vmem:[#allocation2 + $0x14] sm:$0xf] }
 0x134   : > { %v7336_v19 = vld [vmem:[#allocation2 + $0x14] sm:$0xf]  ;;  %902 = vst [vmem:[#allocation2 + $0x34] sm:$0xf] %v5835_v12  ;;  %v5833_v28 = vpack.c.bf16 %v666_v14, %v666_v14  ;;  %v669_v42 = vmax.f32 %v547_v15, 0.0  ;;  %v539_v45 = vadd.f32 %v7263_v33, %v538_v18  ;;  %v1905_v47 = vshrl.u32 %v1852_v8, 16 }
 0x135   : > { %v6436_v48 = vpop.f32.mrf.mxu0  ;;  %v1908_v49 = vshll.u32 %v1852_v8, 16  ;;  %v7348_v18 = vrot.slane %v2142_v27, 11 }
 0x136   : > { %900 = vst [vmem:[#allocation2 + $0x24] sm:$0xf] %v5833_v28  ;;  %v5836_v57 = vpack.c.bf16 %v669_v42, %v669_v42  ;;  %v667_v1 = vmax.f32 %v539_v45, 0.0  ;;  %v560_v63 = vadd.f32 %v6436_v48, %v7263_v33  ;;  %v1907_v2 = vrot.slane %v1905_v47, 7 }
 0x137   : > { %v551_v6 = vpop.f32.mrf.mxu0  ;;  %v1853_v12 = vld [vmem:[#allocation2 + $0x18] sm:$0xf]  ;;  %v2267_v14 = vrot.slane %v1905_v47, 4  ;;  %v2268_v15 = vrot.slane %v1908_v49, 5  ;;  %9593 = vst [vmem:[#allocation17_spill] sm:$0xff] %v7348_v18 }
 0x138   : > { %903 = vst [vmem:[#allocation2 + $0x38] sm:$0xf] %v5836_v57  ;;  %v5834_v9 = vpack.c.bf16 %v667_v1, %v667_v1  ;;  %v672_v17 = vmax.f32 %v560_v63, 0.0  ;;  %v552_v11 = vadd.f32 %v7263_v33, %v551_v6  ;;  %v1910_v13 = vor.u32 %v1908_v49, %v1907_v2 }
 0x139   : > { %v6437_v28 = vpop.f32.mrf.mxu0  ;;  %v1912_v42 = vrot.slane %v1907_v2, 4  ;;  %v1914_v45 = vshrl.u32 %v1853_v12, 16  ;;  %v1917_v55 = vshll.u32 %v1853_v12, 16  ;;  %v2269_v48 = vor.u32 %v2268_v15, %v2267_v14 }
 0x13a   : > { %901 = vst [vmem:[#allocation2 + $0x28] sm:$0xf] %v5834_v9  ;;  %v5839_v53 = vpack.c.bf16 %v672_v17, %v672_v17  ;;  %v670_v7 = vmax.f32 %v552_v11, 0.0  ;;  %v563_v47 = vadd.f32 %v6437_v28, %v7263_v33  ;;  %v5625_v5 = vcombine.low %v1852_v8, %v1853_v12 }
 0x13b   : > { %v1916_v57 = vrot.slane %v1914_v45, 7  ;;  %v2270_v1 = vrot.slane %v2269_v48, 4  ;;  %v2271_v49 = vrot.slane %v1917_v55, 5  ;;  %v2273_v63 = vrot.slane %v1914_v45, 4  ;;  %v554_v2 = vpop.f32.mrf.mxu0  ;;  %v7358_v6 = vld [vmem:[#allocation2 + $0x34] sm:$0xf] }
 0x13c   : > { %906 = vst [vmem:[#allocation2 + $0x54] sm:$0xf] %v5839_v53  ;;  %v5837_v14 = vpack.c.bf16 %v670_v7, %v670_v7  ;;  %v673_v15 = vmax.f32 %v563_v47, 0.0  ;;  %2939 = vmatprep.mubr.bf16.mxu1 %v5625_v5  ;;  %v555_v9 = vadd.f32 %v7263_v33, %v554_v2  ;;  %v1911_v8 = vsel %vm7317_vm6, %v7238_v58, %v1910_v13 }
 0x13d   : > { %v1919_v12 = vor.u32 %v1917_v55, %v1916_v57  ;;  %v2274_v17 = vor.u32 %v2273_v63, %v2271_v49  ;;  %v6440_v11 = vpop.f32.mrf.mxu0  ;;  %v2272_v28 = vsel %vm7354_vm7, %v2270_v1, %v2271_v49  ;;  %v1855_v45 = vld [vmem:[#allocation2 + $0x24] sm:$0xf]  ;;  %v9513_v48 = vshrl.u32 %v7358_v6, 16 }
 0x13e   : > { %904 = vst [vmem:[#allocation2 + $0x44] sm:$0xf] %v5837_v14  ;;  %v5840_v53 = vpack.c.bf16 %v673_v15, %v673_v15  ;;  %v671_v7 = vmax.f32 %v555_v9, 0.0  ;;  %v576_v5 = vadd.f32 %v6440_v11, %v7263_v33  ;;  %v1927_v47 = vshrl.u32 %v1855_v45, 16  ;;  %v6731_v14 = vld [vmem:[#allocation8 + $0xb0] sm:$0xff]  }
 0x13f   : > { %v2275_v2 = vrot.slane %v2274_v17, 4  ;;  %v567_v54 = vpop.f32.mrf.mxu0  ;;  %v1920_v58 = vsel %vm7317_vm6, %v1912_v42, %v1919_v12  ;;  %v1930_v13 = vshll.u32 %v1855_v45, 16  ;;  %v7372_v55 = vrot.slane %v9513_v48, 7 }
 0x140   : > { %907 = vst [vmem:[#allocation2 + $0x58] sm:$0xf] %v5840_v53  ;;  %v5838_v57 = vpack.c.bf16 %v671_v7, %v671_v7  ;;  %v676_v1 = vmax.f32 %v576_v5, 0.0  ;;  %v568_v49 = vadd.f32 %v7263_v33, %v567_v54  ;;  %v5609_v63 = vcombine.low %v1911_v8, %v1920_v58 }
 0x141   : > { %v6441_v15 = vpop.f32.mrf.mxu0  ;;  %v2280_v9 = vsel %vm7354_vm7, %v2275_v2, %v7240_v59  ;;  %v1856_v17 = vld [vmem:[#allocation2 + $0x28] sm:$0xf]  ;;  %v1929_v11 = vrot.slane %v1927_v47, 7  ;;  %v2281_v42 = vrot.slane %v1927_v47, 4  ;;  %v2282_v12 = vrot.slane %v1930_v13, 5 }
 0x142   : > { %905 = vst [vmem:[#allocation2 + $0x48] sm:$0xf] %v5838_v57  ;;  %v5843_v4 = vpack.c.bf16 %v676_v1, %v676_v1  ;;  %v674_v48 = vmax.f32 %v568_v49, 0.0  ;;  %v579_v53 = vadd.f32 %v6441_v15, %v7263_v33  ;;  %2940 = vmatmul.mubr.bf16.vlgmr.msra.gmra.mxu1 %v5609_v63  ;;  %v5641_v7 = vcombine.low %v2272_v28, %v2280_v9  ;;  %v6734_v1 = vld [vmem:[#allocation8 + $0xa8] sm:$0xff]  }
 0x143   : > { %v570_v5 = vpop.f32.mrf.mxu0  ;;  %6511 = vmatpush3.bf16.msra.mxu1 %v7235_v46  ;;  %v1936_v54 = vshrl.u32 %v1856_v17, 16  ;;  %v1939_v8 = vshll.u32 %v1856_v17, 16  ;;  %v2283_v58 = vor.u32 %v2282_v12, %v2281_v42  ;;  %v5626_v56 = vcombine.low %v1855_v45, %v1856_v17  ;;  %v7381_v46 = vld [vmem:[#allocation2 + $0x38] sm:$0xf] }
 0x144   : > { %910 = vst [vmem:[#allocation2 + $0x74] sm:$0xf] %v5843_v4  ;;  %v5841_v59 = vpack.c.bf16 %v674_v48, %v674_v48  ;;  %v677_v2 = vmax.f32 %v579_v53, 0.0  ;;  %v571_v47 = vadd.f32 %v7263_v33, %v570_v5  ;;  %6478 = vmatprep.mubr.bf16.mxu0 %v5641_v7  ;;  %v1932_v57 = vor.u32 %v1930_v13, %v1929_v11 }
 0x145   : > { %6512 = vmatprep.subr.bf16.mxu1 %v6731_v14  ;;  %v1938_v49 = vrot.slane %v1936_v54, 7  ;;  %v2284_v15 = vrot.slane %v2283_v58, 4  ;;  %v2285_v63 = vrot.slane %v1939_v8, 5  ;;  %v2287_v28 = vrot.slane %v1936_v54, 4  ;;  %2947 = vmatprep.mubr.bf16.mxu1 %v5626_v56  ;;  %v6444_v9 = vpop.f32.mrf.mxu0 }
 0x146   : > { %908 = vst [vmem:[#allocation2 + $0x64] sm:$0xf] %v5841_v59  ;;  %v5844_v42 = vpack.c.bf16 %v677_v2, %v677_v2  ;;  %v675_v45 = vmax.f32 %v571_v47, 0.0  ;;  %v592_v4 = vadd.f32 %v6444_v9, %v7263_v33  ;;  %v1933_v48 = vsel %vm7317_vm6, %v7246_v20, %v1932_v57  ;;  %v6741_v59 = vld [vmem:[#allocation8 + $0xa0] sm:$0xff]  }
 0x147   : > { %v2288_v13 = vor.u32 %v2287_v28, %v2285_v63  ;;  %v583_v17 = vpop.f32.mrf.mxu0  ;;  %v1934_v12 = vrot.slane %v1929_v11, 4  ;;  %v1941_v53 = vor.u32 %v1939_v8, %v1938_v49  ;;  %v1952_v7 = vshll.u32 %v7358_v6, 16  ;;  %6513 = vmatpush3.bf16.msra.mxu1 %v6731_v14 }
 0x148   : > { %911 = vst [vmem:[#allocation2 + $0x78] sm:$0xf] %v5844_v42  ;;  %v5842_v56 = vpack.c.bf16 %v675_v45, %v675_v45  ;;  %v680_v5 = vmax.f32 %v592_v4, 0.0  ;;  %v584_v54 = vadd.f32 %v7263_v33, %v583_v17  ;;  %v1958_v58 = vshrl.u32 %v7381_v46, 16  ;;  %6514 = vmatprep.subr.bf16.mxu1 %v6734_v1 }
 0x149   : > { %v2289_v2 = vrot.slane %v2288_v13, 4  ;;  %v6445_v47 = vpop.f32.mrf.mxu0  ;;  %v1942_v20 = vsel %vm7317_vm6, %v1934_v12, %v1941_v53  ;;  %v1961_v11 = vshll.u32 %v7381_v46, 16  ;;  %v9596_v8 = vshrl.u32 %v7358_v6, 16 }
 0x14a   : > { %909 = vst [vmem:[#allocation2 + $0x68] sm:$0xf] %v5842_v56  ;;  %v5847_v14 = vpack.c.bf16 %v680_v5, %v680_v5  ;;  %v678_v49 = vmax.f32 %v584_v54, 0.0  ;;  %v595_v28 = vadd.f32 %v6445_v47, %v7263_v33  ;;  %v5610_v9 = vcombine.low %v1933_v48, %v1942_v20  ;;  %v6752_v5 = vld [vmem:[#allocation8 + $0x98] sm:$0xff]  }
 0x14b   : > { %v2295_v57 = vrot.slane %v9596_v8, 4  ;;  %v586_v42 = vpop.f32.mrf.mxu0  ;;  %v1960_v45 = vrot.slane %v1958_v58, 7  ;;  %v2296_v4 = vrot.slane %v1952_v7, 5  ;;  %v2301_v17 = vrot.slane %v1958_v58, 4  ;;  %6515 = vmatpush3.bf16.msra.mxu1 %v6734_v1 }
 0x14c   : > { %v5627_v13 = vcombine.low %v7358_v6, %v7381_v46  ;;  %914 = vst [vmem:[#allocation2 + $0x94] sm:$0xf] %v5847_v14  ;;  %v5845_v12 = vpack.c.bf16 %v678_v49, %v678_v49  ;;  %v681_v53 = vmax.f32 %v595_v28, 0.0  ;;  %v587_v18 = vadd.f32 %v7263_v33, %v586_v42  ;;  %2948 = vmatmul.mubr.bf16.gmra.mxu1 %v5610_v9  ;;  %v6738_v46 = vld [vmem:[#allocation8 + $0x38] sm:$0xff]  }
 0x14d   : > { %v2286_v56 = vsel %vm7354_vm7, %v2284_v15, %v2285_v63  ;;  %6516 = vmatprep.subr.bf16.mxu1 %v6741_v59  ;;  %v6448_v48 = vpop.f32.mrf.mxu0  ;;  %v2294_v54 = vsel %vm7354_vm7, %v2289_v2, %v7252_v29  ;;  %v2297_v58 = vor.u32 %v2296_v4, %v2295_v57  ;;  %v2299_v6 = vrot.slane %v1961_v11, 5  ;;  %v7406_v15 = vld [vmem:[#allocation2 + $0x44] sm:$0xf]  ;;  %v7413_v4 = vld [vmem:[#allocation2 + $0x48] sm:$0xf] }
 0x14e   : > { %2955 = vmatprep.mubr.bf16.mxu1 %v5627_v13  ;;  %v1954_v1 = vor.u32 %v1952_v7, %v7372_v55  ;;  %912 = vst [vmem:[#allocation2 + $0x84] sm:$0xf] %v5845_v12  ;;  %v5848_v47 = vpack.c.bf16 %v681_v53, %v681_v53  ;;  %v679_v20 = vmax.f32 %v587_v18, 0.0  ;;  %v608_v8 = vadd.f32 %v6448_v48, %v7263_v33  ;;  %v6739_v63 = vld [vmem:[#allocation8 + $0x70] sm:$0xff]  }
 0x14f   : > { %v5642_v14 = vcombine.low %v2286_v56, %v2294_v54  ;;  %v2298_v49 = vrot.slane %v2297_v58, 4  ;;  %v2302_v28 = vor.u32 %v2301_v17, %v2299_v6  ;;  %v599_v9 = vpop.f32.mrf.mxu0  ;;  %v1956_v2 = vrot.slane %v7372_v55, 4  ;;  %6517 = vmatpush3.bf16.msra.mxu1 %v6741_v59  ;;  %v6761_v13 = vld [vmem:[#allocation8 + $0x90] sm:$0xff]   ;;  %v6743_v54 = vld [vmem:[#allocation8 + $0x68] sm:$0xff]  }
 0x150   : > { %v1955_v29 = vsel %vm7317_vm6, %v7250_v25, %v1954_v1  ;;  %915 = vst [vmem:[#allocation2 + $0x98] sm:$0xf] %v5848_v47  ;;  %v5846_v7 = vpack.c.bf16 %v679_v20, %v679_v20  ;;  %v684_v57 = vmax.f32 %v608_v8, 0.0  ;;  %v600_v18 = vadd.f32 %v7263_v33, %v599_v9  ;;  %6518 = vmatprep.subr.bf16.mxu1 %v6752_v5  ;;  %v6740_v59 = vld [vmem:[#allocation8 + $0x30] sm:$0xff]   ;;  %v6766_v9 = vld [vmem:[#allocation8 + $0x88] sm:$0xff]  }
 0x151   : > { %6479 = vmatmul.mubr.bf16.vlgmr.msra.gmra.mxu0 %v5642_v14  ;;  %v1963_v42 = vor.u32 %v1961_v11, %v1960_v45  ;;  %v2300_v17 = vsel %vm7354_vm7, %v2298_v49, %v2299_v6  ;;  %v2303_v12 = vrot.slane %v2302_v28, 4  ;;  %v6449_v53 = vpop.f32.mrf.mxu0  ;;  %v1971_v25 = vshrl.u32 %v7406_v15, 16  ;;  %v7429_v28 = vld [vmem:[#allocation2 + $0x54] sm:$0xf] }
 0x152   : > { %v1974_v55 = vshll.u32 %v7406_v15, 16  ;;  %6149 = vmatpush3.bf16.msra.mxu0 %v6738_v46  ;;  %913 = vst [vmem:[#allocation2 + $0x88] sm:$0xf] %v5846_v7  ;;  %v5851_v56 = vpack.c.bf16 %v684_v57, %v684_v57  ;;  %v682_v48 = vmax.f32 %v600_v18, 0.0  ;;  %v611_v11 = vadd.f32 %v6449_v53, %v7263_v33  ;;  %v7436_v57 = vld [vmem:[#allocation2 + $0x58] sm:$0xf] }
 0x153   : > { %v1964_v45 = vsel %vm7317_vm6, %v1956_v2, %v1963_v42  ;;  %6150 = vmatprep.subr.bf16.mxu0 %v6739_v63  ;;  %v2308_v58 = vsel %vm7354_vm7, %v2303_v12, %v7248_v24  ;;  %v602_v6 = vpop.f32.mrf.mxu0  ;;  %v7425_v47 = vrot.slane %v1971_v25, 7  ;;  %v1980_v46 = vshrl.u32 %v7413_v4, 16  ;;  %6519 = vmatpush3.bf16.msra.mxu1 %v6752_v5  ;;  %v6744_v63 = vld [vmem:[#allocation8 + $0x28] sm:$0xff]   ;;  %v6745_v53 = vld [vmem:[#allocation8 + $0x60] sm:$0xff]  }
 0x154   : > { %v5611_v1 = vcombine.low %v1955_v29, %v1964_v45  ;;  %918 = vst [vmem:[#allocation2 + $0xb4] sm:$0xf] %v5851_v56  ;;  %v5643_v20 = vcombine.low %v2300_v17, %v2308_v58  ;;  %v5849_v8 = vpack.c.bf16 %v682_v48, %v682_v48  ;;  %v685_v14 = vmax.f32 %v611_v11, 0.0  ;;  %6520 = vmatprep.subr.bf16.mxu1 %v6761_v13 }
 0x155   : > { %v603_v49 = vadd.f32 %v7263_v33, %v602_v6  ;;  %v7431_v24 = vrot.slane %v1980_v46, 7  ;;  %v1983_v29 = vshll.u32 %v7413_v4, 16  ;;  %v2309_v2 = vrot.slane %v1971_v25, 4  ;;  %v6452_v7 = vpop.f32.mrf.mxu0 }
 0x156   : > { %2956 = vmatmul.mubr.bf16.gmra.mxu1 %v5611_v1  ;;  %v2310_v5 = vrot.slane %v1974_v55, 5  ;;  %6151 = vmatpush3.bf16.msra.mxu0 %v6740_v59  ;;  %916 = vst [vmem:[#allocation2 + $0xa4] sm:$0xf] %v5849_v8  ;;  %v5852_v18 = vpack.c.bf16 %v685_v14, %v685_v14  ;;  %v2315_v17 = vrot.slane %v1980_v46, 4  ;;  %v5628_v12 = vcombine.low %v7406_v15, %v7413_v4  ;;  %v6771_v1 = vld [vmem:[#allocation8 + $0x80] sm:$0xff]  }
 0x157   : > { %6482 = vmatprep.mubr.bf16.mxu0 %v5643_v20  ;;  %v683_v42 = vmax.f32 %v603_v49, 0.0  ;;  %6152 = vmatprep.subr.bf16.mxu0 %v6743_v54  ;;  %v624_v56 = vadd.f32 %v6452_v7, %v7263_v33  ;;  %v2313_v48 = vrot.slane %v1983_v29, 5  ;;  %v9515_v11 = vshrl.u32 %v7429_v28, 16  ;;  %v615_v45 = vpop.f32.mrf.mxu0 }
 0x158   : > { %v2311_v25 = vor.u32 %v2310_v5, %v2309_v2  ;;  %6521 = vmatpush3.bf16.msra.mxu1 %v6761_v13  ;;  %919 = vst [vmem:[#allocation2 + $0xb8] sm:$0xf] %v5852_v18  ;;  %2963 = vmatprep.mubr.bf16.mxu1 %v5628_v12  ;;  %v9514_v58 = vshll.u32 %v7429_v28, 16  ;;  %v2002_v6 = vshrl.u32 %v7436_v57, 16  ;;  %v9516_v54 = vshll.u32 %v7436_v57, 16  ;;  %v6746_v13 = vld [vmem:[#allocation8 + $0x20] sm:$0xff]  }
 0x159   : > { %v5850_v59 = vpack.c.bf16 %v683_v42, %v683_v42  ;;  %6522 = vmatprep.subr.bf16.mxu1 %v6766_v9  ;;  %v688_v46 = vmax.f32 %v624_v56, 0.0  ;;  %v2316_v8 = vor.u32 %v2315_v17, %v2313_v48  ;;  %v2323_v14 = vrot.slane %v9515_v11, 4  ;;  %v6453_v49 = vpop.f32.mrf.mxu0  ;;  %v6748_v42 = vld [vmem:[#allocation8 + $0x58] sm:$0xff]  }
 0x15a   : > { %v2312_v20 = vrot.slane %v2311_v25, 4  ;;  %6153 = vmatpush3.bf16.msra.mxu0 %v6744_v63  ;;  %v2324_v2 = vrot.slane %v9514_v58, 5  ;;  %v2327_v5 = vrot.slane %v9516_v54, 5  ;;  %v2329_v7 = vrot.slane %v2002_v6, 4 }
 0x15b   : > { %917 = vst [vmem:[#allocation2 + $0xa8] sm:$0xf] %v5850_v59  ;;  %v616_v18 = vadd.f32 %v7263_v33, %v615_v45  ;;  %6154 = vmatprep.subr.bf16.mxu0 %v6745_v53  ;;  %v5855_v17 = vpack.c.bf16 %v688_v46, %v688_v46  ;;  %v2317_v63 = vrot.slane %v2316_v8, 4  ;;  %v627_v56 = vadd.f32 %v6453_v49, %v7263_v33  ;;  %v618_v25 = vpop.f32.mrf.mxu0  ;;  %v6775_v8 = vld [vmem:[#allocation8 + $0x1f8] sm:$0xff]  }
 0x15c   : > { %v2314_v12 = vsel %vm7354_vm7, %v2312_v20, %v2313_v48  ;;  %6523 = vmatpush3.bf16.msra.mxu1 %v6766_v9  ;;  %v2325_v59 = vor.u32 %v2324_v2, %v2323_v14  ;;  %v2330_v58 = vor.u32 %v2329_v7, %v2327_v5  ;;  %v619_v54 = vadd.f32 %v7263_v33, %v618_v25  ;;  %v6749_v9 = vld [vmem:[#allocation8 + $0x18] sm:$0xff]  }
 0x15d   : > { %v686_v11 = vmax.f32 %v616_v18, 0.0  ;;  %6524 = vmatprep.subr.bf16.mxu1 %v6771_v1  ;;  %922 = vst [vmem:[#allocation2 + $0xd4] sm:$0xf] %v5855_v17  ;;  %v2322_v53 = vsel %vm7354_vm7, %v2317_v63, %v7254_v30  ;;  %v689_v45 = vmax.f32 %v627_v56, 0.0  ;;  %v1976_v48 = vor.u32 %v1974_v55, %v7425_v47  ;;  %v6456_v20 = vpop.f32.mrf.mxu0  ;;  %v7467_v18 = vld [vmem:[#allocation2 + $0x64] sm:$0xf] }
 0x15e   : > { %v1978_v46 = vrot.slane %v7425_v47, 4  ;;  %6155 = vmatpush3.bf16.msra.mxu0 %v6746_v13  ;;  %v5644_v14 = vcombine.low %v2314_v12, %v2322_v53  ;;  %v2326_v49 = vrot.slane %v2325_v59, 4  ;;  %v2331_v2 = vrot.slane %v2330_v58, 4  ;;  %v6750_v17 = vld [vmem:[#allocation8 + $0x50] sm:$0xff]   ;;  %v6754_v59 = vld [vmem:[#allocation8 + $0x48] sm:$0xff]  }
 0x15f   : > { %v5853_v7 = vpack.c.bf16 %v686_v11, %v686_v11  ;;  %6156 = vmatprep.subr.bf16.mxu0 %v6748_v42  ;;  %v5856_v30 = vpack.c.bf16 %v689_v45, %v689_v45  ;;  %v687_v63 = vmax.f32 %v619_v54, 0.0  ;;  %v1977_v15 = vsel %vm7317_vm6, %v7258_v32, %v1976_v48  ;;  %v7475_v47 = vld [vmem:[#allocation2 + $0x68] sm:$0xf]  ;;  %v631_v13 = vpop.f32.mrf.mxu0 }
 0x160   : > { %v1985_v55 = vor.u32 %v1983_v29, %v7431_v24  ;;  %6525 = vmatpush3.bf16.msra.mxu1 %v6771_v1  ;;  %6483 = vmatmul.mubr.bf16.gmra.mxu0 %v5644_v14  ;;  %v2328_v11 = vsel %vm7354_vm7, %v2326_v49, %v2327_v5  ;;  %v2336_v58 = vsel %vm7354_vm7, %v2331_v2, %v7256_v31  ;;  %v2015_v1 = vshrl.u32 %v7467_v18, 16  ;;  %v6751_v5 = vld [vmem:[#allocation8 + $0x10] sm:$0xff]  }
 0x161   : > { %920 = vst [vmem:[#allocation2 + $0xc4] sm:$0xf] %v5853_v7  ;;  %v5629_v32 = vcombine.low %v7429_v28, %v7436_v57  ;;  %v640_v54 = vadd.f32 %v6456_v20, %v7263_v33  ;;  %v5645_v4 = vcombine.low %v2328_v11, %v2336_v58  ;;  %923 = vst [vmem:[#allocation2 + $0xd8] sm:$0xf] %v5856_v30  ;;  %v6457_v42 = vpop.f32.mrf.mxu0  ;;  %6284 = vmatprep.subr.bf16.mxu1 %v6775_v8 }
 0x162   : > { %v5854_v24 = vpack.c.bf16 %v687_v63, %v687_v63  ;;  %v1986_v29 = vsel %vm7317_vm6, %v1978_v46, %v1985_v55  ;;  %6157 = vmatpush3.bf16.msra.mxu0 %v6749_v9  ;;  %v2018_v56 = vshll.u32 %v7467_v18, 16  ;;  %v2024_v25 = vshrl.u32 %v7475_v47, 16  ;;  %v7495_v9 = vld [vmem:[#allocation2 + $0x74] sm:$0xf] }
 0x163   : > { %v5612_v12 = vcombine.low %v1977_v15, %v1986_v29  ;;  %v692_v31 = vmax.f32 %v640_v54, 0.0  ;;  %6158 = vmatprep.subr.bf16.mxu0 %v6750_v17  ;;  %6486 = vmatprep.mubr.bf16.mxu0 %v5645_v4  ;;  %v2027_v53 = vshll.u32 %v7475_v47, 16  ;;  %v2337_v45 = vrot.slane %v2015_v1, 4  ;;  %v634_v20 = vpop.f32.mrf.mxu0  ;;  %v7508_v4 = vld [vmem:[#allocation2 + $0x78] sm:$0xf] }
 0x164   : > { %921 = vst [vmem:[#allocation2 + $0xc8] sm:$0xf] %v5854_v24  ;;  %v632_v48 = vadd.f32 %v7263_v33, %v631_v13  ;;  %v643_v46 = vadd.f32 %v6457_v42, %v7263_v33  ;;  %v2338_v14 = vrot.slane %v2018_v56, 5  ;;  %v2343_v49 = vrot.slane %v2024_v25, 4  ;;  %v6755_v13 = vld [vmem:[#allocation8 + $0x8] sm:$0xff]   ;;  %v6756_v24 = vld [vmem:[#allocation8 + $0x40] sm:$0xff]  }
 0x165   : > { %2964 = vmatmul.mubr.bf16.gmra.mxu1 %v5612_v12  ;;  %v5859_v8 = vpack.c.bf16 %v692_v31, %v692_v31  ;;  %v635_v2 = vadd.f32 %v7263_v33, %v634_v20  ;;  %v2341_v7 = vrot.slane %v2027_v53, 5  ;;  %v9597_v63 = vshrl.u32 %v7429_v28, 16  ;;  %v6460_v55 = vpop.f32.mrf.mxu0 }
 0x166   : > { %2971 = vmatprep.mubr.bf16.mxu1 %v5629_v32  ;;  %v690_v17 = vmax.f32 %v632_v48, 0.0  ;;  %v693_v30 = vmax.f32 %v643_v46, 0.0  ;;  %6159 = vmatpush3.bf16.msra.mxu0 %v6751_v5  ;;  %v2339_v11 = vor.u32 %v2338_v14, %v2337_v45  ;;  %v2004_v54 = vrot.slane %v2002_v6, 7  ;;  %v7529_v55 = vld [vmem:[#allocation2 + $0x88] sm:$0xf] }
 0x167   : > { %v1995_v15 = vrot.slane %v9597_v63, 7  ;;  %926 = vst [vmem:[#allocation2 + $0xf4] sm:$0xf] %v5859_v8  ;;  %v691_v58 = vmax.f32 %v635_v2, 0.0  ;;  %v2037_v32 = vshrl.u32 %v7495_v9, 16  ;;  %6160 = vmatprep.subr.bf16.mxu0 %v6754_v59  ;;  %v2344_v29 = vor.u32 %v2343_v49, %v2341_v7  ;;  %v647_v5 = vpop.f32.mrf.mxu0 }
 0x168   : > { %v5857_v42 = vpack.c.bf16 %v690_v17, %v690_v17  ;;  %v5860_v12 = vpack.c.bf16 %v693_v30, %v693_v30  ;;  %v9598_v31 = vshll.u32 %v7429_v28, 16  ;;  %v2340_v46 = vrot.slane %v2339_v11, 4  ;;  %v7520_v28 = vld [vmem:[#allocation2 + $0x84] sm:$0xf]  ;;  %v6757_v30 = vld [vmem:[#allocation8] sm:$0xff]  }
 0x169   : > { %v5858_v20 = vpack.c.bf16 %v691_v58, %v691_v58  ;;  %v2000_v45 = vrot.slane %v1995_v15, 4  ;;  %v9599_v8 = vshll.u32 %v7436_v57, 16  ;;  %v2345_v6 = vrot.slane %v2344_v29, 4  ;;  %v6461_v17 = vpop.f32.mrf.mxu0  ;;  %v7538_v29 = vld [vmem:[#allocation8 + $0x238] sm:$0xff]  }
 0x16a   : > { %v1998_v48 = vor.u32 %v9598_v31, %v1995_v15  ;;  %924 = vst [vmem:[#allocation2 + $0xe4] sm:$0xf] %v5857_v42  ;;  %927 = vst [vmem:[#allocation2 + $0xf8] sm:$0xf] %v5860_v12  ;;  %v2040_v49 = vshll.u32 %v7495_v9, 16  ;;  %v2046_v2 = vshrl.u32 %v7508_v4, 16  ;;  %6161 = vmatpush3.bf16.msra.mxu0 %v6755_v13  ;;  %v2342_v57 = vsel %vm7354_vm7, %v2340_v46, %v2341_v7 }
 0x16b   : > { %v2007_v14 = vor.u32 %v9599_v8, %v2004_v54  ;;  %925 = vst [vmem:[#allocation2 + $0xe8] sm:$0xf] %v5858_v20  ;;  %v2049_v15 = vshll.u32 %v7508_v4, 16  ;;  %6162 = vmatprep.subr.bf16.mxu0 %v6756_v24  ;;  %v2350_v13 = vsel %vm7354_vm7, %v2345_v6, %v7265_v34  ;;  %v650_v54 = vpop.f32.mrf.mxu0  ;;  %v5630_v24 = vcombine.low %v7467_v18, %v7475_v47 }
 0x16c   : > { %v1999_v59 = vsel %vm7317_vm6, %v7267_v35, %v1998_v48  ;;  %v2351_v35 = vrot.slane %v2037_v32, 4  ;;  %v2352_v7 = vrot.slane %v2040_v49, 5  ;;  %v2357_v58 = vrot.slane %v2046_v2, 4 }
 0x16d   : > { %v2008_v63 = vsel %vm7317_vm6, %v2000_v45, %v2007_v14  ;;  %v5646_v42 = vcombine.low %v2342_v57, %v2350_v13  ;;  %v2355_v12 = vrot.slane %v2049_v15, 5  ;;  %v2059_v31 = vshrl.u32 %v7520_v28, 16 }
 0x16e   : > { %v5613_v11 = vcombine.low %v1999_v59, %v2008_v63  ;;  %v2353_v34 = vor.u32 %v2352_v7, %v2351_v35  ;;  %v2062_v48 = vshll.u32 %v7520_v28, 16  ;;  %v2068_v46 = vshrl.u32 %v7529_v55, 16  ;;  %6163 = vmatpush3.bf16.msra.mxu0 %v6757_v30 }
 0x16f   : > { %v2071_v20 = vshll.u32 %v7529_v55, 16  ;;  %6487 = vmatmul.mubr.bf16.gmra.mxu0 %v5646_v42  ;;  %v2358_v45 = vor.u32 %v2357_v58, %v2355_v12  ;;  %v2365_v8 = vrot.slane %v2059_v31, 4  ;;  %v648_v14 = vadd.f32 %v7263_v33, %v647_v5  ;;  %6558 = vmatprep.subr.bf16.mxu0 %v7538_v29 }
 0x170   : > { %2972 = vmatmul.mubr.bf16.gmra.mxu1 %v5613_v11  ;;  %v651_v6 = vadd.f32 %v7263_v33, %v650_v54  ;;  %v2354_v59 = vrot.slane %v2353_v34, 4  ;;  %v2366_v17 = vrot.slane %v2062_v48, 5  ;;  %v2371_v30 = vrot.slane %v2068_v46, 4  ;;  %v7565_v54 = vld [vmem:[#allocation2 + $0x94] sm:$0xf] }
 0x171   : > { %2979 = vmatprep.mubr.bf16.mxu1 %v5630_v24  ;;  %v2369_v57 = vrot.slane %v2071_v20, 5  ;;  %v2359_v63 = vrot.slane %v2358_v45, 4  ;;  %v694_v35 = vmax.f32 %v648_v14, 0.0  ;;  %v2017_v5 = vrot.slane %v2015_v1, 7  ;;  %v7572_v1 = vld [vmem:[#allocation2 + $0x98] sm:$0xf] }
 0x172   : > { %v695_v13 = vmax.f32 %v651_v6, 0.0  ;;  %v2356_v33 = vsel %vm7354_vm7, %v2354_v59, %v2355_v12  ;;  %v2367_v11 = vor.u32 %v2366_v17, %v2365_v8  ;;  %v2026_v58 = vrot.slane %v2024_v25, 7 }
 0x173   : > { %v2372_v7 = vor.u32 %v2371_v30, %v2369_v57  ;;  %v2364_v42 = vsel %vm7354_vm7, %v2359_v63, %v7269_v36  ;;  %v5861_v24 = vpack.c.bf16 %v694_v35, %v694_v35  ;;  %v2020_v45 = vor.u32 %v2018_v56, %v2017_v5  ;;  %v7582_v56 = vld [vmem:[#allocation2 + $0xa4] sm:$0xf] }
 0x174   : > { %v5862_v34 = vpack.c.bf16 %v695_v13, %v695_v13  ;;  %v5647_v14 = vcombine.low %v2356_v33, %v2364_v42  ;;  %v2368_v12 = vrot.slane %v2367_v11, 4  ;;  %v2022_v6 = vrot.slane %v2017_v5, 4 }
 0x175   : > { %v2373_v8 = vrot.slane %v2372_v7, 4  ;;  %928 = vst [vmem:[#allocation2 + $0x104] sm:$0xf] %v5861_v24  ;;  %v2021_v25 = vsel %vm7317_vm6, %v7273_v38, %v2020_v45  ;;  %v2029_v36 = vor.u32 %v2027_v53, %v2026_v58  ;;  %v5631_v59 = vcombine.low %v7495_v9, %v7508_v4  ;;  %v7591_v53 = vld [vmem:[#allocation2 + $0xa8] sm:$0xf] }
 0x176   : > { %929 = vst [vmem:[#allocation2 + $0x108] sm:$0xf] %v5862_v34  ;;  %v2081_v18 = vshrl.u32 %v7565_v54, 16  ;;  %6490 = vmatprep.mubr.bf16.mxu0 %v5647_v14  ;;  %v2370_v17 = vsel %vm7354_vm7, %v2368_v12, %v2369_v57  ;;  %v2084_v38 = vshll.u32 %v7565_v54, 16  ;;  %v2090_v47 = vshrl.u32 %v7572_v1, 16 }
 0x177   : > { %v2378_v30 = vsel %vm7354_vm7, %v2373_v8, %v7271_v37  ;;  %v2030_v35 = vsel %vm7317_vm6, %v2022_v6, %v2029_v36  ;;  %v2093_v13 = vshll.u32 %v7572_v1, 16  ;;  %v2103_v11 = vshrl.u32 %v7582_v56, 16 }
 0x178   : > { %v5648_v63 = vcombine.low %v2370_v17, %v2378_v30  ;;  %v2379_v5 = vrot.slane %v2081_v18, 4  ;;  %v5614_v57 = vcombine.low %v2021_v25, %v2030_v35  ;;  %v2380_v33 = vrot.slane %v2084_v38, 5  ;;  %v7620_v17 = vld [vmem:[#allocation2 + $0xb4] sm:$0xf] }
 0x179   : > { %v2385_v37 = vrot.slane %v2090_v47, 4  ;;  %v2383_v7 = vrot.slane %v2093_v13, 5  ;;  %v2106_v58 = vshll.u32 %v7582_v56, 16  ;;  %v2112_v42 = vshrl.u32 %v7591_v53, 16 }
 0x17a   : > { %6491 = vmatmul.mubr.bf16.gmra.mxu0 %v5648_v63  ;;  %v2115_v24 = vshll.u32 %v7591_v53, 16  ;;  %2980 = vmatmul.mubr.bf16.gmra.mxu1 %v5614_v57  ;;  %v2381_v34 = vor.u32 %v2380_v33, %v2379_v5  ;;  %v2393_v45 = vrot.slane %v2103_v11, 4  ;;  %v2039_v14 = vrot.slane %v2037_v32, 7  ;;  %v7628_v33 = vld [vmem:[#allocation2 + $0xb8] sm:$0xf] }
 0x17b   : > { %v2048_v12 = vrot.slane %v2046_v2, 7  ;;  %2987 = vmatprep.mubr.bf16.mxu1 %v5631_v59  ;;  %v2386_v8 = vor.u32 %v2385_v37, %v2383_v7  ;;  %v2394_v6 = vrot.slane %v2106_v58, 5  ;;  %v2399_v36 = vrot.slane %v2112_v42, 4 }
 0x17c   : > { %v2397_v25 = vrot.slane %v2115_v24, 5  ;;  %v2382_v30 = vrot.slane %v2381_v34, 4  ;;  %v2042_v32 = vor.u32 %v2040_v49, %v2039_v14  ;;  %v2044_v63 = vrot.slane %v2039_v14, 4 }
 0x17d   : > { %v2051_v2 = vor.u32 %v2049_v15, %v2048_v12  ;;  %v2387_v59 = vrot.slane %v2386_v8, 4  ;;  %v2395_v35 = vor.u32 %v2394_v6, %v2393_v45  ;;  %v5632_v57 = vcombine.low %v7520_v28, %v7529_v55  ;;  %v7638_v15 = vld [vmem:[#allocation2 + $0xc4] sm:$0xf] }
 0x17e   : > { %v2400_v5 = vor.u32 %v2399_v36, %v2397_v25  ;;  %v2384_v37 = vsel %vm7354_vm7, %v2382_v30, %v2383_v7  ;;  %v2043_v9 = vsel %vm7317_vm6, %v7277_v40, %v2042_v32  ;;  %v2125_v4 = vshrl.u32 %v7620_v17, 16  ;;  %v7646_v36 = vld [vmem:[#allocation2 + $0xc8] sm:$0xf] }
 0x17f   : > { %v2052_v49 = vsel %vm7317_vm6, %v2044_v63, %v2051_v2  ;;  %v2392_v34 = vsel %vm7354_vm7, %v2387_v59, %v7275_v39  ;;  %v2396_v45 = vrot.slane %v2395_v35, 4  ;;  %v2128_v7 = vshll.u32 %v7620_v17, 16 }
 0x180   : > { %v2401_v14 = vrot.slane %v2400_v5, 4  ;;  %v5615_v12 = vcombine.low %v2043_v9, %v2052_v49  ;;  %v5649_v8 = vcombine.low %v2384_v37, %v2392_v34  ;;  %v2134_v6 = vshrl.u32 %v7628_v33, 16 }
 0x181   : > { %v2137_v40 = vshll.u32 %v7628_v33, 16  ;;  %v2398_v30 = vsel %vm7354_vm7, %v2396_v45, %v2397_v25  ;;  %v2407_v39 = vrot.slane %v2125_v4, 4  ;;  %v9518_v63 = vshrl.u32 %v7638_v15, 16 }
 0x182   : > { %v2406_v32 = vsel %vm7354_vm7, %v2401_v14, %v7279_v43  ;;  %6494 = vmatprep.mubr.bf16.mxu0 %v5649_v8  ;;  %2988 = vmatmul.mubr.bf16.gmra.mxu1 %v5615_v12  ;;  %v2408_v59 = vrot.slane %v2128_v7, 5  ;;  %v2413_v25 = vrot.slane %v2134_v6, 4  ;;  %v9517_v43 = vshll.u32 %v7638_v15, 16  ;;  %v7671_v12 = vld [vmem:[#allocation2 + $0xd4] sm:$0xf] }
 0x183   : > { %v5650_v2 = vcombine.low %v2398_v30, %v2406_v32  ;;  %v2411_v35 = vrot.slane %v2137_v40, 5  ;;  %2995 = vmatprep.mubr.bf16.mxu1 %v5632_v57  ;;  %v9520_v5 = vshrl.u32 %v7646_v36, 16  ;;  %v9519_v37 = vshll.u32 %v7646_v36, 16 }
 0x184   : > { %v2421_v9 = vrot.slane %v9518_v63, 4  ;;  %v2409_v49 = vor.u32 %v2408_v59, %v2407_v39  ;;  %v2061_v45 = vrot.slane %v2059_v31, 7  ;;  %v2070_v14 = vrot.slane %v2068_v46, 7  ;;  %v7685_v63 = vld [vmem:[#allocation2 + $0xd8] sm:$0xf] }
 0x185   : > { %6495 = vmatmul.mubr.bf16.gmra.mxu0 %v5650_v2  ;;  %v2414_v34 = vor.u32 %v2413_v25, %v2411_v35  ;;  %v2422_v57 = vrot.slane %v9517_v43, 5  ;;  %v2425_v8 = vrot.slane %v9519_v37, 5  ;;  %v2427_v30 = vrot.slane %v9520_v5, 4 }
 0x186   : > { %v5633_v32 = vcombine.low %v7565_v54, %v7572_v1  ;;  %v2410_v39 = vrot.slane %v2409_v49, 4  ;;  %v2064_v31 = vor.u32 %v2062_v48, %v2061_v45  ;;  %v2066_v46 = vrot.slane %v2061_v45, 4 }
 0x187   : > { %v2415_v2 = vrot.slane %v2414_v34, 4  ;;  %v2423_v59 = vor.u32 %v2422_v57, %v2421_v9  ;;  %v2428_v25 = vor.u32 %v2427_v30, %v2425_v8  ;;  %v2073_v43 = vor.u32 %v2071_v20, %v2070_v14  ;;  %v7697_v9 = vld [vmem:[#allocation2 + $0xe4] sm:$0xf]  ;;  %v7705_v30 = vld [vmem:[#allocation2 + $0xe8] sm:$0xf] }
 0x188   : > { %v2169_v37 = vshrl.u32 %v7671_v12, 16  ;;  %v2412_v5 = vsel %vm7354_vm7, %v2410_v39, %v2411_v35  ;;  %v2065_v28 = vsel %vm7317_vm6, %v7290_v61, %v2064_v31  ;;  %v2172_v48 = vshll.u32 %v7671_v12, 16 }
 0x189   : > { %v2420_v49 = vsel %vm7354_vm7, %v2415_v2, %v7281_v44  ;;  %v2424_v20 = vrot.slane %v2423_v59, 4  ;;  %v2429_v34 = vrot.slane %v2428_v25, 4  ;;  %v2074_v45 = vsel %vm7317_vm6, %v2066_v46, %v2073_v43 }
 0x18a   : > { %v5651_v55 = vcombine.low %v2412_v5, %v2420_v49  ;;  %v5616_v14 = vcombine.low %v2065_v28, %v2074_v45  ;;  %v2178_v35 = vshrl.u32 %v7685_v63, 16  ;;  %v2181_v57 = vshll.u32 %v7685_v63, 16 }
 0x18b   : > { %v2435_v44 = vrot.slane %v2169_v37, 4  ;;  %v2426_v61 = vsel %vm7354_vm7, %v2424_v20, %v2425_v8  ;;  %v2434_v5 = vsel %vm7354_vm7, %v2429_v34, %v7297_v22  ;;  %v2436_v43 = vrot.slane %v2172_v48, 5 }
 0x18c   : > { %6498 = vmatprep.mubr.bf16.mxu0 %v5651_v55  ;;  %v2191_v39 = vshrl.u32 %v7697_v9, 16  ;;  %v5652_v2 = vcombine.low %v2426_v61, %v2434_v5  ;;  %2996 = vmatmul.mubr.bf16.gmra.mxu1 %v5616_v14  ;;  %v2439_v31 = vrot.slane %v2181_v57, 5  ;;  %v2441_v46 = vrot.slane %v2178_v35, 4 }
 0x18d   : > { %v9522_v59 = vshll.u32 %v7697_v9, 16  ;;  %3003 = vmatprep.mubr.bf16.mxu1 %v5633_v32  ;;  %v2437_v8 = vor.u32 %v2436_v43, %v2435_v44  ;;  %v2200_v25 = vshrl.u32 %v7705_v30, 16  ;;  %v9521_v22 = vshll.u32 %v7705_v30, 16  ;;  %v7730_v32 = vld [vmem:[#allocation2 + $0xf4] sm:$0xf] }
 0x18e   : > { %v2449_v49 = vrot.slane %v2191_v39, 4  ;;  %6499 = vmatmul.mubr.bf16.gmra.mxu0 %v5652_v2  ;;  %v2442_v28 = vor.u32 %v2441_v46, %v2439_v31  ;;  %v2083_v20 = vrot.slane %v2081_v18, 7  ;;  %v2092_v34 = vrot.slane %v2090_v47, 7  ;;  %v7740_v46 = vld [vmem:[#allocation2 + $0xf8] sm:$0xf] }
 0x18f   : > { %v2450_v55 = vrot.slane %v9522_v59, 5  ;;  %v2438_v45 = vrot.slane %v2437_v8, 4  ;;  %v2453_v14 = vrot.slane %v9521_v22, 5  ;;  %v2455_v44 = vrot.slane %v2200_v25, 4 }
 0x190   : > { %v5634_v61 = vcombine.low %v7582_v56, %v7591_v53  ;;  %v2443_v5 = vrot.slane %v2442_v28, 4  ;;  %v2086_v18 = vor.u32 %v2084_v38, %v2083_v20  ;;  %v2088_v2 = vrot.slane %v2083_v20, 4 }
 0x191   : > { %v2451_v43 = vor.u32 %v2450_v55, %v2449_v49  ;;  %v2440_v47 = vsel %vm7354_vm7, %v2438_v45, %v2439_v31  ;;  %v2456_v8 = vor.u32 %v2455_v44, %v2453_v14  ;;  %v2095_v22 = vor.u32 %v2093_v13, %v2092_v34  ;;  %v7754_v55 = vld [vmem:[#allocation2 + $0x104] sm:$0xf]  ;;  %v7759_v34 = vld [vmem:[#allocation2 + $0x108] sm:$0xf] }
 0x192   : > { %v2213_v59 = vshrl.u32 %v7730_v32, 16  ;;  %v2448_v28 = vsel %vm7354_vm7, %v2443_v5, %v7299_v23  ;;  %v2087_v54 = vsel %vm7317_vm6, %v7295_v16, %v2086_v18  ;;  %v2216_v38 = vshll.u32 %v7730_v32, 16 }
 0x193   : > { %v2452_v49 = vrot.slane %v2451_v43, 4  ;;  %v5653_v31 = vcombine.low %v2440_v47, %v2448_v28  ;;  %v2457_v20 = vrot.slane %v2456_v8, 4  ;;  %v2096_v1 = vsel %vm7317_vm6, %v2088_v2, %v2095_v22 }
 0x194   : > { %v2222_v13 = vshrl.u32 %v7740_v46, 16  ;;  %v5617_v45 = vcombine.low %v2087_v54, %v2096_v1  ;;  %v2225_v44 = vshll.u32 %v7740_v46, 16  ;;  %v2463_v16 = vrot.slane %v2213_v59, 4 }
 0x195   : > { %v2454_v23 = vsel %vm7354_vm7, %v2452_v49, %v2453_v14  ;;  %6502 = vmatprep.mubr.bf16.mxu0 %v5653_v31  ;;  %v2462_v5 = vsel %vm7354_vm7, %v2457_v20, %v7301_v26  ;;  %v2464_v22 = vrot.slane %v2216_v38, 5  ;;  %v2235_v18 = vshrl.u32 %v7754_v55, 16 }
 0x196   : > { %v2469_v43 = vrot.slane %v2222_v13, 4  ;;  %v5654_v14 = vcombine.low %v2454_v23, %v2462_v5  ;;  %3004 = vmatmul.mubr.bf16.gmra.mxu1 %v5617_v45  ;;  %v2467_v2 = vrot.slane %v2225_v44, 5  ;;  %v9523_v47 = vshll.u32 %v7754_v55, 16 }
 0x197   : > { %v2244_v8 = vshrl.u32 %v7759_v34, 16  ;;  %3011 = vmatprep.mubr.bf16.mxu1 %v5634_v61  ;;  %v2465_v28 = vor.u32 %v2464_v22, %v2463_v16  ;;  %v2247_v26 = vshll.u32 %v7759_v34, 16  ;;  %v2477_v49 = vrot.slane %v2235_v18, 4 }
 0x198   : > { %v2105_v54 = vrot.slane %v2103_v11, 7  ;;  %6503 = vmatmul.mubr.bf16.gmra.mxu0 %v5654_v14  ;;  %v2470_v31 = vor.u32 %v2469_v43, %v2467_v2  ;;  %v2478_v20 = vrot.slane %v9523_v47, 5  ;;  %v2114_v61 = vrot.slane %v2112_v42, 7  ;;  %v7793_v11 = vld [vmem:[#allocation2 + $0x18] sm:$0xf] }
 0x199   : > { %v2483_v1 = vrot.slane %v2244_v8, 4  ;;  %v2466_v23 = vrot.slane %v2465_v28, 4  ;;  %v2481_v45 = vrot.slane %v2247_v26, 5  ;;  %v5635_v47 = vcombine.low %v7620_v17, %v7628_v33 }
 0x19a   : > { %v2108_v16 = vor.u32 %v2106_v58, %v2105_v54  ;;  %v2110_v5 = vrot.slane %v2105_v54, 4  ;;  %v2471_v22 = vrot.slane %v2470_v31, 4  ;;  %v2479_v43 = vor.u32 %v2478_v20, %v2477_v49 }
 0x19b   : > { %v2117_v14 = vor.u32 %v2115_v24, %v2114_v61  ;;  %v2468_v42 = vsel %vm7354_vm7, %v2466_v23, %v2467_v2  ;;  %v2484_v28 = vor.u32 %v2483_v1, %v2481_v45  ;;  %v9600_v58 = vshrl.u32 %v7336_v19, 16 }
 0x19c   : > { %v2109_v56 = vsel %vm7317_vm6, %v7310_v62, %v2108_v16  ;;  %v2476_v49 = vsel %vm7354_vm7, %v2471_v22, %v7303_v41  ;;  %v2480_v53 = vrot.slane %v2479_v43, 4  ;;  %v1020_v31 = vshrl.u32 %v7793_v11, 16 }
 0x19d   : > { %v1013_v54 = vrot.slane %v9600_v58, 7  ;;  %v2118_v24 = vsel %vm7317_vm6, %v2110_v5, %v2117_v14  ;;  %v5655_v20 = vcombine.low %v2468_v42, %v2476_v49  ;;  %v2485_v2 = vrot.slane %v2484_v28, 4  ;;  %v6823_v42 = vld [vmem:[#allocation2 + $0x14] sm:$0xf] }
 0x19e   : > { %v5618_v1 = vcombine.low %v2109_v56, %v2118_v24  ;;  %v1023_v61 = vshll.u32 %v7793_v11, 16  ;;  %v2482_v62 = vsel %vm7354_vm7, %v2480_v53, %v2481_v45  ;;  %v1022_v23 = vrot.slane %v1020_v31, 7  ;;  %v7829_v24 = vld [vmem:[#allocation2 + $0x24] sm:$0xf] }
 0x19f   : > { %v9601_v16 = vmov %v9600_v58  ;;  %v9602_v41 = vshll.u32 %v7336_v19, 16  ;;  %6506 = vmatprep.mubr.bf16.mxu0 %v5655_v20  ;;  %v2490_v5 = vsel %vm7354_vm7, %v2485_v2, %v7308_v60  ;;  %v1374_v14 = vrot.slane %v1020_v31, 4 }
 0x1a0   : > { %v1368_v58 = vrot.slane %v9601_v16, 4  ;;  %3012 = vmatmul.mubr.bf16.gmra.mxu1 %v5618_v1  ;;  %v7822_v43 = vrot.slane %v1023_v61, 5  ;;  %v5562_v28 = vcombine.low %v6823_v42, %v7793_v11  ;;  %v5656_v45 = vcombine.low %v2482_v62, %v2490_v5  ;;  %v7836_v1 = vld [vmem:[#allocation2 + $0x28] sm:$0xf]  ;;  %v7869_v42 = vld [vmem:[#allocation2 + $0x34] sm:$0xf] }
 0x1a1   : > { %v1369_v22 = vrot.slane %v9602_v41, 5  ;;  %3019 = vmatprep.mubr.bf16.mxu1 %v5635_v47  ;;  %v2127_v49 = vrot.slane %v2125_v4, 7  ;;  %v2136_v53 = vrot.slane %v2134_v6, 7  ;;  %v5636_v20 = vcombine.low %v7638_v15, %v7646_v36 }
 0x1a2   : > { %v1375_v60 = vor.u32 %v1374_v14, %v7822_v43  ;;  %v9603_v31 = vmov %v9602_v41  ;;  %v1018_v11 = vrot.slane %v1013_v54, 4  ;;  %6507 = vmatmul.mubr.bf16.gmra.mxu0 %v5656_v45  ;;  %v9604_v16 = vcombine.low %v7283_v50, %v7285_v51 }
 0x1a3   : > { %v1370_v56 = vor.u32 %v1369_v22, %v1368_v58  ;;  %v1016_v2 = vor.u32 %v9603_v31, %v1013_v54  ;;  %v2130_v4 = vor.u32 %v2128_v7, %v2127_v49  ;;  %v2132_v6 = vrot.slane %v2127_v49, 4 }
 0x1a4   : > { %v2139_v62 = vor.u32 %v2137_v40, %v2136_v53  ;;  %3405 = vmatprep.mubr.bf16.mxu0 %v9604_v16  ;;  %v7847_v58 = vrot.slane %v1375_v60, 4  ;;  %v1025_v54 = vor.u32 %v1023_v61, %v1022_v23  ;;  %v1033_v41 = vshrl.u32 %v7829_v24, 16  ;;  %v6784_v16 = vld [vmem:[#allocation8 + $0x230] sm:$0xff]  }
 0x1a5   : > { %v7838_v47 = vrot.slane %v1370_v56, 4  ;;  %v1017_v19 = vsel %vm7317_vm6, %v7312_v0, %v1016_v2  ;;  %v2131_v17 = vsel %vm7317_vm6, %v7338_v21, %v2130_v4  ;;  %v1036_v7 = vshll.u32 %v7829_v24, 16  ;;  %v7879_v2 = vld [vmem:[#allocation2 + $0x38] sm:$0xf] }
 0x1a6   : > { %v2140_v33 = vsel %vm7317_vm6, %v2132_v6, %v2139_v62  ;;  %v1042_v50 = vshrl.u32 %v7836_v1, 16  ;;  %v1026_v22 = vsel %vm7317_vm6, %v1018_v11, %v1025_v54  ;;  %v1035_v5 = vrot.slane %v1033_v41, 7 }
 0x1a7   : > { %v5619_v40 = vcombine.low %v2131_v17, %v2140_v33  ;;  %v9525_v0 = vshll.u32 %v7836_v1, 16  ;;  %v7863_v61 = vcombine.low %v1017_v19, %v1026_v22  ;;  %v7865_v14 = vrot.slane %v1033_v41, 4  ;;  %v1887_v22 = vld [vmem:[#allocation2 + $0xd0] sm:$0x8] }
 0x1a8   : > { %v1044_v23 = vrot.slane %v1042_v50, 7  ;;  %v7867_v21 = vrot.slane %v1036_v7, 5  ;;  %v7871_v45 = vrot.slane %v1042_v50, 4  ;;  %v5563_v56 = vcombine.low %v7829_v24, %v7836_v1  ;;  %v6803_v24 = vld [vmem:[#allocation8 + $0x218] sm:$0xff]  }
 0x1a9   : > { %3020 = vmatmul.mubr.bf16.gmra.mxu1 %v5619_v40  ;;  %v9605_v49 = vshrl.u32 %v7638_v15, 16  ;;  %v9606_v60 = vshrl.u32 %v7646_v36, 16  ;;  %v5637_v11 = vcombine.low %v7671_v12, %v7685_v63  ;;  %v1038_v4 = vor.u32 %v1036_v7, %v1035_v5  ;;  %v1890_v12 = vld [vmem:[#allocation2 + $0xe0] sm:$0x8] }
 0x1aa   : > { %3027 = vmatprep.mubr.bf16.mxu1 %v5636_v20  ;;  %v1040_v6 = vrot.slane %v1035_v5, 4  ;;  %v1047_v62 = vor.u32 %v9525_v0, %v1044_v23  ;;  %v9607_v19 = vshll.u32 %v7638_v15, 16  ;;  %v9608_v17 = vshll.u32 %v7646_v36, 16  ;;  %3406 = vmatmul.mubr.bf16.vlgmr.msra.gmra.mxu0 %v7341_v52  ;;  %v9609_v5 = vld [vmem:[#allocation17_spill] sm:$0xff] }
 0x1ab   : > { %v2149_v53 = vrot.slane %v9605_v49, 7  ;;  %v2158_v31 = vrot.slane %v9606_v60, 7  ;;  %v1055_v50 = vshrl.u32 %v7869_v42, 16  ;;  %v1039_v20 = vsel %vm7317_vm6, %v7329_v10, %v1038_v4  ;;  %3413 = vmatprep.mubr.bf16.mxu0 %v5562_v28  ;;  %6559 = vmatpush3.bf16.msra.mxu0 %v7538_v29  ;;  %v7909_v4 = vld [vmem:[#allocation2 + $0x44] sm:$0xf]  ;;  %v6791_v28 = vld [vmem:[#allocation8 + $0x228] sm:$0xff]  }
 0x1ac   : > { %v1048_v7 = vsel %vm7317_vm6, %v1040_v6, %v1047_v62  ;;  %v1058_v40 = vshll.u32 %v7869_v42, 16  ;;  %v1064_v15 = vshrl.u32 %v7879_v2, 16  ;;  %v9524_v60 = vshll.u32 %v7879_v2, 16  ;;  %6560 = vmatprep.subr.bf16.mxu0 %v6784_v16 }
 0x1ad   : > { %v2152_v54 = vor.u32 %v9607_v19, %v2149_v53  ;;  %v2154_v41 = vrot.slane %v2149_v53, 4  ;;  %v2161_v33 = vor.u32 %v9608_v17, %v2158_v31  ;;  %v7903_v23 = vcombine.low %v1039_v20, %v1048_v7 }
 0x1ae   : > { %v1057_v49 = vrot.slane %v1055_v50, 7  ;;  %v1066_v53 = vrot.slane %v1064_v15, 7  ;;  %v7907_v31 = vrot.slane %v1055_v50, 4  ;;  %v7911_v6 = vrot.slane %v1058_v40, 5  ;;  %v7923_v50 = vld [vmem:[#allocation2 + $0x48] sm:$0xf] }
 0x1af   : > { %v2153_v36 = vsel %vm7317_vm6, %v9609_v5, %v2152_v54  ;;  %v2162_v52 = vsel %vm7317_vm6, %v2154_v41, %v2161_v33  ;;  %v7913_v62 = vrot.slane %v1064_v15, 4  ;;  %v5564_v19 = vcombine.low %v7869_v42, %v7879_v2  ;;  %6561 = vmatpush3.bf16.msra.mxu0 %v6784_v16 }
 0x1b0   : > { %v5620_v10 = vcombine.low %v2153_v36, %v2162_v52  ;;  %v2164_v54 = vshrl.u32 %v1887_v22, 16  ;;  %v2171_v29 = vrot.slane %v2169_v37, 7  ;;  %v2180_v41 = vrot.slane %v2178_v35, 7  ;;  %6562 = vmatprep.subr.bf16.mxu0 %v6791_v28  ;;  %v6798_v52 = vld [vmem:[#allocation8 + $0x220] sm:$0xff]  }
 0x1b1   : > { %v5638_v17 = vcombine.low %v7697_v9, %v7705_v30  ;;  %v1060_v33 = vor.u32 %v1058_v40, %v1057_v49  ;;  %v1062_v7 = vrot.slane %v1057_v49, 4  ;;  %v1069_v15 = vor.u32 %v9524_v60, %v1066_v53  ;;  %v9610_v40 = vld [vmem:[#allocation16_spill] sm:$0xff] }
 0x1b2   : > { %3028 = vmatmul.mubr.bf16.gmra.mxu1 %v5620_v10  ;;  %v5605_v20 = vrot.slane %v2164_v54, 11  ;;  %v1077_v22 = vshrl.u32 %v7909_v4, 16  ;;  %v2174_v37 = vor.u32 %v2172_v48, %v2171_v29  ;;  %v2176_v35 = vrot.slane %v2171_v29, 4  ;;  %3414 = vmatmul.mubr.bf16.gmra.mxu0 %v7863_v61  ;;  %v944_v54 = vld [vmem:[#allocation2 + $0x40] sm:$0x8] }
 0x1b3   : > { %3035 = vmatprep.mubr.bf16.mxu1 %v5637_v11  ;;  %v2183_v5 = vor.u32 %v2181_v57, %v2180_v41  ;;  %v1061_v36 = vsel %vm7317_vm6, %v9610_v40, %v1060_v33  ;;  %v1070_v49 = vsel %vm7317_vm6, %v1062_v7, %v1069_v15  ;;  %v1080_v16 = vshll.u32 %v7909_v4, 16  ;;  %3421 = vmatprep.mubr.bf16.mxu0 %v5563_v56  ;;  %v7966_v40 = vld [vmem:[#allocation2 + $0x58] sm:$0xf] }
 0x1b4   : > { %v1079_v10 = vrot.slane %v1077_v22, 7  ;;  %v1086_v11 = vshrl.u32 %v7923_v50, 16  ;;  %v2175_v63 = vsel %vm7317_vm6, %v5605_v20, %v2174_v37  ;;  %v7944_v57 = vcombine.low %v1061_v36, %v1070_v49  ;;  %6563 = vmatpush3.bf16.msra.mxu0 %v6791_v28 }
 0x1b5   : > { %v2184_v48 = vsel %vm7317_vm6, %v2176_v35, %v2183_v5  ;;  %v1089_v53 = vshll.u32 %v7923_v50, 16  ;;  %v7950_v33 = vrot.slane %v1077_v22, 4  ;;  %v7952_v61 = vrot.slane %v1080_v16, 5  ;;  %v7960_v35 = vld [vmem:[#allocation2 + $0x54] sm:$0xf]  ;;  %6564 = vmatprep.subr.bf16.mxu0 %v6798_v52 }
 0x1b6   : > { %v5621_v29 = vcombine.low %v2175_v63, %v2184_v48  ;;  %v1088_v41 = vrot.slane %v1086_v11, 7  ;;  %v7954_v20 = vrot.slane %v1086_v11, 4  ;;  %v5565_v7 = vcombine.low %v7909_v4, %v7923_v50 }
 0x1b7   : > { %v2186_v15 = vshrl.u32 %v1890_v12, 16  ;;  %v2193_v37 = vrot.slane %v2191_v39, 7  ;;  %v2202_v56 = vrot.slane %v2200_v25, 7  ;;  %v5639_v22 = vcombine.low %v7730_v32, %v7740_v46 }
 0x1b8   : > { %v1072_v28 = vshrl.u32 %v944_v54, 16  ;;  %v1082_v5 = vor.u32 %v1080_v16, %v1079_v10  ;;  %v9611_v49 = vshll.u32 %v7697_v9, 16  ;;  %v1084_v39 = vrot.slane %v1079_v10, 4  ;;  %6565 = vmatpush3.bf16.msra.mxu0 %v6798_v52 }
 0x1b9   : > { %v5606_v36 = vrot.slane %v2186_v15, 11  ;;  %v2198_v12 = vrot.slane %v2193_v37, 4  ;;  %v9612_v63 = vshll.u32 %v7705_v30, 16  ;;  %v1091_v25 = vor.u32 %v1089_v53, %v1088_v41  ;;  %6566 = vmatprep.subr.bf16.mxu0 %v6803_v24  ;;  %v6805_v30 = vld [vmem:[#allocation8 + $0x210] sm:$0xff]  }
 0x1ba   : > { %v2196_v11 = vor.u32 %v9611_v49, %v2193_v37  ;;  %3036 = vmatmul.mubr.bf16.gmra.mxu1 %v5621_v29  ;;  %v5533_v60 = vrot.slane %v1072_v28, 11  ;;  %v1099_v0 = vshrl.u32 %v7960_v35, 16  ;;  %v1102_v9 = vshll.u32 %v7960_v35, 16  ;;  %v1893_v29 = vld [vmem:[#allocation2 + $0xf0] sm:$0x8]  ;;  %3422 = vmatmul.mubr.bf16.gmra.mxu0 %v7903_v23 }
 0x1bb   : > { %v2205_v48 = vor.u32 %v9612_v63, %v2202_v56  ;;  %3043 = vmatprep.mubr.bf16.mxu1 %v5638_v17  ;;  %v1108_v54 = vshrl.u32 %v7966_v40, 16  ;;  %v1111_v10 = vshll.u32 %v7966_v40, 16  ;;  %v1092_v17 = vsel %vm7317_vm6, %v1084_v39, %v1091_v25  ;;  %v947_v37 = vld [vmem:[#allocation2 + $0x50] sm:$0x8]  ;;  %3429 = vmatprep.mubr.bf16.mxu0 %v5564_v19  ;;  %v8000_v39 = vld [vmem:[#allocation2 + $0x64] sm:$0xf] }
 0x1bc   : > { %v2197_v16 = vsel %vm7317_vm6, %v5606_v36, %v2196_v11  ;;  %v1083_v41 = vsel %vm7317_vm6, %v5533_v60, %v1082_v5  ;;  %v1101_v52 = vrot.slane %v1099_v0, 7  ;;  %v7989_v49 = vrot.slane %v1099_v0, 4  ;;  %6567 = vmatpush3.bf16.msra.mxu0 %v6803_v24  ;;  %v8008_v63 = vld [vmem:[#allocation2 + $0x68] sm:$0xf] }
 0x1bd   : > { %v2206_v15 = vsel %vm7317_vm6, %v2198_v12, %v2205_v48  ;;  %v7987_v28 = vcombine.low %v1083_v41, %v1092_v17  ;;  %v1110_v36 = vrot.slane %v1108_v54, 7  ;;  %v7994_v11 = vrot.slane %v1102_v9, 5  ;;  %6568 = vmatprep.subr.bf16.mxu0 %v6805_v30  ;;  %v6807_v48 = vld [vmem:[#allocation8 + $0x208] sm:$0xff]  }
 0x1be   : > { %v5622_v56 = vcombine.low %v2197_v16, %v2206_v15  ;;  %v7996_v60 = vrot.slane %v1108_v54, 4  ;;  %v5566_v5 = vcombine.low %v7960_v35, %v7966_v40  ;;  %v2208_v12 = vshrl.u32 %v1893_v29, 16  ;;  %v6787_v40 = vld [vmem:[#allocation8 + $0x1a0] sm:$0xff]  }
 0x1bf   : > { %v2215_v23 = vrot.slane %v2213_v59, 7  ;;  %v2224_v0 = vrot.slane %v2222_v13, 7  ;;  %v5640_v42 = vcombine.low %v7754_v55, %v7759_v34  ;;  %v1094_v19 = vshrl.u32 %v947_v37, 16  ;;  %v1896_v37 = vld [vmem:[#allocation2 + $0x100] sm:$0x8]  ;;  %v9614_v34 = vld [vmem:[#allocation13_spill] sm:$0xff] }
 0x1c0   : > { %v5607_v25 = vrot.slane %v2208_v12, 11  ;;  %v1104_v16 = vor.u32 %v1102_v9, %v1101_v52  ;;  %v1106_v54 = vrot.slane %v1101_v52, 4  ;;  %v1113_v24 = vor.u32 %v1111_v10, %v1110_v36  ;;  %6569 = vmatpush3.bf16.msra.mxu0 %v6805_v30  ;;  %v6808_v36 = vld [vmem:[#allocation8 + $0x200] sm:$0xff]  }
 0x1c1   : > { %v2218_v59 = vor.u32 %v2216_v38, %v2215_v23  ;;  %v2220_v29 = vrot.slane %v2215_v23, 4  ;;  %v2227_v13 = vor.u32 %v2225_v44, %v2224_v0  ;;  %v5534_v15 = vrot.slane %v1094_v19, 11  ;;  %6570 = vmatprep.subr.bf16.mxu0 %v6807_v48  ;;  %v8030_v0 = vld [vmem:[#allocation2 + $0x74] sm:$0xf] }
 0x1c2   : > { %3044 = vmatmul.mubr.bf16.gmra.mxu1 %v5622_v56  ;;  %v1114_v41 = vsel %vm7317_vm6, %v1106_v54, %v1113_v24  ;;  %v1121_v17 = vshrl.u32 %v8000_v39, 16  ;;  %v1124_v9 = vshll.u32 %v8000_v39, 16  ;;  %v1130_v52 = vshrl.u32 %v8008_v63, 16  ;;  %v950_v56 = vld [vmem:[#allocation2 + $0x60] sm:$0x8]  ;;  %3430 = vmatmul.mubr.bf16.gmra.mxu0 %v7944_v57 }
 0x1c3   : > { %3051 = vmatprep.mubr.bf16.mxu1 %v5639_v22  ;;  %v2219_v32 = vsel %vm7317_vm6, %v5607_v25, %v2218_v59  ;;  %v2228_v46 = vsel %vm7317_vm6, %v2220_v29, %v2227_v13  ;;  %v1105_v38 = vsel %vm7317_vm6, %v5534_v15, %v1104_v16  ;;  %v1133_v44 = vshll.u32 %v8008_v63, 16  ;;  %3437 = vmatprep.mubr.bf16.mxu0 %v5565_v7 }
 0x1c4   : > { %v5623_v12 = vcombine.low %v2219_v32, %v2228_v46  ;;  %v8028_v23 = vcombine.low %v1105_v38, %v1114_v41  ;;  %v1123_v30 = vrot.slane %v1121_v17, 7  ;;  %v1132_v22 = vrot.slane %v1130_v52, 7  ;;  %6571 = vmatpush3.bf16.msra.mxu0 %v6807_v48 }
 0x1c5   : > { %v8033_v19 = vrot.slane %v1121_v17, 4  ;;  %v8035_v25 = vrot.slane %v1124_v9, 5  ;;  %v8037_v16 = vrot.slane %v1130_v52, 4  ;;  %v5567_v54 = vcombine.low %v8000_v39, %v8008_v63  ;;  %v8050_v17 = vld [vmem:[#allocation2 + $0x78] sm:$0xf]  ;;  %6572 = vmatprep.subr.bf16.mxu0 %v6808_v36  ;;  %v6789_v63 = vld [vmem:[#allocation8 + $0x1d8] sm:$0xff]  }
 0x1c6   : > { %v2230_v24 = vshrl.u32 %v1896_v37, 16  ;;  %v2237_v59 = vrot.slane %v2235_v18, 7  ;;  %v2246_v57 = vrot.slane %v2244_v8, 7  ;;  %v1116_v29 = vshrl.u32 %v950_v56, 16 }
 0x1c7   : > { %v1126_v13 = vor.u32 %v1124_v9, %v1123_v30  ;;  %v1128_v15 = vrot.slane %v1123_v30, 4  ;;  %v1135_v41 = vor.u32 %v1133_v44, %v1132_v22  ;;  %v1143_v52 = vshrl.u32 %v8030_v0, 16 }
 0x1c8   : > { %v5608_v4 = vrot.slane %v2230_v24, 11  ;;  %v9613_v7 = vshll.u32 %v7754_v55, 16  ;;  %v2242_v18 = vrot.slane %v2237_v59, 4  ;;  %v2249_v8 = vor.u32 %v2247_v26, %v2246_v57  ;;  %v1335_v24 = vld [vmem:[#allocation2 + $0xc] sm:$0x1]  ;;  %6573 = vmatpush3.bf16.msra.mxu0 %v6808_v36 }
 0x1c9   : > { %v5535_v46 = vrot.slane %v1116_v29, 11  ;;  %v1136_v48 = vsel %vm7317_vm6, %v1128_v15, %v1135_v41  ;;  %v1145_v9 = vrot.slane %v1143_v52, 7  ;;  %v1146_v38 = vshll.u32 %v8030_v0, 16  ;;  %v1336_v29 = vld [vmem:[#allocation2 + $0x1c] sm:$0x1] }
 0x1ca   : > { %v2240_v32 = vor.u32 %v9613_v7, %v2237_v59  ;;  %3052 = vmatmul.mubr.bf16.gmra.mxu1 %v5623_v12  ;;  %v2250_v56 = vsel %vm7317_vm6, %v2242_v18, %v2249_v8  ;;  %v1152_v30 = vshrl.u32 %v8050_v17, 16  ;;  %v1155_v22 = vshll.u32 %v8050_v17, 16  ;;  %v1337_v15 = vld [vmem:[#allocation2 + $0x2c] sm:$0x1]  ;;  %v953_v55 = vld [vmem:[#allocation2 + $0x70] sm:$0x8]  ;;  %3438 = vmatmul.mubr.bf16.gmra.mxu0 %v7987_v28 }
 0x1cb   : > { %3059 = vmatprep.mubr.bf16.mxu1 %v5640_v42  ;;  %v1127_v12 = vsel %vm7317_vm6, %v5535_v46, %v1126_v13  ;;  %v8071_v59 = vrot.slane %v1143_v52, 4  ;;  %v8073_v57 = vrot.slane %v1146_v38, 5  ;;  %v5568_v36 = vcombine.low %v8030_v0, %v8050_v17  ;;  %v9615_v42 = vld [vmem:[#allocation14_spill] sm:$0xff]  ;;  %3445 = vmatprep.mubr.bf16.mxu0 %v5566_v5 }
 0x1cc   : > { %v2241_v37 = vsel %vm7317_vm6, %v5608_v4, %v2240_v32  ;;  %v8075_v41 = vcombine.low %v1127_v12, %v1136_v48  ;;  %v1154_v4 = vrot.slane %v1152_v30, 7  ;;  %v8077_v7 = vrot.slane %v1152_v30, 4  ;;  %v9618_v30 = vld [vmem:[#allocation15_spill] sm:$0xff]  ;;  %v6783_v0 = vld [vmem:[#allocation8 + $0x1a8] sm:$0xff]  }
 0x1cd   : > { %v5624_v26 = vcombine.low %v2241_v37, %v2250_v56  ;;  %v1356_v13 = vor.u32 %v9615_v42, %v9614_v34  ;;  %v9616_v52 = vshll.u32 %v7285_v51, 16  ;;  %v1364_v18 = vshll.u32 %v1335_v24, 16 }
 0x1ce   : > { %v1373_v8 = vsel %vm7354_vm7, %v7838_v47, %v7822_v43  ;;  %v1378_v46 = vshll.u32 %v1336_v29, 16  ;;  %v1384_v28 = vor.u32 %v7867_v21, %v7865_v14  ;;  %v9617_v48 = vshll.u32 %v7836_v1, 16  ;;  %v8101_v21 = vld [vmem:[#allocation2 + $0x84] sm:$0xf] }
 0x1cf   : > { %v1358_v32 = vrot.slane %v9616_v52, 5  ;;  %v1392_v56 = vshll.u32 %v1337_v15, 16  ;;  %v1357_v51 = vrot.slane %v1356_v13, 4  ;;  %v1366_v12 = vrot.slane %v1364_v18, 5 }
 0x1d0   : > { %v1386_v37 = vrot.slane %v9617_v48, 5  ;;  %v1138_v34 = vshrl.u32 %v953_v55, 16  ;;  %v1380_v42 = vrot.slane %v1378_v46, 5  ;;  %v1385_v52 = vrot.slane %v1384_v28, 4 }
 0x1d1   : > { %v1361_v24 = vor.u32 %v9618_v30, %v1358_v32  ;;  %v1394_v47 = vrot.slane %v1392_v56, 5  ;;  %v1359_v35 = vsel %vm7354_vm7, %v1357_v51, %v1358_v32  ;;  %v1148_v14 = vor.u32 %v1146_v38, %v1145_v9  ;;  %v1338_v51 = vld [vmem:[#allocation2 + $0x3c] sm:$0x1] }
 0x1d2   : > { %v1389_v43 = vor.u32 %v7871_v45, %v1386_v37  ;;  %v5536_v29 = vrot.slane %v1138_v34, 11  ;;  %3060 = vmatmul.mubr.bf16.gmra.mxu1 %v5624_v26  ;;  %v1381_v1 = vsel %vm7354_vm7, %v7847_v58, %v1380_v42  ;;  %v1387_v15 = vsel %vm7354_vm7, %v1385_v52, %v1386_v37  ;;  %v8108_v45 = vld [vmem:[#allocation2 + $0x88] sm:$0xf]  ;;  %3446 = vmatmul.mubr.bf16.gmra.mxu0 %v8028_v23  ;;  %v956_v34 = vld [vmem:[#allocation2 + $0x80] sm:$0x8]  ;;  %v6776_v42 = vld [vmem:[#allocation8 + $0x1b8] sm:$0xff]  }
 0x1d3   : > { %v1362_v5 = vrot.slane %v1361_v24, 4  ;;  %v1150_v13 = vrot.slane %v1145_v9, 4  ;;  %v5578_v18 = vcombine.low %v1373_v8, %v1381_v1  ;;  %v1157_v26 = vor.u32 %v1155_v22, %v1154_v4  ;;  %v1339_v4 = vld [vmem:[#allocation2 + $0x4c] sm:$0x1]  ;;  %3453 = vmatprep.mubr.bf16.mxu0 %v5567_v54  ;;  %v6779_v54 = vld [vmem:[#allocation8 + $0x1f0] sm:$0xff]  }
 0x1d4   : > { %v1390_v55 = vrot.slane %v1389_v43, 4  ;;  %v1149_v38 = vsel %vm7317_vm6, %v5536_v29, %v1148_v14  ;;  %v1165_v28 = vshrl.u32 %v8101_v21, 16  ;;  %v1168_v9 = vshll.u32 %v8101_v21, 16 }
 0x1d5   : > { %v1367_v32 = vsel %vm7354_vm7, %v1362_v5, %v1366_v12  ;;  %v1158_v8 = vsel %vm7317_vm6, %v1150_v13, %v1157_v26  ;;  %v1174_v37 = vshrl.u32 %v8108_v45, 16  ;;  %v1177_v56 = vshll.u32 %v8108_v45, 16 }
 0x1d6   : > { %v5577_v46 = vcombine.low %v1359_v35, %v1367_v32  ;;  %v1395_v58 = vsel %vm7354_vm7, %v1390_v55, %v1394_v47  ;;  %v8128_v30 = vcombine.low %v1149_v38, %v1158_v8  ;;  %v1167_v24 = vrot.slane %v1165_v28, 7 }
 0x1d7   : > { %v5579_v48 = vcombine.low %v1387_v15, %v1395_v58  ;;  %v8130_v12 = vrot.slane %v1165_v28, 4  ;;  %v8132_v23 = vrot.slane %v1168_v9, 5  ;;  %v1176_v52 = vrot.slane %v1174_v37, 7 }
 0x1d8   : > { %6526 = vmatprep.mubr.bf16.mxu1 %v5577_v46  ;;  %v8134_v43 = vrot.slane %v1174_v37, 4  ;;  %v5569_v47 = vcombine.low %v8101_v21, %v8108_v45  ;;  %v1398_v39 = vor.u32 %v7911_v6, %v7907_v31  ;;  %v9619_v35 = vshll.u32 %v7879_v2, 16  ;;  %v8148_v2 = vld [vmem:[#allocation2 + $0x94] sm:$0xf]  ;;  %v8150_v46 = vld [vmem:[#allocation2 + $0x98] sm:$0xf] }
 0x1d9   : > { %v1406_v29 = vshll.u32 %v1338_v51, 16  ;;  %v1412_v14 = vor.u32 %v7952_v61, %v7950_v33  ;;  %v1414_v1 = vrot.slane %v1089_v53, 5  ;;  %v1420_v55 = vshll.u32 %v1339_v4, 16  ;;  %v6780_v53 = vld [vmem:[#allocation8 + $0x1b0] sm:$0xff]   ;;  %v8243_v45 = vld [vmem:[#allocation2 + $0xb8] sm:$0xf] }
 0x1da   : > { %v1400_v5 = vrot.slane %v9619_v35, 5  ;;  %v1399_v15 = vrot.slane %v1398_v39, 4  ;;  %v1160_v13 = vshrl.u32 %v956_v34, 16  ;;  %v1170_v32 = vor.u32 %v1168_v9, %v1167_v24  ;;  %6527 = vmatmul.mubr.bf16.vlgmr.msra.gmra.mxu1 %v5578_v18  ;;  %v6782_v9 = vld [vmem:[#allocation8 + $0x1e8] sm:$0xff]   ;;  %3454 = vmatmul.mubr.bf16.gmra.mxu0 %v8075_v41 }
 0x1db   : > { %v1408_v26 = vrot.slane %v1406_v29, 5  ;;  %v1413_v31 = vrot.slane %v1412_v14, 4  ;;  %v1417_v6 = vor.u32 %v7954_v20, %v1414_v1  ;;  %6285 = vmatpush3.bf16.msra.mxu1 %v6776_v42  ;;  %6530 = vmatprep.mubr.bf16.mxu1 %v5579_v48  ;;  %v1422_v33 = vrot.slane %v1420_v55, 5  ;;  %v1340_v42 = vld [vmem:[#allocation2 + $0x5c] sm:$0x1]  ;;  %v6786_v55 = vld [vmem:[#allocation8 + $0x1e0] sm:$0xff]  }
 0x1dc   : > { %v1403_v38 = vor.u32 %v7913_v62, %v1400_v5  ;;  %v1401_v50 = vsel %vm7354_vm7, %v1399_v15, %v1400_v5  ;;  %v5537_v61 = vrot.slane %v1160_v13, 11  ;;  %v1172_v58 = vrot.slane %v1167_v24, 4  ;;  %6286 = vmatprep.subr.bf16.mxu1 %v6779_v54  ;;  %3461 = vmatprep.mubr.bf16.mxu0 %v5568_v36  ;;  %v1341_v36 = vld [vmem:[#allocation2 + $0x6c] sm:$0x1]  ;;  %v959_v5 = vld [vmem:[#allocation2 + $0x90] sm:$0x8] }
 0x1dd   : > { %v1415_v62 = vsel %vm7354_vm7, %v1413_v31, %v1414_v1  ;;  %v1418_v28 = vrot.slane %v1417_v6, 4  ;;  %v1179_v20 = vor.u32 %v1177_v56, %v1176_v52  ;;  %v1187_v8 = vshrl.u32 %v8148_v2, 16 }
 0x1de   : > { %v1404_v18 = vrot.slane %v1403_v38, 4  ;;  %v1171_v48 = vsel %vm7317_vm6, %v5537_v61, %v1170_v32  ;;  %v1190_v37 = vshll.u32 %v8148_v2, 16  ;;  %v1196_v51 = vshrl.u32 %v8150_v46, 16 }
 0x1df   : > { %v1423_v24 = vsel %vm7354_vm7, %v1418_v28, %v1422_v33  ;;  %v1180_v41 = vsel %vm7317_vm6, %v1172_v58, %v1179_v20  ;;  %v1199_v34 = vshll.u32 %v8150_v46, 16  ;;  %6287 = vmatpush3.bf16.msra.mxu1 %v6780_v53  ;;  %v1189_v35 = vrot.slane %v1187_v8, 7 }
 0x1e0   : > { %v1409_v4 = vsel %vm7354_vm7, %v1404_v18, %v1408_v26  ;;  %v5581_v39 = vcombine.low %v1415_v62, %v1423_v24  ;;  %v8174_v54 = vcombine.low %v1171_v48, %v1180_v41  ;;  %v1198_v29 = vrot.slane %v1196_v51, 7  ;;  %6288 = vmatprep.subr.bf16.mxu1 %v6782_v9 }
 0x1e1   : > { %v5580_v52 = vcombine.low %v1401_v50, %v1409_v4  ;;  %v8176_v14 = vrot.slane %v1187_v8, 4  ;;  %v8178_v1 = vrot.slane %v1190_v37, 5  ;;  %v8180_v15 = vrot.slane %v1196_v51, 4 }
 0x1e2   : > { %v5570_v13 = vcombine.low %v8148_v2, %v8150_v46  ;;  %v1426_v32 = vor.u32 %v7994_v11, %v7989_v49  ;;  %v1428_v38 = vrot.slane %v1111_v10, 5  ;;  %v1434_v26 = vshll.u32 %v1340_v42, 16  ;;  %v8193_v11 = vld [vmem:[#allocation2 + $0xa4] sm:$0xf]  ;;  %3462 = vmatmul.mubr.bf16.gmra.mxu0 %v8128_v30 }
 0x1e3   : > { %6531 = vmatmul.mubr.bf16.gmra.mxu1 %v5580_v52  ;;  %v1440_v31 = vor.u32 %v8035_v25, %v8033_v19  ;;  %v1442_v6 = vrot.slane %v1133_v44, 5  ;;  %v1448_v50 = vshll.u32 %v1341_v36, 16  ;;  %v1182_v53 = vshrl.u32 %v959_v5, 16  ;;  %v8196_v25 = vld [vmem:[#allocation2 + $0xa8] sm:$0xf]  ;;  %3469 = vmatprep.mubr.bf16.mxu0 %v5569_v47  ;;  %v6790_v47 = vld [vmem:[#allocation8 + $0x198] sm:$0xff]  }
 0x1e4   : > { %6534 = vmatprep.mubr.bf16.mxu1 %v5581_v39  ;;  %v1427_v33 = vrot.slane %v1426_v32, 4  ;;  %v1431_v61 = vor.u32 %v7996_v60, %v1428_v38  ;;  %v1436_v58 = vrot.slane %v1434_v26, 5  ;;  %6289 = vmatpush3.bf16.msra.mxu1 %v6783_v0  ;;  %v1192_v49 = vor.u32 %v1190_v37, %v1189_v35  ;;  %v1342_v52 = vld [vmem:[#allocation2 + $0x7c] sm:$0x1]  ;;  %v1343_v39 = vld [vmem:[#allocation2 + $0x8c] sm:$0x1] }
 0x1e5   : > { %v1441_v10 = vrot.slane %v1440_v31, 4  ;;  %v1445_v18 = vor.u32 %v8037_v16, %v1442_v6  ;;  %v1450_v62 = vrot.slane %v1448_v50, 5  ;;  %v5538_v19 = vrot.slane %v1182_v53, 11  ;;  %6290 = vmatprep.subr.bf16.mxu1 %v6786_v55  ;;  %v962_v55 = vld [vmem:[#allocation2 + $0xa0] sm:$0x8] }
 0x1e6   : > { %v1429_v60 = vsel %vm7354_vm7, %v1427_v33, %v1428_v38  ;;  %v1432_v44 = vrot.slane %v1431_v61, 4  ;;  %v1194_v28 = vrot.slane %v1189_v35, 4  ;;  %v1201_v20 = vor.u32 %v1199_v34, %v1198_v29  ;;  %v6793_v35 = vld [vmem:[#allocation8 + $0x1d0] sm:$0xff]  }
 0x1e7   : > { %v1443_v16 = vsel %vm7354_vm7, %v1441_v10, %v1442_v6  ;;  %v1446_v9 = vrot.slane %v1445_v18, 4  ;;  %v1193_v48 = vsel %vm7317_vm6, %v5538_v19, %v1192_v49  ;;  %v1209_v30 = vshrl.u32 %v8193_v11, 16  ;;  %v6794_v61 = vld [vmem:[#allocation8 + $0x190] sm:$0xff]   ;;  %v6796_v18 = vld [vmem:[#allocation8 + $0x1c8] sm:$0xff]  }
 0x1e8   : > { %v1437_v8 = vsel %vm7354_vm7, %v1432_v44, %v1436_v58  ;;  %v1202_v37 = vsel %vm7317_vm6, %v1194_v28, %v1201_v20  ;;  %v1212_v51 = vshll.u32 %v8193_v11, 16  ;;  %v1218_v21 = vshrl.u32 %v8196_v25, 16  ;;  %6291 = vmatpush3.bf16.msra.mxu1 %v6787_v40  ;;  %v6800_v20 = vld [vmem:[#allocation8 + $0x1c0] sm:$0xff]  }
 0x1e9   : > { %v5582_v4 = vcombine.low %v1429_v60, %v1437_v8  ;;  %v1451_v24 = vsel %vm7354_vm7, %v1446_v9, %v1450_v62  ;;  %v8219_v41 = vcombine.low %v1193_v48, %v1202_v37  ;;  %v1211_v42 = vrot.slane %v1209_v30, 7  ;;  %6292 = vmatprep.subr.bf16.mxu1 %v6789_v63  ;;  %v6797_v60 = vld [vmem:[#allocation8 + $0x188] sm:$0xff]  }
 0x1ea   : > { %v5583_v0 = vcombine.low %v1443_v16, %v1451_v24  ;;  %v1220_v36 = vrot.slane %v1218_v21, 7  ;;  %v1221_v5 = vshll.u32 %v8196_v25, 16  ;;  %v8222_v29 = vrot.slane %v1209_v30, 4  ;;  %3470 = vmatmul.mubr.bf16.gmra.mxu0 %v8174_v54  ;;  %v1344_v8 = vld [vmem:[#allocation2 + $0x9c] sm:$0x1] }
 0x1eb   : > { %6535 = vmatmul.mubr.bf16.gmra.mxu1 %v5582_v4  ;;  %v8224_v32 = vrot.slane %v1212_v51, 5  ;;  %v8226_v38 = vrot.slane %v1218_v21, 4  ;;  %v5571_v26 = vcombine.low %v8193_v11, %v8196_v25  ;;  %v1454_v31 = vor.u32 %v8073_v57, %v8071_v59  ;;  %3477 = vmatprep.mubr.bf16.mxu0 %v5570_v13  ;;  %v1345_v4 = vld [vmem:[#allocation2 + $0xac] sm:$0x1]  ;;  %v965_v24 = vld [vmem:[#allocation2 + $0xb0] sm:$0x8] }
 0x1ec   : > { %6538 = vmatprep.mubr.bf16.mxu1 %v5583_v0  ;;  %v1456_v6 = vrot.slane %v1155_v22, 5  ;;  %v1462_v50 = vshll.u32 %v1342_v52, 16  ;;  %v1468_v53 = vor.u32 %v8132_v23, %v8130_v12  ;;  %v1470_v33 = vrot.slane %v1177_v56, 5  ;;  %6293 = vmatpush3.bf16.msra.mxu1 %v6790_v47  ;;  %v8241_v12 = vld [vmem:[#allocation2 + $0xb4] sm:$0xf] }
 0x1ed   : > { %v1455_v58 = vrot.slane %v1454_v31, 4  ;;  %v1476_v49 = vshll.u32 %v1343_v39, 16  ;;  %v1204_v40 = vshrl.u32 %v962_v55, 16  ;;  %v1214_v10 = vor.u32 %v1212_v51, %v1211_v42  ;;  %6294 = vmatprep.subr.bf16.mxu1 %v6793_v35  ;;  %v6801_v0 = vld [vmem:[#allocation8 + $0x180] sm:$0xff]  }
 0x1ee   : > { %v1459_v17 = vor.u32 %v8077_v7, %v1456_v6  ;;  %v1464_v22 = vrot.slane %v1462_v50, 5  ;;  %v1469_v59 = vrot.slane %v1468_v53, 4  ;;  %v1473_v57 = vor.u32 %v8134_v43, %v1470_v33 }
 0x1ef   : > { %v1457_v56 = vsel %vm7354_vm7, %v1455_v58, %v1456_v6  ;;  %v1478_v23 = vrot.slane %v1476_v49, 5  ;;  %v5539_v62 = vrot.slane %v1204_v40, 11  ;;  %v1216_v54 = vrot.slane %v1211_v42, 4  ;;  %v8288_v49 = vld [vmem:[#allocation2 + $0xc4] sm:$0xf] }
 0x1f0   : > { %v1460_v19 = vrot.slane %v1459_v17, 4  ;;  %v1471_v7 = vsel %vm7354_vm7, %v1469_v59, %v1470_v33  ;;  %v1474_v63 = vrot.slane %v1473_v57, 4  ;;  %v1223_v43 = vor.u32 %v1221_v5, %v1220_v36  ;;  %6295 = vmatpush3.bf16.msra.mxu1 %v6794_v61 }
 0x1f1   : > { %v1215_v2 = vsel %vm7317_vm6, %v5539_v62, %v1214_v10  ;;  %v1231_v13 = vshrl.u32 %v8241_v12, 16  ;;  %v1234_v44 = vshll.u32 %v8241_v12, 16  ;;  %v1240_v28 = vshrl.u32 %v8243_v45, 16  ;;  %6296 = vmatprep.subr.bf16.mxu1 %v6796_v18 }
 0x1f2   : > { %v1465_v16 = vsel %vm7354_vm7, %v1460_v19, %v1464_v22  ;;  %v1479_v9 = vsel %vm7354_vm7, %v1474_v63, %v1478_v23  ;;  %v1224_v48 = vsel %vm7317_vm6, %v1216_v54, %v1223_v43  ;;  %v1243_v30 = vshll.u32 %v8243_v45, 16  ;;  %3478 = vmatmul.mubr.bf16.gmra.mxu0 %v8219_v41  ;;  %v1346_v43 = vld [vmem:[#allocation2 + $0xbc] sm:$0x1] }
 0x1f3   : > { %v5584_v37 = vcombine.low %v1457_v56, %v1465_v16  ;;  %v5585_v51 = vcombine.low %v1471_v7, %v1479_v9  ;;  %v5555_v21 = vcombine.low %v1215_v2, %v1224_v48  ;;  %v1233_v47 = vrot.slane %v1231_v13, 7  ;;  %3485 = vmatprep.mubr.bf16.mxu0 %v5571_v26 }
 0x1f4   : > { %v1242_v42 = vrot.slane %v1240_v28, 7  ;;  %v8266_v52 = vrot.slane %v1231_v13, 4  ;;  %v8268_v39 = vrot.slane %v1234_v44, 5  ;;  %v8270_v35 = vrot.slane %v1240_v28, 4  ;;  %6297 = vmatpush3.bf16.msra.mxu1 %v6797_v60  ;;  %v1347_v60 = vld [vmem:[#allocation2 + $0xcc] sm:$0x1] }
 0x1f5   : > { %6539 = vmatmul.mubr.bf16.gmra.mxu1 %v5584_v37  ;;  %v1236_v36 = vor.u32 %v1234_v44, %v1233_v47  ;;  %v1238_v55 = vrot.slane %v1233_v47, 4  ;;  %v5572_v31 = vcombine.low %v8241_v12, %v8243_v45  ;;  %v1482_v6 = vor.u32 %v8178_v1, %v8176_v14  ;;  %6298 = vmatprep.subr.bf16.mxu1 %v6800_v20  ;;  %v968_v20 = vld [vmem:[#allocation2 + $0xc0] sm:$0x8] }
 0x1f6   : > { %6542 = vmatprep.mubr.bf16.mxu1 %v5585_v51  ;;  %v1245_v50 = vor.u32 %v1243_v30, %v1242_v42  ;;  %v1484_v53 = vrot.slane %v1199_v34, 5  ;;  %v1490_v33 = vshll.u32 %v1344_v8, 16  ;;  %v1496_v61 = vor.u32 %v8224_v32, %v8222_v29  ;;  %v8293_v29 = vld [vmem:[#allocation2 + $0xc8] sm:$0xf] }
 0x1f7   : > { %v1483_v58 = vrot.slane %v1482_v6, 4  ;;  %v1498_v14 = vrot.slane %v1221_v5, 5  ;;  %v1504_v1 = vshll.u32 %v1345_v4, 16  ;;  %v1226_v41 = vshrl.u32 %v965_v24, 16  ;;  %v8316_v4 = vld [vmem:[#allocation2 + $0xd4] sm:$0xf] }
 0x1f8   : > { %v1487_v40 = vor.u32 %v8180_v15, %v1484_v53  ;;  %v1492_v46 = vrot.slane %v1490_v33, 5  ;;  %v1497_v34 = vrot.slane %v1496_v61, 4  ;;  %v1246_v10 = vsel %vm7317_vm6, %v1238_v55, %v1245_v50  ;;  %6299 = vmatpush3.bf16.msra.mxu1 %v6801_v0  ;;  %v8321_v55 = vld [vmem:[#allocation2 + $0xd8] sm:$0xf] }
 0x1f9   : > { %v1485_v11 = vsel %vm7354_vm7, %v1483_v58, %v1484_v53  ;;  %v1501_v25 = vor.u32 %v8226_v38, %v1498_v14  ;;  %v1506_v5 = vrot.slane %v1504_v1, 5  ;;  %v5540_v32 = vrot.slane %v1226_v41, 11 }
 0x1fa   : > { %v1488_v26 = vrot.slane %v1487_v40, 4  ;;  %v1499_v18 = vsel %vm7354_vm7, %v1497_v34, %v1498_v14  ;;  %v1253_v15 = vshrl.u32 %v8288_v49, 16  ;;  %v1256_v17 = vshll.u32 %v8288_v49, 16  ;;  %3486 = vmatmul.mubr.bf16.gmra.mxu0 %v5555_v21 }
 0x1fb   : > { %v1502_v22 = vrot.slane %v1501_v25, 4  ;;  %v1237_v59 = vsel %vm7317_vm6, %v5540_v32, %v1236_v36  ;;  %v1262_v57 = vshrl.u32 %v8293_v29, 16  ;;  %v1265_v12 = vshll.u32 %v8293_v29, 16  ;;  %3493 = vmatprep.mubr.bf16.mxu0 %v5572_v31 }
 0x1fc   : > { %v1493_v38 = vsel %vm7354_vm7, %v1488_v26, %v1492_v46  ;;  %v5556_v56 = vcombine.low %v1237_v59, %v1246_v10  ;;  %v1255_v23 = vrot.slane %v1253_v15, 7  ;;  %v1522_v62 = vrot.slane %v1253_v15, 4  ;;  %v1349_v15 = vld [vmem:[#allocation2 + $0xec] sm:$0x1] }
 0x1fd   : > { %v5586_v54 = vcombine.low %v1485_v11, %v1493_v38  ;;  %v1507_v19 = vsel %vm7354_vm7, %v1502_v22, %v1506_v5  ;;  %v1264_v7 = vrot.slane %v1262_v57, 7  ;;  %v1523_v63 = vrot.slane %v1256_v17, 5  ;;  %v8337_v11 = vld [vmem:[#allocation2 + $0xe4] sm:$0xf] }
 0x1fe   : > { %v5587_v2 = vcombine.low %v1499_v18, %v1507_v19  ;;  %v1258_v13 = vor.u32 %v1256_v17, %v1255_v23  ;;  %v1260_v44 = vrot.slane %v1255_v23, 4  ;;  %v1528_v28 = vrot.slane %v1262_v57, 4  ;;  %v8341_v18 = vld [vmem:[#allocation2 + $0xe8] sm:$0xf] }
 0x1ff   : > { %6543 = vmatmul.mubr.bf16.gmra.mxu1 %v5586_v54  ;;  %v1267_v16 = vor.u32 %v1265_v12, %v1264_v7  ;;  %v5573_v9 = vcombine.low %v8288_v49, %v8293_v29  ;;  %v1510_v48 = vor.u32 %v8268_v39, %v8266_v52  ;;  %v1512_v8 = vrot.slane %v1243_v30, 5  ;;  %v1348_v29 = vld [vmem:[#allocation2 + $0xdc] sm:$0x1] }
 0x200   : > { %6546 = vmatprep.mubr.bf16.mxu1 %v5587_v2  ;;  %v1518_v37 = vshll.u32 %v1346_v43, 16  ;;  %v1524_v51 = vor.u32 %v1523_v63, %v1522_v62  ;;  %v1526_v21 = vrot.slane %v1265_v12, 5  ;;  %v1532_v47 = vshll.u32 %v1347_v60, 16  ;;  %v971_v60 = vld [vmem:[#allocation2 + $0xd0] sm:$0x8] }
 0x201   : > { %v1511_v24 = vrot.slane %v1510_v48, 4  ;;  %v1515_v42 = vor.u32 %v8270_v35, %v1512_v8  ;;  %v1248_v0 = vshrl.u32 %v968_v20, 16  ;;  %v1268_v36 = vsel %vm7317_vm6, %v1260_v44, %v1267_v16  ;;  %v8357_v20 = vld [vmem:[#allocation2 + $0xf4] sm:$0xf] }
 0x202   : > { %v1520_v52 = vrot.slane %v1518_v37, 5  ;;  %v1525_v39 = vrot.slane %v1524_v51, 4  ;;  %v1529_v45 = vor.u32 %v1528_v28, %v1526_v21  ;;  %v1534_v30 = vrot.slane %v1532_v47, 5  ;;  %3494 = vmatmul.mubr.bf16.gmra.mxu0 %v5556_v56  ;;  %v8343_v17 = vpop.f32.mrf.mxu1 }
 0x203   : > { %v1513_v31 = vsel %vm7354_vm7, %v1511_v24, %v1512_v8  ;;  %v1516_v6 = vrot.slane %v1515_v42, 4  ;;  %v5541_v50 = vrot.slane %v1248_v0, 11  ;;  %v1275_v53 = vshrl.u32 %v8316_v4, 16  ;;  %3501 = vmatprep.mubr.bf16.mxu0 %v5573_v9  ;;  %v8367_v24 = vld [vmem:[#allocation2 + $0xf8] sm:$0xf] }
 0x204   : > { %v1527_v35 = vsel %vm7354_vm7, %v1525_v39, %v1526_v21  ;;  %v1530_v33 = vrot.slane %v1529_v45, 4  ;;  %v1278_v61 = vshll.u32 %v8316_v4, 16  ;;  %v1284_v58 = vshrl.u32 %v8321_v55, 16  ;;  %v8349_v54 = vpop.f32.mrf.mxu1 }
 0x205   : > { %v1521_v14 = vsel %vm7354_vm7, %v1516_v6, %v1520_v52  ;;  %v1259_v1 = vsel %vm7317_vm6, %v5541_v50, %v1258_v13  ;;  %v1277_v41 = vrot.slane %v1275_v53, 7  ;;  %v1287_v49 = vshll.u32 %v8321_v55, 16 }
 0x206   : > { %v5588_v40 = vcombine.low %v1513_v31, %v1521_v14  ;;  %v1535_v46 = vsel %vm7354_vm7, %v1530_v33, %v1534_v30  ;;  %v5557_v34 = vcombine.low %v1259_v1, %v1268_v36  ;;  %v1286_v10 = vrot.slane %v1284_v58, 7  ;;  %v8359_v16 = vpop.f32.mrf.mxu1  ;;  %v8377_v31 = vld [vmem:[#allocation2 + $0x24] sm:$0xf] }
 0x207   : > { %v5589_v25 = vcombine.low %v1527_v35, %v1535_v46  ;;  %v8339_v5 = vor.u32 %v1278_v61, %v1277_v41  ;;  %v1282_v32 = vrot.slane %v1277_v41, 4  ;;  %v1536_v26 = vrot.slane %v1275_v53, 4 }
 0x208   : > { %6547 = vmatmul.mubr.bf16.gmra.mxu1 %v5588_v40  ;;  %v1289_v22 = vor.u32 %v1287_v49, %v1286_v10  ;;  %v1537_v59 = vrot.slane %v1278_v61, 5  ;;  %v1542_v57 = vrot.slane %v1284_v58, 4  ;;  %v5574_v12 = vcombine.low %v8316_v4, %v8321_v55  ;;  %v8379_v6 = vpop.f32.mrf.mxu1  ;;  %v1350_v61 = vld [vmem:[#allocation2 + $0xfc] sm:$0x1] }
 0x209   : > { %6550 = vmatprep.mubr.bf16.mxu1 %v5589_v25  ;;  %v1540_v38 = vrot.slane %v1287_v49, 5  ;;  %v1546_v56 = vshll.u32 %v1348_v29, 16  ;;  %v1297_v23 = vshrl.u32 %v8337_v11, 16  ;;  %v1300_v62 = vshll.u32 %v8337_v11, 16  ;;  %v8392_v49 = vld [vmem:[#allocation2 + $0x28] sm:$0xf] }
 0x20a   : > { %v1538_v19 = vor.u32 %v1537_v59, %v1536_v26  ;;  %v1306_v7 = vshrl.u32 %v8341_v18, 16  ;;  %v1309_v63 = vshll.u32 %v8341_v18, 16  ;;  %v1560_v43 = vshll.u32 %v1349_v15, 16  ;;  %3502 = vmatmul.mubr.bf16.gmra.mxu0 %v5557_v34 }
 0x20b   : > { %v1543_v2 = vor.u32 %v1542_v57, %v1540_v38  ;;  %v1548_v13 = vrot.slane %v1546_v56, 5  ;;  %v1550_v44 = vrot.slane %v1297_v23, 4  ;;  %v1551_v28 = vrot.slane %v1300_v62, 5  ;;  %3509 = vmatprep.mubr.bf16.mxu0 %v5574_v12 }
 0x20c   : > { %v1539_v9 = vrot.slane %v1538_v19, 4  ;;  %v1554_v48 = vrot.slane %v1309_v63, 5  ;;  %v1556_v8 = vrot.slane %v1306_v7, 4  ;;  %v1562_v37 = vrot.slane %v1560_v43, 5  ;;  %v8394_v40 = vpop.f32.mrf.mxu1 }
 0x20d   : > { %v1544_v51 = vrot.slane %v1543_v2, 4  ;;  %v1552_v21 = vor.u32 %v1551_v28, %v1550_v44  ;;  %v1270_v47 = vshrl.u32 %v971_v60, 16  ;;  %v1290_v4 = vsel %vm7317_vm6, %v1282_v32, %v1289_v22  ;;  %v974_v60 = vld [vmem:[#allocation2 + $0xe0] sm:$0x8] }
 0x20e   : > { %v1541_v42 = vsel %vm7354_vm7, %v1539_v9, %v1540_v38  ;;  %v1557_v0 = vor.u32 %v1556_v8, %v1554_v48  ;;  %v5575_v36 = vcombine.low %v8337_v11, %v8341_v18  ;;  %v1319_v55 = vshrl.u32 %v8357_v20, 16  ;;  %v8403_v15 = vpop.f32.mrf.mxu1 }
 0x20f   : > { %v1549_v52 = vsel %vm7354_vm7, %v1544_v51, %v1548_v13  ;;  %v1553_v39 = vrot.slane %v1552_v21, 4  ;;  %v5542_v45 = vrot.slane %v1270_v47, 11  ;;  %v1322_v30 = vshll.u32 %v8357_v20, 16  ;;  %v3696_v47 = vld [vmem:[#allocation2 + $0x20] sm:$0x8] }
 0x210   : > { %v5590_v50 = vcombine.low %v1541_v42, %v1549_v52  ;;  %v1558_v53 = vrot.slane %v1557_v0, 4  ;;  %v1328_v35 = vshrl.u32 %v8367_v24, 16  ;;  %v1331_v33 = vshll.u32 %v8367_v24, 16  ;;  %v8412_v13 = vpop.f32.mrf.mxu1 }
 0x211   : > { %v1555_v58 = vsel %vm7354_vm7, %v1553_v39, %v1554_v48  ;;  %v1281_v14 = vsel %vm7317_vm6, %v5542_v45, %v8339_v5  ;;  %v1564_v1 = vrot.slane %v1319_v55, 4  ;;  %v1565_v41 = vrot.slane %v1322_v30, 5  ;;  %v8410_v2 = vpop.f32.mrf.mxu0  ;;  %v8430_v39 = vld [vmem:[#allocation2 + $0x34] sm:$0xf] }
 0x212   : > { %6551 = vmatmul.mubr.bf16.gmra.mxu1 %v5590_v50  ;;  %v1563_v46 = vsel %vm7354_vm7, %v1558_v53, %v1562_v37  ;;  %v5558_v34 = vcombine.low %v1281_v14, %v1290_v4  ;;  %v1568_v10 = vrot.slane %v1331_v33, 5  ;;  %v1570_v29 = vrot.slane %v1328_v35, 4  ;;  %v8422_v4 = vpop.f32.mrf.mxu1 }
 0x213   : > { %v5591_v25 = vcombine.low %v1555_v58, %v1563_v46  ;;  %v1566_v5 = vor.u32 %v1565_v41, %v1564_v1  ;;  %v1574_v32 = vshll.u32 %v1350_v61, 16  ;;  %v3750_v26 = vshrl.u32 %v8377_v31, 16  ;;  %v8440_v61 = vld [vmem:[#allocation2 + $0x38] sm:$0xf]  ;;  %v8442_v58 = vpop.f32.mrf.mxu0 }
 0x214   : > { %v1571_v22 = vor.u32 %v1570_v29, %v1568_v10  ;;  %v3753_v59 = vshll.u32 %v8377_v31, 16  ;;  %v3759_v57 = vshrl.u32 %v8392_v49, 16  ;;  %v3762_v12 = vshll.u32 %v8392_v49, 16  ;;  %3510 = vmatmul.mubr.bf16.gmra.mxu0 %v5558_v34 }
 0x215   : > { %6554 = vmatprep.mubr.bf16.mxu1 %v5591_v25  ;;  %v1567_v38 = vrot.slane %v1566_v5, 4  ;;  %v1576_v56 = vrot.slane %v1574_v32, 5  ;;  %v3752_v19 = vrot.slane %v3750_v26, 7  ;;  %v8408_v43 = vrot.slane %v3750_v26, 4  ;;  %3517 = vmatprep.mubr.bf16.mxu0 %v5575_v36  ;;  %v4097_v25 = vld [vmem:[#allocation2 + $0x3c] sm:$0x1] }
 0x216   : > { %v1572_v44 = vrot.slane %v1571_v22, 4  ;;  %v3761_v28 = vrot.slane %v3759_v57, 7  ;;  %v8414_v9 = vrot.slane %v3753_v59, 5  ;;  %v8416_v48 = vrot.slane %v3759_v57, 4  ;;  %v8446_v46 = vpop.f32.mrf.mxu1  ;;  %v977_v26 = vld [vmem:[#allocation2 + $0xf0] sm:$0x8]  ;;  %v8462_v22 = vpop.f32.mrf.mxu0 }
 0x217   : > { %v1569_v8 = vsel %vm7354_vm7, %v1567_v38, %v1568_v10  ;;  %v3755_v37 = vor.u32 %v3753_v59, %v3752_v19  ;;  %v3757_v51 = vrot.slane %v3752_v19, 4  ;;  %v5737_v21 = vcombine.low %v8377_v31, %v8392_v49 }
 0x218   : > { %v1577_v42 = vsel %vm7354_vm7, %v1572_v44, %v1576_v56  ;;  %v3764_v0 = vor.u32 %v3762_v12, %v3761_v28  ;;  %v1292_v52 = vshrl.u32 %v974_v60, 16  ;;  %v1299_v36 = vrot.slane %v1297_v23, 7  ;;  %v8464_v59 = vpop.f32.mrf.mxu1 }
 0x219   : > { %v5592_v45 = vcombine.low %v1569_v8, %v1577_v42  ;;  %v1308_v50 = vrot.slane %v1306_v7, 7  ;;  %v5576_v31 = vcombine.low %v8357_v20, %v8367_v24  ;;  %v8438_v53 = vadd.f32 %v8349_v54, %v8343_v17 }
 0x21a   : > { %v5543_v14 = vrot.slane %v1292_v52, 11  ;;  %v1302_v23 = vor.u32 %v1300_v62, %v1299_v36  ;;  %v1304_v1 = vrot.slane %v1299_v36, 4  ;;  %v3745_v41 = vshrl.u32 %v3696_v47, 16  ;;  %v4096_v36 = vld [vmem:[#allocation2 + $0x2c] sm:$0x1] }
 0x21b   : > { %6555 = vmatmul.mubr.bf16.gmra.mxu1 %v5592_v45  ;;  %v1311_v7 = vor.u32 %v1309_v63, %v1308_v50  ;;  %v3765_v17 = vsel %vm7317_vm6, %v3757_v51, %v3764_v0  ;;  %v3772_v54 = vshrl.u32 %v8430_v39, 16  ;;  %v3775_v34 = vshll.u32 %v8430_v39, 16  ;;  %v8476_v50 = vpop.f32.mrf.mxu0 }
 0x21c   : > { %4784 = vmatprep.mubr.bf16.mxu1 %v5737_v21  ;;  %v1303_v11 = vsel %vm7317_vm6, %v5543_v14, %v1302_v23  ;;  %v5705_v62 = vrot.slane %v3745_v41, 11  ;;  %v3781_v10 = vshrl.u32 %v8440_v61, 16  ;;  %v3784_v29 = vshll.u32 %v8440_v61, 16  ;;  %v8478_v14 = vpop.f32.mrf.mxu1 }
 0x21d   : > { %v1312_v18 = vsel %vm7317_vm6, %v1304_v1, %v1311_v7  ;;  %v8460_v63 = vrot.slane %v3772_v54, 7  ;;  %v4126_v5 = vrot.slane %v3772_v54, 4  ;;  %v4127_v32 = vrot.slane %v3775_v34, 5  ;;  %v3704_v54 = vld [vmem:[#allocation2 + $0x48] sm:$0xf] }
 0x21e   : > { %v5559_v57 = vcombine.low %v1303_v11, %v1312_v18  ;;  %v3756_v38 = vsel %vm7317_vm6, %v5705_v62, %v3755_v37  ;;  %v3783_v56 = vrot.slane %v3781_v10, 7  ;;  %v4130_v19 = vrot.slane %v3784_v29, 5  ;;  %v8501_v62 = vpop.f32.mrf.mxu1 }
 0x21f   : > { %v5721_v60 = vcombine.low %v3756_v38, %v3765_v17  ;;  %v4128_v44 = vor.u32 %v4127_v32, %v4126_v5  ;;  %v4132_v28 = vrot.slane %v3781_v10, 4  ;;  %v4136_v8 = vshll.u32 %v4097_v25, 16 }
 0x220   : > { %3518 = vmatmul.mubr.bf16.gmra.mxu0 %v5559_v57  ;;  %v5738_v51 = vcombine.low %v8430_v39, %v8440_v61  ;;  %v1314_v21 = vshrl.u32 %v977_v26, 16  ;;  %v1321_v47 = vrot.slane %v1319_v55, 7  ;;  %v1330_v42 = vrot.slane %v1328_v35, 7  ;;  %v8499_v11 = vpop.f32.mrf.mxu0 }
 0x221   : > { %3525 = vmatprep.mubr.bf16.mxu0 %v5576_v31  ;;  %v4129_v0 = vrot.slane %v4128_v44, 4  ;;  %v4133_v37 = vor.u32 %v4132_v28, %v4130_v19  ;;  %v4138_v52 = vrot.slane %v4136_v8, 5  ;;  %v4114_v45 = vor.u32 %v8414_v9, %v8408_v43  ;;  %v3699_v9 = vld [vmem:[#allocation2 + $0x30] sm:$0x8] }
 0x222   : > { %v5544_v39 = vrot.slane %v1314_v21, 11  ;;  %v1324_v61 = vor.u32 %v1322_v30, %v1321_v47  ;;  %v1326_v55 = vrot.slane %v1321_v47, 4  ;;  %v1333_v35 = vor.u32 %v1331_v33, %v1330_v42  ;;  %v3703_v33 = vld [vmem:[#allocation2 + $0x44] sm:$0xf]  ;;  %v8505_v57 = vpop.f32.mrf.mxu0  ;;  %v3702_v42 = vld [vmem:[#allocation2 + $0x40] sm:$0x8] }
 0x223   : > { %4785 = vmatmul.mubr.bf16.vlgmr.msra.gmra.mxu1 %v5721_v60  ;;  %v4131_v31 = vsel %vm7354_vm7, %v4129_v0, %v4130_v19  ;;  %v4134_v23 = vrot.slane %v4133_v37, 4  ;;  %v4115_v1 = vrot.slane %v4114_v45, 4  ;;  %v4116_v43 = vrot.slane %v3762_v12, 5 }
 0x224   : > { %4792 = vmatprep.mubr.bf16.mxu1 %v5738_v51  ;;  %v1325_v41 = vsel %vm7317_vm6, %v5544_v39, %v1324_v61  ;;  %v1334_v20 = vsel %vm7317_vm6, %v1326_v55, %v1333_v35  ;;  %v4122_v30 = vshll.u32 %v4096_v36, 16  ;;  %v6033_v24 = vadd.f32 %v8379_v6, %v8359_v16  ;;  %v4098_v51 = vld [vmem:[#allocation2 + $0x4c] sm:$0x1]  ;;  %v8517_v45 = vpop.f32.mrf.mxu0 }
 0x225   : > { %v4139_v7 = vsel %vm7354_vm7, %v4134_v23, %v4138_v52  ;;  %v5560_v17 = vcombine.low %v1325_v41, %v1334_v20  ;;  %v4117_v49 = vsel %vm7354_vm7, %v4115_v1, %v4116_v43  ;;  %v4119_v12 = vor.u32 %v8416_v48, %v4116_v43  ;;  %v8511_v21 = vpop.f32.mrf.mxu1  ;;  %v8533_v43 = vld [vmem:[#allocation2 + $0x54] sm:$0xf] }
 0x226   : > { %v5754_v10 = vcombine.low %v4131_v31, %v4139_v7  ;;  %v4124_v25 = vrot.slane %v4122_v30, 5  ;;  %v3767_v18 = vshrl.u32 %v3699_v9, 16  ;;  %v3777_v16 = vor.u32 %v3775_v34, %v8460_v63  ;;  %v8537_v30 = vld [vmem:[#allocation2 + $0x58] sm:$0xf] }
 0x227   : > { %v4120_v6 = vrot.slane %v4119_v12, 4  ;;  %v3779_v5 = vrot.slane %v8460_v63, 4  ;;  %v3786_v32 = vor.u32 %v3784_v29, %v3783_v56  ;;  %v3794_v26 = vshrl.u32 %v3703_v33, 16  ;;  %v8519_v39 = vpop.f32.mrf.mxu1 }
 0x228   : > { %3526 = vmatmul.mubr.bf16.gmra.mxu0 %v5560_v17  ;;  %v5706_v38 = vrot.slane %v3767_v18, 11  ;;  %v3797_v48 = vshll.u32 %v3703_v33, 16  ;;  %v3803_v19 = vshrl.u32 %v3704_v54, 16  ;;  %v3806_v60 = vshll.u32 %v3704_v54, 16 }
 0x229   : > { %v4125_v44 = vsel %vm7354_vm7, %v4120_v6, %v4124_v25  ;;  %v3787_v28 = vsel %vm7317_vm6, %v3779_v5, %v3786_v32  ;;  %v3796_v8 = vrot.slane %v3794_v26, 7  ;;  %v4140_v34 = vrot.slane %v3794_v26, 4  ;;  %v8535_v9 = vpop.f32.mrf.mxu1  ;;  %v8560_v26 = vld [vmem:[#allocation2 + $0x64] sm:$0xf] }
 0x22a   : > { %v5753_v29 = vcombine.low %v4117_v49, %v4125_v44  ;;  %v3778_v63 = vsel %vm7317_vm6, %v5706_v38, %v3777_v16  ;;  %v3805_v56 = vrot.slane %v3803_v19, 7  ;;  %v4141_v47 = vrot.slane %v3797_v48, 5  ;;  %v4099_v16 = vld [vmem:[#allocation2 + $0x5c] sm:$0x1]  ;;  %v8562_v38 = vld [vmem:[#allocation2 + $0x68] sm:$0xf] }
 0x22b   : > { %v5722_v0 = vcombine.low %v3778_v63, %v3787_v28  ;;  %v4146_v37 = vrot.slane %v3803_v19, 4  ;;  %v5739_v52 = vcombine.low %v3703_v33, %v3704_v54  ;;  %v6036_v36 = vadd.f32 %v8403_v15, %v8394_v40 }
 0x22c   : > { %6574 = vmatprep.mubr.bf16.mxu0 %v5753_v29  ;;  %v4142_v61 = vor.u32 %v4141_v47, %v4140_v34  ;;  %v4144_v55 = vrot.slane %v3806_v60, 5  ;;  %v4150_v35 = vshll.u32 %v4098_v51, 16  ;;  %v8523_v31 = vadd.f32 %v8438_v53, %v8442_v58 }
 0x22d   : > { %4793 = vmatmul.mubr.bf16.gmra.mxu1 %v5722_v0  ;;  %v8526_v23 = vadd.f32 %v8410_v2, %v6036_v36  ;;  %v6039_v1 = vadd.f32 %v8422_v4, %v8412_v13  ;;  %v8531_v40 = vadd.f32 %v6033_v24, %v8476_v50  ;;  %v3789_v15 = vshrl.u32 %v3702_v42, 16  ;;  %v8542_v50 = vpop.f32.mrf.mxu0  ;;  %v8544_v24 = vpop.f32.mrf.mxu1 }
 0x22e   : > { %9620 = vst [vmem:[#allocation17_spill] sm:$0xff] %v8523_v31  ;;  %4800 = vmatprep.mubr.bf16.mxu1 %v5739_v52  ;;  %v4143_v41 = vrot.slane %v4142_v61, 4  ;;  %v4147_v20 = vor.u32 %v4146_v37, %v4144_v55  ;;  %v4152_v53 = vrot.slane %v4150_v35, 5  ;;  %v3799_v58 = vor.u32 %v3797_v48, %v3796_v8 }
 0x22f   : > { %9621 = vst [vmem:[#allocation16_spill] sm:$0xff] %v8526_v23  ;;  %9622 = vst [vmem:[#allocation13_spill] sm:$0xff] %v8531_v40  ;;  %v8540_v2 = vadd.f32 %v8462_v22, %v6039_v1  ;;  %v5707_v33 = vrot.slane %v3789_v15, 11  ;;  %v3801_v13 = vrot.slane %v3796_v8, 4  ;;  %v3808_v4 = vor.u32 %v3806_v60, %v3805_v56  ;;  %v4100_v8 = vld [vmem:[#allocation2 + $0x6c] sm:$0x1]  ;;  %v8566_v34 = vpop.f32.mrf.mxu0 }
 0x230   : > { %6575 = vmatmul.mubr.bf16.vlgmr.msra.gmra.mxu0 %v5754_v10  ;;  %v4145_v7 = vsel %vm7354_vm7, %v4143_v41, %v4144_v55  ;;  %v4148_v17 = vrot.slane %v4147_v20, 4  ;;  %v3816_v49 = vshrl.u32 %v8533_v43, 16  ;;  %v3819_v12 = vshll.u32 %v8533_v43, 16  ;;  %v8564_v48 = vpop.f32.mrf.mxu1 }
 0x231   : > { %9623 = vst [vmem:[#allocation14_spill] sm:$0xff] %v8540_v2  ;;  %v3800_v22 = vsel %vm7317_vm6, %v5707_v33, %v3799_v58  ;;  %v3809_v54 = vsel %vm7317_vm6, %v3801_v13, %v3808_v4  ;;  %v3825_v25 = vshrl.u32 %v8537_v30, 16  ;;  %v3828_v18 = vshll.u32 %v8537_v30, 16  ;;  %v8577_v36 = vpop.f32.mrf.mxu0 }
 0x232   : > { %v4153_v10 = vsel %vm7354_vm7, %v4148_v17, %v4152_v53  ;;  %v5723_v6 = vcombine.low %v3800_v22, %v3809_v54  ;;  %v8558_v5 = vrot.slane %v3816_v49, 7  ;;  %v4154_v32 = vrot.slane %v3816_v49, 4  ;;  %v8572_v47 = vpop.f32.mrf.mxu1 }
 0x233   : > { %v5755_v19 = vcombine.low %v4145_v7, %v4153_v10  ;;  %v3827_v60 = vrot.slane %v3825_v25, 7  ;;  %v4155_v44 = vrot.slane %v3819_v12, 5  ;;  %v4158_v28 = vrot.slane %v3828_v18, 5  ;;  %v8588_v53 = vpop.f32.mrf.mxu0 }
 0x234   : > { %v4160_v51 = vrot.slane %v3825_v25, 4  ;;  %v5740_v29 = vcombine.low %v8533_v43, %v8537_v30  ;;  %v6042_v63 = vadd.f32 %v8464_v59, %v8446_v46  ;;  %v4164_v56 = vshll.u32 %v4099_v16, 16  ;;  %v3705_v59 = vld [vmem:[#allocation2 + $0x50] sm:$0x8]  ;;  %v8580_v1 = vpop.f32.mrf.mxu1 }
 0x235   : > { %6578 = vmatprep.mubr.bf16.mxu0 %v5755_v19  ;;  %4801 = vmatmul.mubr.bf16.gmra.mxu1 %v5723_v6  ;;  %v4156_v42 = vor.u32 %v4155_v44, %v4154_v32  ;;  %v3838_v0 = vshrl.u32 %v8560_v26, 16  ;;  %v3841_v37 = vshll.u32 %v8560_v26, 16  ;;  %v3847_v52 = vshrl.u32 %v8562_v38, 16  ;;  %v8599_v22 = vpop.f32.mrf.mxu0 }
 0x236   : > { %v4161_v61 = vor.u32 %v4160_v51, %v4158_v28  ;;  %4808 = vmatprep.mubr.bf16.mxu1 %v5740_v29  ;;  %v4166_v55 = vrot.slane %v4164_v56, 5  ;;  %v3850_v35 = vshll.u32 %v8562_v38, 16  ;;  %v4178_v46 = vshll.u32 %v4100_v8, 16  ;;  %v8607_v6 = vpop.f32.mrf.mxu1  ;;  %v4101_v56 = vld [vmem:[#allocation2 + $0x7c] sm:$0x1] }
 0x237   : > { %v4157_v15 = vrot.slane %v4156_v42, 4  ;;  %v4168_v43 = vrot.slane %v3838_v0, 4  ;;  %v4169_v41 = vrot.slane %v3841_v37, 5  ;;  %v4174_v20 = vrot.slane %v3847_v52, 4  ;;  %v8624_v42 = vld [vmem:[#allocation2 + $0x84] sm:$0xf] }
 0x238   : > { %v4162_v58 = vrot.slane %v4161_v61, 4  ;;  %v4172_v30 = vrot.slane %v3850_v35, 5  ;;  %v4180_v33 = vrot.slane %v4178_v46, 5  ;;  %v8593_v13 = vadd.f32 %v6042_v63, %v8505_v57  ;;  %v8605_v57 = vld [vmem:[#allocation2 + $0x74] sm:$0xf] }
 0x239   : > { %v4159_v4 = vsel %vm7354_vm7, %v4157_v15, %v4158_v28  ;;  %v4170_v7 = vor.u32 %v4169_v41, %v4168_v43  ;;  %v6045_v17 = vadd.f32 %v8501_v62, %v8478_v14  ;;  %v3811_v49 = vshrl.u32 %v3705_v59, 16  ;;  %v8612_v62 = vld [vmem:[#allocation2 + $0x78] sm:$0xf] }
 0x23a   : > { %9624 = vst [vmem:[#allocation15_spill] sm:$0xff] %v8593_v13  ;;  %v4167_v54 = vsel %vm7354_vm7, %v4162_v58, %v4166_v55  ;;  %v4175_v25 = vor.u32 %v4174_v20, %v4172_v30  ;;  %v3821_v16 = vor.u32 %v3819_v12, %v8558_v5  ;;  %v3823_v10 = vrot.slane %v8558_v5, 4  ;;  %v8636_v55 = vld [vmem:[#allocation2 + $0x88] sm:$0xf]  ;;  %v8638_v46 = vpop.f32.mrf.mxu1  ;;  %v4102_v20 = vld [vmem:[#allocation2 + $0x8c] sm:$0x1] }
 0x23b   : > { %v5756_v32 = vcombine.low %v4159_v4, %v4167_v54  ;;  %v4171_v19 = vrot.slane %v4170_v7, 4  ;;  %v8610_v44 = vadd.f32 %v6045_v17, %v8542_v50  ;;  %v5708_v14 = vrot.slane %v3811_v49, 11 }
 0x23c   : > { %v4176_v28 = vrot.slane %v4175_v25, 4  ;;  %v3830_v8 = vor.u32 %v3828_v18, %v3827_v60  ;;  %v5741_v51 = vcombine.low %v8560_v26, %v8562_v38  ;;  %v6048_v12 = vadd.f32 %v8519_v39, %v8511_v21  ;;  %v8626_v18 = vpop.f32.mrf.mxu0  ;;  %v8650_v7 = vpop.f32.mrf.mxu1 }
 0x23d   : > { %9625 = vst [vmem:[#allocation18_spill] sm:$0xff] %v8610_v44  ;;  %6579 = vmatmul.mubr.bf16.gmra.mxu0 %v5756_v32  ;;  %v4173_v5 = vsel %vm7354_vm7, %v4171_v19, %v4172_v30  ;;  %v3822_v29 = vsel %vm7317_vm6, %v5708_v14, %v3821_v16  ;;  %v3860_v50 = vshrl.u32 %v8605_v57, 16  ;;  %v3863_v63 = vshll.u32 %v8605_v57, 16  ;;  %v3708_v16 = vld [vmem:[#allocation2 + $0x60] sm:$0x8] }
 0x23e   : > { %v4181_v60 = vsel %vm7354_vm7, %v4176_v28, %v4180_v33  ;;  %v3831_v21 = vsel %vm7317_vm6, %v3823_v10, %v3830_v8  ;;  %v8633_v39 = vadd.f32 %v8499_v11, %v6048_v12  ;;  %v9539_v61 = vshrl.u32 %v8612_v62, 16  ;;  %v8643_v58 = vpop.f32.mrf.mxu0  ;;  %v8661_v8 = vpop.f32.mrf.mxu1 }
 0x23f   : > { %v5757_v59 = vcombine.low %v4173_v5, %v4181_v60  ;;  %v5724_v15 = vcombine.low %v3822_v29, %v3831_v21  ;;  %v9535_v43 = vshll.u32 %v8612_v62, 16  ;;  %v4182_v41 = vrot.slane %v3860_v50, 4 }
 0x240   : > { %9626 = vst [vmem:[#allocation19_spill] sm:$0xff] %v8633_v39  ;;  %v4183_v11 = vrot.slane %v3863_v63, 5  ;;  %v4188_v30 = vrot.slane %v9539_v61, 4  ;;  %v4192_v33 = vshll.u32 %v4101_v56, 16  ;;  %v9533_v4 = vshrl.u32 %v8624_v42, 16  ;;  %v8657_v10 = vpop.f32.mrf.mxu0 }
 0x241   : > { %6582 = vmatprep.mubr.bf16.mxu0 %v5757_v59  ;;  %4809 = vmatmul.mubr.bf16.gmra.mxu1 %v5724_v15  ;;  %v4186_v17 = vrot.slane %v9535_v43, 5  ;;  %v9529_v49 = vshll.u32 %v8624_v42, 16  ;;  %v9532_v54 = vshrl.u32 %v8636_v55, 16  ;;  %v9526_v25 = vshll.u32 %v8636_v55, 16  ;;  %v8764_v61 = vld [vmem:[#allocation2 + $0xb4] sm:$0xf] }
 0x242   : > { %4816 = vmatprep.mubr.bf16.mxu1 %v5741_v51  ;;  %v4184_v32 = vor.u32 %v4183_v11, %v4182_v41  ;;  %v4194_v19 = vrot.slane %v4192_v33, 5  ;;  %v4196_v14 = vrot.slane %v9533_v4, 4  ;;  %v4206_v28 = vshll.u32 %v4102_v20, 16  ;;  %v8671_v15 = vpop.f32.mrf.mxu0  ;;  %v8673_v41 = vpop.f32.mrf.mxu1 }
 0x243   : > { %v4189_v12 = vor.u32 %v4188_v30, %v4186_v17  ;;  %v4197_v5 = vrot.slane %v9529_v49, 5  ;;  %v4200_v29 = vrot.slane %v9526_v25, 5  ;;  %v4202_v56 = vrot.slane %v9532_v54, 4  ;;  %9627 = vst [vmem:[#allocation20_spill] sm:$0xff] %v8671_v15 }
 0x244   : > { %v4185_v60 = vrot.slane %v4184_v32, 4  ;;  %v4208_v51 = vrot.slane %v4206_v28, 5  ;;  %v6051_v21 = vadd.f32 %v8544_v24, %v8535_v9  ;;  %v3833_v59 = vshrl.u32 %v3708_v16, 16  ;;  %v8684_v24 = vpop.f32.mrf.mxu1 }
 0x245   : > { %v4190_v20 = vrot.slane %v4189_v12, 4  ;;  %v4198_v11 = vor.u32 %v4197_v5, %v4196_v14  ;;  %v4203_v30 = vor.u32 %v4202_v56, %v4200_v29  ;;  %v3840_v33 = vrot.slane %v3838_v0, 7  ;;  %v8690_v5 = vld [vmem:[#allocation2 + $0x94] sm:$0xf] }
 0x246   : > { %v4187_v25 = vsel %vm7354_vm7, %v4185_v60, %v4186_v17  ;;  %v8680_v32 = vadd.f32 %v8517_v45, %v6051_v21  ;;  %v5709_v28 = vrot.slane %v3833_v59, 11  ;;  %v3849_v9 = vrot.slane %v3847_v52, 7  ;;  %v8696_v60 = vld [vmem:[#allocation2 + $0x98] sm:$0xf]  ;;  %v8698_v21 = vpop.f32.mrf.mxu0  ;;  %v8710_v59 = vld [vmem:[#allocation2 + $0xa4] sm:$0xf] }
 0x247   : > { %v4195_v16 = vsel %vm7354_vm7, %v4190_v20, %v4194_v19  ;;  %v4199_v14 = vrot.slane %v4198_v11, 4  ;;  %v4204_v12 = vrot.slane %v4203_v30, 4  ;;  %v3843_v0 = vor.u32 %v3841_v37, %v3840_v33  ;;  %v8700_v19 = vpop.f32.mrf.mxu1 }
 0x248   : > { %9628 = vst [vmem:[#allocation21_spill] sm:$0xff] %v8680_v32  ;;  %v5758_v17 = vcombine.low %v4187_v25, %v4195_v16  ;;  %v3845_v56 = vrot.slane %v3840_v33, 4  ;;  %v3852_v45 = vor.u32 %v3850_v35, %v3849_v9  ;;  %v5742_v52 = vcombine.low %v8605_v57, %v8612_v62  ;;  %v4103_v35 = vld [vmem:[#allocation2 + $0x9c] sm:$0x1]  ;;  %v8716_v33 = vld [vmem:[#allocation2 + $0xa8] sm:$0xf] }
 0x249   : > { %v4201_v26 = vsel %vm7354_vm7, %v4199_v14, %v4200_v29  ;;  %v4209_v37 = vsel %vm7354_vm7, %v4204_v12, %v4208_v51  ;;  %v3844_v25 = vsel %vm7317_vm6, %v5709_v28, %v3843_v0  ;;  %v6054_v38 = vadd.f32 %v8572_v47, %v8564_v48  ;;  %v8718_v51 = vpop.f32.mrf.mxu0  ;;  %v8720_v28 = vpop.f32.mrf.mxu1 }
 0x24a   : > { %6583 = vmatmul.mubr.bf16.gmra.mxu0 %v5758_v17  ;;  %v5759_v20 = vcombine.low %v4201_v26, %v4209_v37  ;;  %v3853_v11 = vsel %vm7317_vm6, %v3845_v56, %v3852_v45  ;;  %v9528_v30 = vshrl.u32 %v8690_v5, 16  ;;  %v9527_v29 = vshll.u32 %v8690_v5, 16  ;;  %v4104_v56 = vld [vmem:[#allocation2 + $0xac] sm:$0x1] }
 0x24b   : > { %v5725_v9 = vcombine.low %v3844_v25, %v3853_v11  ;;  %v8723_v48 = vadd.f32 %v6054_v38, %v8577_v36  ;;  %v9531_v47 = vshrl.u32 %v8696_v60, 16  ;;  %v9530_v16 = vshll.u32 %v8696_v60, 16  ;;  %v8732_v45 = vpop.f32.mrf.mxu0  ;;  %v8734_v26 = vpop.f32.mrf.mxu1 }
 0x24c   : > { %6586 = vmatprep.mubr.bf16.mxu0 %v5759_v20  ;;  %v4210_v14 = vrot.slane %v9528_v30, 4  ;;  %v4211_v12 = vrot.slane %v9527_v29, 5  ;;  %v4220_v0 = vshll.u32 %v4103_v35, 16  ;;  %v9534_v17 = vshrl.u32 %v8710_v59, 16  ;;  %v3711_v20 = vld [vmem:[#allocation2 + $0x70] sm:$0x8] }
 0x24d   : > { %9629 = vst [vmem:[#allocation22_spill] sm:$0xff] %v8723_v48  ;;  %4817 = vmatmul.mubr.bf16.gmra.mxu1 %v5725_v9  ;;  %v4214_v36 = vrot.slane %v9530_v16, 5  ;;  %v4216_v37 = vrot.slane %v9531_v47, 4  ;;  %v9536_v25 = vshll.u32 %v8710_v59, 16  ;;  %v9537_v38 = vshrl.u32 %v8716_v33, 16  ;;  %v8745_v9 = vpop.f32.mrf.mxu0 }
 0x24e   : > { %4824 = vmatprep.mubr.bf16.mxu1 %v5742_v52  ;;  %v4212_v35 = vor.u32 %v4211_v12, %v4210_v14  ;;  %v4222_v11 = vrot.slane %v4220_v0, 5  ;;  %v9538_v29 = vshll.u32 %v8716_v33, 16  ;;  %v4224_v30 = vrot.slane %v9534_v17, 4  ;;  %v8755_v0 = vpop.f32.mrf.mxu1 }
 0x24f   : > { %v4217_v49 = vor.u32 %v4216_v37, %v4214_v36  ;;  %v4225_v16 = vrot.slane %v9536_v25, 5  ;;  %v4230_v47 = vrot.slane %v9537_v38, 4  ;;  %v4234_v54 = vshll.u32 %v4104_v56, 16 }
 0x250   : > { %v4213_v4 = vrot.slane %v4212_v35, 4  ;;  %v4228_v52 = vrot.slane %v9538_v29, 5  ;;  %v6057_v14 = vadd.f32 %v8607_v6, %v8580_v1  ;;  %v3855_v12 = vshrl.u32 %v3711_v20, 16  ;;  %v8766_v1 = vpop.f32.mrf.mxu0  ;;  %v8768_v6 = vpop.f32.mrf.mxu1 }
 0x251   : > { %v4218_v17 = vrot.slane %v4217_v49, 4  ;;  %v4226_v43 = vor.u32 %v4225_v16, %v4224_v30  ;;  %v4236_v37 = vrot.slane %v4234_v54, 5  ;;  %v3862_v25 = vrot.slane %v3860_v50, 7 }
 0x252   : > { %v4215_v38 = vsel %vm7354_vm7, %v4213_v4, %v4214_v36  ;;  %v4231_v56 = vor.u32 %v4230_v47, %v4228_v52  ;;  %v8762_v35 = vadd.f32 %v6057_v14, %v8599_v22  ;;  %v5710_v29 = vrot.slane %v3855_v12, 11  ;;  %v8774_v4 = vld [vmem:[#allocation2 + $0xb8] sm:$0xf]  ;;  %v8780_v14 = vpop.f32.mrf.mxu0  ;;  %v8782_v12 = vpop.f32.mrf.mxu1 }
 0x253   : > { %v4223_v49 = vsel %vm7354_vm7, %v4218_v17, %v4222_v11  ;;  %v4227_v54 = vrot.slane %v4226_v43, 4  ;;  %v3865_v50 = vor.u32 %v3863_v63, %v3862_v25  ;;  %v3867_v30 = vrot.slane %v3862_v25, 4  ;;  %v4105_v25 = vld [vmem:[#allocation2 + $0xbc] sm:$0x1] }
 0x254   : > { %9630 = vst [vmem:[#allocation23_spill] sm:$0xff] %v8762_v35  ;;  %v5760_v47 = vcombine.low %v4215_v38, %v4223_v49  ;;  %v4232_v22 = vrot.slane %v4231_v56, 4  ;;  %v9631_v16 = vshrl.u32 %v8612_v62, 16  ;;  %v5743_v20 = vcombine.low %v8624_v42, %v8636_v55 }
 0x255   : > { %v4229_v43 = vsel %vm7354_vm7, %v4227_v54, %v4228_v52  ;;  %v3866_v57 = vsel %vm7317_vm6, %v5710_v29, %v3865_v50  ;;  %v6060_v63 = vadd.f32 %v8650_v7, %v8638_v46  ;;  %v9540_v17 = vshrl.u32 %v8764_v61, 16  ;;  %v8797_v54 = vld [vmem:[#allocation2 + $0xc4] sm:$0xf]  ;;  %v8799_v29 = vpop.f32.mrf.mxu0  ;;  %v8801_v50 = vpop.f32.mrf.mxu1 }
 0x256   : > { %v3871_v36 = vrot.slane %v9631_v16, 7  ;;  %6587 = vmatmul.mubr.bf16.gmra.mxu0 %v5760_v47  ;;  %v4237_v38 = vsel %vm7354_vm7, %v4232_v22, %v4236_v37  ;;  %v9632_v11 = vshll.u32 %v8612_v62, 16  ;;  %v9541_v49 = vshll.u32 %v8764_v61, 16  ;;  %v8809_v37 = vld [vmem:[#allocation2 + $0xc8] sm:$0xf] }
 0x257   : > { %v9542_v52 = vshrl.u32 %v8774_v4, 16  ;;  %v5761_v46 = vcombine.low %v4229_v43, %v4237_v38  ;;  %v8804_v7 = vadd.f32 %v8566_v34, %v6060_v63  ;;  %v9543_v47 = vshll.u32 %v8774_v4, 16  ;;  %v4106_v38 = vld [vmem:[#allocation2 + $0xcc] sm:$0x1]  ;;  %v8817_v34 = vpop.f32.mrf.mxu0 }
 0x258   : > { %v3874_v56 = vor.u32 %v9632_v11, %v3871_v36  ;;  %v4238_v62 = vrot.slane %v9540_v17, 4  ;;  %v4239_v16 = vrot.slane %v9541_v49, 5  ;;  %v4248_v43 = vshll.u32 %v4105_v25, 16  ;;  %v8825_v25 = vpop.f32.mrf.mxu1 }
 0x259   : > { %9633 = vst [vmem:[#allocation24_spill] sm:$0xff] %v8804_v7  ;;  %v4244_v36 = vrot.slane %v9542_v52, 4  ;;  %6590 = vmatprep.mubr.bf16.mxu0 %v5761_v46  ;;  %v4242_v11 = vrot.slane %v9543_v47, 5  ;;  %v9544_v17 = vshrl.u32 %v8797_v54, 16  ;;  %v9545_v15 = vshll.u32 %v8797_v54, 16 }
 0x25a   : > { %v3875_v22 = vsel %vm7317_vm6, %v3867_v30, %v3874_v56  ;;  %v4240_v30 = vor.u32 %v4239_v16, %v4238_v62  ;;  %v4250_v56 = vrot.slane %v4248_v43, 5  ;;  %v9547_v49 = vshrl.u32 %v8809_v37, 16  ;;  %v3714_v52 = vld [vmem:[#allocation2 + $0x80] sm:$0x8] }
 0x25b   : > { %v5726_v63 = vcombine.low %v3866_v57, %v3875_v22  ;;  %v9546_v35 = vshll.u32 %v8809_v37, 16  ;;  %v4245_v48 = vor.u32 %v4244_v36, %v4242_v11  ;;  %v4252_v57 = vrot.slane %v9544_v17, 4  ;;  %v8839_v36 = vpop.f32.mrf.mxu1 }
 0x25c   : > { %v4253_v46 = vrot.slane %v9545_v15, 5  ;;  %v4262_v22 = vshll.u32 %v4106_v38, 16  ;;  %v4241_v47 = vrot.slane %v4240_v30, 4  ;;  %v4258_v16 = vrot.slane %v9547_v49, 4 }
 0x25d   : > { %4825 = vmatmul.mubr.bf16.gmra.mxu1 %v5726_v63  ;;  %v4256_v62 = vrot.slane %v9546_v35, 5  ;;  %v6063_v43 = vadd.f32 %v8673_v41, %v8661_v8  ;;  %v8837_v63 = vpop.f32.mrf.mxu0  ;;  %v4246_v17 = vrot.slane %v4245_v48, 4  ;;  %v3877_v15 = vshrl.u32 %v3714_v52, 16  ;;  %v8850_v8 = vpop.f32.mrf.mxu1 }
 0x25e   : > { %4832 = vmatprep.mubr.bf16.mxu1 %v5743_v20  ;;  %9634 = vst [vmem:[#allocation25_spill] sm:$0xff] %v8837_v63  ;;  %v4254_v7 = vor.u32 %v4253_v46, %v4252_v57  ;;  %v4264_v44 = vrot.slane %v4262_v22, 5  ;;  %v4243_v20 = vsel %vm7354_vm7, %v4241_v47, %v4242_v11  ;;  %v9636_v35 = vshrl.u32 %v8624_v42, 16  ;;  %v8856_v47 = vld [vmem:[#allocation2 + $0xd4] sm:$0xf] }
 0x25f   : > { %v4259_v38 = vor.u32 %v4258_v16, %v4256_v62  ;;  %v8844_v30 = vadd.f32 %v8588_v53, %v6063_v43  ;;  %v8848_v32 = vpop.f32.mrf.mxu0  ;;  %v4251_v41 = vsel %vm7354_vm7, %v4246_v17, %v4250_v56  ;;  %v5711_v57 = vrot.slane %v3877_v15, 11  ;;  %v8860_v43 = vld [vmem:[#allocation2 + $0xd8] sm:$0xf]  ;;  %v8864_v13 = vpop.f32.mrf.mxu1 }
 0x260   : > { %v3884_v49 = vrot.slane %v9636_v35, 7  ;;  %v4255_v48 = vrot.slane %v4254_v7, 4  ;;  %v9637_v52 = vshrl.u32 %v8636_v55, 16  ;;  %v5762_v11 = vcombine.low %v4243_v20, %v4251_v41  ;;  %v4107_v41 = vld [vmem:[#allocation2 + $0xdc] sm:$0x1] }
 0x261   : > { %9635 = vst [vmem:[#allocation26_spill] sm:$0xff] %v8844_v30  ;;  %v4260_v53 = vrot.slane %v4259_v38, 4  ;;  %v9638_v22 = vshll.u32 %v8624_v42, 16  ;;  %v8862_v30 = vpop.f32.mrf.mxu0  ;;  %v9640_v17 = vshll.u32 %v8636_v55, 16  ;;  %v5744_v56 = vcombine.low %v8690_v5, %v8696_v60  ;;  %v8880_v55 = vld [vmem:[#allocation2 + $0xe4] sm:$0xf] }
 0x262   : > { %v3893_v46 = vrot.slane %v9637_v52, 7  ;;  %v3889_v35 = vrot.slane %v3884_v49, 4  ;;  %9639 = vst [vmem:[#allocation27_spill] sm:$0xff] %v8862_v30  ;;  %v4257_v15 = vsel %vm7354_vm7, %v4255_v48, %v4256_v62  ;;  %v6066_v42 = vadd.f32 %v8700_v19, %v8684_v24  ;;  %6591 = vmatmul.mubr.bf16.gmra.mxu0 %v5762_v11 }
 0x263   : > { %v3887_v16 = vor.u32 %v9638_v22, %v3884_v49  ;;  %v4265_v49 = vsel %vm7354_vm7, %v4260_v53, %v4264_v44  ;;  %v9549_v38 = vshrl.u32 %v8856_v47, 16  ;;  %v9548_v62 = vshll.u32 %v8856_v47, 16  ;;  %v8882_v48 = vpop.f32.mrf.mxu0 }
 0x264   : > { %v3896_v7 = vor.u32 %v9640_v17, %v3893_v46  ;;  %9641 = vst [vmem:[#allocation28_spill] sm:$0xff] %v8882_v48  ;;  %v5763_v52 = vcombine.low %v4257_v15, %v4265_v49  ;;  %v8887_v19 = vadd.f32 %v6066_v42, %v8643_v58  ;;  %v9550_v44 = vshrl.u32 %v8860_v43, 16  ;;  %v8890_v46 = vld [vmem:[#allocation2 + $0xe8] sm:$0xf]  ;;  %v4108_v15 = vld [vmem:[#allocation2 + $0xec] sm:$0x1] }
 0x265   : > { %v3888_v20 = vsel %vm7317_vm6, %v5711_v57, %v3887_v16  ;;  %9643 = vst [vmem:[#allocation30_spill] sm:$0xff] %v8890_v46  ;;  %v8892_v57 = vpop.f32.mrf.mxu1  ;;  %v9551_v53 = vshll.u32 %v8860_v43, 16  ;;  %v4266_v22 = vrot.slane %v9549_v38, 4  ;;  %v4267_v16 = vrot.slane %v9548_v62, 5  ;;  %v8909_v38 = vpop.f32.mrf.mxu0 }
 0x266   : > { %v3897_v24 = vsel %vm7317_vm6, %v3889_v35, %v3896_v7  ;;  %9642 = vst [vmem:[#allocation29_spill] sm:$0xff] %v8887_v19  ;;  %6594 = vmatprep.mubr.bf16.mxu0 %v5763_v52  ;;  %v4272_v58 = vrot.slane %v9550_v44, 4  ;;  %v4276_v35 = vshll.u32 %v4107_v41, 16  ;;  %v9552_v17 = vshrl.u32 %v8880_v55, 16  ;;  %v3717_v52 = vld [vmem:[#allocation2 + $0x90] sm:$0x8] }
 0x267   : > { %v5727_v11 = vcombine.low %v3888_v20, %v3897_v24  ;;  %v9553_v7 = vshll.u32 %v8880_v55, 16  ;;  %v8903_v42 = vpop.f32.mrf.mxu1  ;;  %v4268_v49 = vor.u32 %v4267_v16, %v4266_v22  ;;  %v4270_v20 = vrot.slane %v9551_v53, 5  ;;  %9644 = vst [vmem:[#allocation31_spill] sm:$0xff] %v8909_v38  ;;  %v8921_v2 = vpop.f32.mrf.mxu0 }
 0x268   : > { %v9554_v62 = vshll.u32 %v8890_v46, 16  ;;  %v4278_v41 = vrot.slane %v4276_v35, 5  ;;  %v4280_v44 = vrot.slane %v9552_v17, 4  ;;  %v9645_v39 = vshrl.u32 %v8890_v46, 16  ;;  %9646 = vst [vmem:[#allocation32_spill] sm:$0xff] %v8921_v2 }
 0x269   : > { %4833 = vmatmul.mubr.bf16.gmra.mxu1 %v5727_v11  ;;  %v4281_v19 = vrot.slane %v9553_v7, 5  ;;  %v4290_v11 = vshll.u32 %v4108_v15, 16  ;;  %v8915_v22 = vpop.f32.mrf.mxu1  ;;  %v4269_v16 = vrot.slane %v4268_v49, 4  ;;  %v4273_v53 = vor.u32 %v4272_v58, %v4270_v20 }
 0x26a   : > { %4840 = vmatprep.mubr.bf16.mxu1 %v5744_v56  ;;  %v4284_v24 = vrot.slane %v9554_v62, 5  ;;  %v4286_v40 = vrot.slane %v9645_v39, 4  ;;  %v8925_v17 = vadd.f32 %v8734_v26, %v8720_v28  ;;  %v3899_v7 = vshrl.u32 %v3717_v52, 16  ;;  %v8933_v39 = vpop.f32.mrf.mxu0  ;;  %v8937_v28 = vld [vmem:[#allocation2 + $0xf4] sm:$0xf] }
 0x26b   : > { %v4282_v56 = vor.u32 %v4281_v19, %v4280_v44  ;;  %v4292_v35 = vrot.slane %v4290_v11, 5  ;;  %v8927_v15 = vpop.f32.mrf.mxu1  ;;  %v4271_v58 = vsel %vm7354_vm7, %v4269_v16, %v4270_v20  ;;  %v4274_v49 = vrot.slane %v4273_v53, 4  ;;  %9649 = vst [vmem:[#allocation34_spill] sm:$0xff] %v8933_v39  ;;  %9651 = vst [vmem:[#allocation35_spill] sm:$0xff] %v8937_v28 }
 0x26c   : > { %9647 = vst [vmem:[#allocation33_spill] sm:$0xff] %v8925_v17  ;;  %v4287_v31 = vor.u32 %v4286_v40, %v4284_v24  ;;  %v9648_v62 = vshrl.u32 %v8690_v5, 16  ;;  %v5712_v19 = vrot.slane %v3899_v7, 11  ;;  %v9650_v44 = vshrl.u32 %v8696_v60, 16  ;;  %v8947_v17 = vpop.f32.mrf.mxu0 }
 0x26d   : > { %v4283_v38 = vrot.slane %v4282_v56, 4  ;;  %v8939_v26 = vpop.f32.mrf.mxu1  ;;  %v4279_v52 = vsel %vm7354_vm7, %v4274_v49, %v4278_v41  ;;  %v9652_v40 = vshll.u32 %v8690_v5, 16  ;;  %9654 = vst [vmem:[#allocation37_spill] sm:$0xff] %v8947_v17  ;;  %v5745_v2 = vcombine.low %v8710_v59, %v8716_v33 }
 0x26e   : > { %v3906_v23 = vrot.slane %v9648_v62, 7  ;;  %v3915_v11 = vrot.slane %v9650_v44, 7  ;;  %v4288_v20 = vrot.slane %v4287_v31, 4  ;;  %v8945_v62 = vld [vmem:[#allocation2 + $0xf8] sm:$0xf]  ;;  %v5764_v7 = vcombine.low %v4271_v58, %v4279_v52 }
 0x26f   : > { %9653 = vst [vmem:[#allocation36_spill] sm:$0xff] %v8945_v62  ;;  %v4285_v56 = vsel %vm7354_vm7, %v4283_v38, %v4284_v24  ;;  %v9655_v44 = vshll.u32 %v8696_v60, 16  ;;  %v8955_v41 = vpop.f32.mrf.mxu1  ;;  %v6072_v5 = vadd.f32 %v8768_v6, %v8755_v0  ;;  %v9555_v58 = vshrl.u32 %v8937_v28, 16  ;;  %v4109_v38 = vld [vmem:[#allocation2 + $0xfc] sm:$0x1]  ;;  %v8966_v60 = vpop.f32.mrf.mxu0 }
 0x270   : > { %v3909_v53 = vor.u32 %v9652_v40, %v3906_v23  ;;  %v3911_v16 = vrot.slane %v3906_v23, 4  ;;  %v4293_v31 = vsel %vm7354_vm7, %v4288_v20, %v4292_v35  ;;  %v8964_v24 = vld [vmem:[#allocation2 + $0x104] sm:$0xf]  ;;  %6595 = vmatmul.mubr.bf16.gmra.mxu0 %v5764_v7  ;;  %v9556_v35 = vshll.u32 %v8937_v28, 16  ;;  %v4110_v7 = vld [vmem:[#allocation2 + $0x10c] sm:$0x1] }
 0x271   : > { %v3918_v39 = vor.u32 %v9655_v44, %v3915_v11  ;;  %9656 = vst [vmem:[#allocation38_spill] sm:$0xff] %v8964_v24  ;;  %v5765_v49 = vcombine.low %v4285_v56, %v4293_v31  ;;  %v9557_v52 = vshrl.u32 %v8945_v62, 16  ;;  %v8974_v20 = vpop.f32.mrf.mxu1  ;;  %v8977_v6 = vadd.f32 %v8626_v18, %v6072_v5  ;;  %v8982_v56 = vpop.f32.mrf.mxu0 }
 0x272   : > { %v3910_v23 = vsel %vm7317_vm6, %v5712_v19, %v3909_v53  ;;  %v8972_v19 = vld [vmem:[#allocation2 + $0x108] sm:$0xf]  ;;  %v9560_v40 = vshll.u32 %v8945_v62, 16  ;;  %v4294_v53 = vrot.slane %v9555_v58, 4  ;;  %v4304_v44 = vshll.u32 %v4109_v38, 16 }
 0x273   : > { %v3919_v11 = vsel %vm7317_vm6, %v3911_v16, %v3918_v39  ;;  %9657 = vst [vmem:[#allocation39_spill] sm:$0xff] %v8972_v19  ;;  %9658 = vst [vmem:[#allocation40_spill] sm:$0xff] %v8977_v6  ;;  %6598 = vmatprep.mubr.bf16.mxu0 %v5765_v49  ;;  %v4295_v39 = vrot.slane %v9556_v35, 5  ;;  %v4300_v16 = vrot.slane %v9557_v52, 4  ;;  %v9563_v31 = vshrl.u32 %v8964_v24, 16  ;;  %v8989_v18 = vpop.f32.mrf.mxu1  ;;  %v8996_v35 = vpop.f32.mrf.mxu0 }
 0x274   : > { %v5728_v0 = vcombine.low %v3910_v23, %v3919_v11  ;;  %v4298_v23 = vrot.slane %v9560_v40, 5  ;;  %v9566_v5 = vshll.u32 %v8964_v24, 16  ;;  %v9569_v49 = vshll.u32 %v8972_v19, 16  ;;  %v3720_v58 = vld [vmem:[#allocation2 + $0xa0] sm:$0x8] }
 0x275   : > { %v4296_v52 = vor.u32 %v4295_v39, %v4294_v53  ;;  %v4306_v38 = vrot.slane %v4304_v44, 5  ;;  %v4308_v6 = vrot.slane %v9563_v31, 4  ;;  %v4318_v17 = vshll.u32 %v4110_v7, 16  ;;  %v6168_v63 = vpop.f32.mrf.mxu0 }
 0x276   : > { %4841 = vmatmul.mubr.bf16.gmra.mxu1 %v5728_v0  ;;  %v9000_v0 = vpop.f32.mrf.mxu1  ;;  %v4301_v62 = vor.u32 %v4300_v16, %v4298_v23  ;;  %v4309_v40 = vrot.slane %v9566_v5, 5  ;;  %v4312_v11 = vrot.slane %v9569_v49, 5  ;;  %v9659_v28 = vshrl.u32 %v8972_v19, 16 }
 0x277   : > { %4848 = vmatprep.mubr.bf16.mxu1 %v5745_v2  ;;  %v4297_v2 = vrot.slane %v4296_v52, 4  ;;  %v4320_v53 = vrot.slane %v4318_v17, 5  ;;  %v6075_v39 = vadd.f32 %v8801_v50, %v8782_v12  ;;  %v3921_v44 = vshrl.u32 %v3720_v58, 16  ;;  %v6170_v48 = vpop.f32.mrf.mxu0 }
 0x278   : > { %v4314_v30 = vrot.slane %v9659_v28, 4  ;;  %v9010_v7 = vpop.f32.mrf.mxu1  ;;  %v4302_v31 = vrot.slane %v4301_v62, 4  ;;  %v4310_v16 = vor.u32 %v4309_v40, %v4308_v6  ;;  %v9660_v5 = vshrl.u32 %v8710_v59, 16 }
 0x279   : > { %v4299_v49 = vsel %vm7354_vm7, %v4297_v2, %v4298_v23  ;;  %v9017_v28 = vadd.f32 %v8657_v10, %v6075_v39  ;;  %v5713_v17 = vrot.slane %v3921_v44, 11  ;;  %v9661_v52 = vshrl.u32 %v8716_v33, 16  ;;  %v6171_v19 = vpop.f32.mrf.mxu0 }
 0x27a   : > { %v4315_v46 = vor.u32 %v4314_v30, %v4312_v11  ;;  %v3928_v24 = vrot.slane %v9660_v5, 7  ;;  %v9021_v50 = vpop.f32.mrf.mxu1  ;;  %v4307_v62 = vsel %vm7354_vm7, %v4302_v31, %v4306_v38  ;;  %v4311_v30 = vrot.slane %v4310_v16, 4  ;;  %v3723_v5 = vld [vmem:[#allocation2 + $0xb0] sm:$0x8] }
 0x27b   : > { %v3937_v12 = vrot.slane %v9661_v52, 7  ;;  %v9662_v6 = vshll.u32 %v8710_v59, 16  ;;  %v5766_v23 = vcombine.low %v4299_v49, %v4307_v62  ;;  %v9663_v10 = vshll.u32 %v8716_v33, 16  ;;  %v6173_v38 = vpop.f32.mrf.mxu0 }
 0x27c   : > { %v4316_v58 = vrot.slane %v4315_v46, 4  ;;  %v3933_v2 = vrot.slane %v3928_v24, 4  ;;  %v9029_v44 = vpop.f32.mrf.mxu1  ;;  %v4313_v52 = vsel %vm7354_vm7, %v4311_v30, %v4312_v11  ;;  %v6078_v59 = vadd.f32 %v8839_v36, %v8825_v25 }
 0x27d   : > { %v3931_v40 = vor.u32 %v9662_v6, %v3928_v24  ;;  %v3940_v39 = vor.u32 %v9663_v10, %v3937_v12  ;;  %6599 = vmatmul.mubr.bf16.gmra.mxu0 %v5766_v23  ;;  %v6081_v49 = vadd.f32 %v8864_v13, %v8850_v8  ;;  %v3943_v16 = vshrl.u32 %v3723_v5, 16  ;;  %v6174_v30 = vpop.f32.mrf.mxu0 }
 0x27e   : > { %v4321_v31 = vsel %vm7354_vm7, %v4316_v58, %v4320_v53  ;;  %v9043_v11 = vpop.f32.mrf.mxu1  ;;  %v9046_v53 = vadd.f32 %v6078_v59, %v8718_v51  ;;  %v9665_v25 = vshrl.u32 %v8774_v4, 16  ;;  %v5746_v58 = vcombine.low %v8764_v61, %v8774_v4  ;;  %v3726_v51 = vld [vmem:[#allocation2 + $0xc0] sm:$0x8] }
 0x27f   : > { %v3932_v46 = vsel %vm7317_vm6, %v5713_v17, %v3931_v40  ;;  %v5767_v24 = vcombine.low %v4313_v52, %v4321_v31  ;;  %v3941_v33 = vsel %vm7317_vm6, %v3933_v2, %v3940_v39  ;;  %v9664_v17 = vshrl.u32 %v8764_v61, 16 }
 0x280   : > { %v5729_v12 = vcombine.low %v3932_v46, %v3941_v33  ;;  %v3959_v36 = vrot.slane %v9665_v25, 7  ;;  %v9055_v13 = vadd.f32 %v6081_v49, %v8745_v9  ;;  %v5714_v8 = vrot.slane %v3943_v16, 11  ;;  %v6101_v40 = vpop.f32.mrf.mxu1  ;;  %v6176_v9 = vpop.f32.mrf.mxu0 }
 0x281   : > { %v3950_v62 = vrot.slane %v9664_v17, 7  ;;  %6602 = vmatprep.mubr.bf16.mxu0 %v5767_v24  ;;  %v6084_v6 = vadd.f32 %v8903_v42, %v8892_v57  ;;  %v9666_v5 = vshll.u32 %v8764_v61, 16  ;;  %v9667_v10 = vshll.u32 %v8774_v4, 16 }
 0x282   : > { %4849 = vmatmul.mubr.bf16.gmra.mxu1 %v5729_v12  ;;  %v9065_v52 = vadd.f32 %v8982_v56, %v8966_v60  ;;  %v6087_v57 = vadd.f32 %v8927_v15, %v8915_v22  ;;  %v9073_v42 = vadd.f32 %v6168_v63, %v8996_v35  ;;  %v6103_v61 = vpop.f32.mrf.mxu1  ;;  %v3965_v46 = vshrl.u32 %v3726_v51, 16  ;;  %v6177_v59 = vpop.f32.mrf.mxu0 }
 0x283   : > { %v3953_v23 = vor.u32 %v9666_v5, %v3950_v62  ;;  %v3955_v2 = vrot.slane %v3950_v62, 4  ;;  %v3962_v39 = vor.u32 %v9667_v10, %v3959_v36  ;;  %4856 = vmatprep.mubr.bf16.mxu1 %v5746_v58  ;;  %v9068_v31 = vadd.f32 %v8698_v21, %v6084_v6 }
 0x284   : > { %v9080_v56 = vadd.f32 %v8732_v45, %v6087_v57  ;;  %v9668_v21 = vshrl.u32 %v8797_v54, 16  ;;  %v9669_v22 = vshrl.u32 %v8809_v37, 16  ;;  %v6104_v63 = vpop.f32.mrf.mxu1  ;;  %v6090_v35 = vadd.f32 %v8955_v41, %v8939_v26  ;;  %v6179_v33 = vpop.f32.mrf.mxu0  ;;  %v3729_v45 = vld [vmem:[#allocation2 + $0xd0] sm:$0x8] }
 0x285   : > { %v3954_v4 = vsel %vm7317_vm6, %v5714_v8, %v3953_v23  ;;  %v3963_v60 = vsel %vm7317_vm6, %v3955_v2, %v3962_v39  ;;  %v9088_v49 = vadd.f32 %v6171_v19, %v6170_v48  ;;  %v6093_v16 = vadd.f32 %v8989_v18, %v8974_v20 }
 0x286   : > { %v3972_v24 = vrot.slane %v9668_v21, 7  ;;  %v3981_v15 = vrot.slane %v9669_v22, 7  ;;  %v9092_v12 = vadd.f32 %v6174_v30, %v6173_v38  ;;  %v6106_v17 = vpop.f32.mrf.mxu1  ;;  %v5730_v62 = vcombine.low %v3954_v4, %v3963_v60  ;;  %v6180_v8 = vpop.f32.mrf.mxu0 }
 0x287   : > { %v5747_v25 = vcombine.low %v8797_v54, %v8809_v37  ;;  %v5715_v36 = vrot.slane %v3965_v46, 11  ;;  %v9097_v58 = vadd.f32 %v6090_v35, %v8780_v14  ;;  %v9670_v26 = vshll.u32 %v8797_v54, 16 }
 0x288   : > { %v3977_v41 = vrot.slane %v3972_v24, 4  ;;  %v9671_v19 = vshll.u32 %v8809_v37, 16  ;;  %v9104_v18 = vadd.f32 %v6093_v16, %v8817_v34  ;;  %v6107_v38 = vpop.f32.mrf.mxu1  ;;  %v3987_v30 = vshrl.u32 %v3729_v45, 16  ;;  %v6182_v5 = vpop.f32.mrf.mxu0 }
 0x289   : > { %v3975_v48 = vor.u32 %v9670_v26, %v3972_v24  ;;  %v9672_v6 = vshrl.u32 %v8856_v47, 16  ;;  %v6096_v14 = vadd.f32 %v9010_v7, %v9000_v0  ;;  %v9673_v54 = vshrl.u32 %v8860_v43, 16  ;;  %v9677_v26 = vld [vmem:[#allocation28_spill] sm:$0xff] }
 0x28a   : > { %v3984_v20 = vor.u32 %v9671_v19, %v3981_v15  ;;  %4857 = vmatmul.mubr.bf16.gmra.mxu1 %v5730_v62  ;;  %v9112_v2 = vadd.f32 %v6177_v59, %v6176_v9  ;;  %v6099_v37 = vadd.f32 %v9029_v44, %v9021_v50  ;;  %v9116_v34 = vadd.f32 %v6180_v8, %v6179_v33  ;;  %v6109_v10 = vpop.f32.mrf.mxu1  ;;  %v6183_v57 = vpop.f32.mrf.mxu0  ;;  %v3732_v9 = vld [vmem:[#allocation2 + $0xe0] sm:$0x8] }
 0x28b   : > { %v3994_v51 = vrot.slane %v9672_v6, 7  ;;  %4864 = vmatprep.mubr.bf16.mxu1 %v5747_v25  ;;  %v4003_v23 = vrot.slane %v9673_v54, 7  ;;  %v9119_v39 = vadd.f32 %v8766_v1, %v6096_v14  ;;  %v3976_v0 = vsel %vm7317_vm6, %v5715_v36, %v3975_v48 }
 0x28c   : > { %v3985_v7 = vsel %vm7317_vm6, %v3977_v41, %v3984_v20  ;;  %v9126_v4 = vadd.f32 %v8799_v29, %v6099_v37  ;;  %v6110_v46 = vpop.f32.mrf.mxu1  ;;  %v5716_v59 = vrot.slane %v3987_v30, 11  ;;  %v9674_v50 = vshll.u32 %v8856_v47, 16  ;;  %v6185_v21 = vpop.f32.mrf.mxu0 }
 0x28d   : > { %v3999_v60 = vrot.slane %v3994_v51, 4  ;;  %v9675_v1 = vshll.u32 %v8860_v43, 16  ;;  %v6102_v22 = vadd.f32 %v6101_v40, %v9043_v11  ;;  %v9133_v15 = vadd.f32 %v6183_v57, %v6182_v5  ;;  %v9681_v57 = vld [vmem:[#allocation25_spill] sm:$0xff] }
 0x28e   : > { %v3997_v44 = vor.u32 %v9674_v50, %v3994_v51  ;;  %v6105_v35 = vadd.f32 %v6104_v63, %v6103_v61  ;;  %v6112_v33 = vpop.f32.mrf.mxu1  ;;  %v5731_v16 = vcombine.low %v3976_v0, %v3985_v7  ;;  %v4009_v29 = vshrl.u32 %v3732_v9, 16  ;;  %v6186_v25 = vpop.f32.mrf.mxu0  ;;  %v9678_v61 = vld [vmem:[#allocation30_spill] sm:$0xff]  ;;  %v9682_v9 = vld [vmem:[#allocation27_spill] sm:$0xff] }
 0x28f   : > { %v4006_v24 = vor.u32 %v9675_v1, %v4003_v23  ;;  %v9676_v45 = vshrl.u32 %v8880_v55, 16  ;;  %v5748_v36 = vcombine.low %v8856_v47, %v8860_v43  ;;  %v9140_v8 = vadd.f32 %v6102_v22, %v8848_v32  ;;  %v3735_v32 = vld [vmem:[#allocation2 + $0xf0] sm:$0x8]  ;;  %v9155_v23 = vld [vmem:[#allocation2 + $0x114] sm:$0xf] }
 0x290   : > { %v9143_v48 = vadd.f32 %v6105_v35, %v9677_v26  ;;  %v9145_v11 = vadd.f32 %v6186_v25, %v6185_v21  ;;  %v6113_v40 = vpop.f32.mrf.mxu1  ;;  %v9679_v63 = vshrl.u32 %v9678_v61, 16  ;;  %v6188_v19 = vpop.f32.mrf.mxu0  ;;  %v3998_v20 = vsel %vm7317_vm6, %v5716_v59, %v3997_v44 }
 0x291   : > { %v4016_v62 = vrot.slane %v9676_v45, 7  ;;  %v4007_v47 = vsel %vm7317_vm6, %v3999_v60, %v4006_v24  ;;  %v6108_v43 = vadd.f32 %v6107_v38, %v6106_v17  ;;  %v6111_v30 = vadd.f32 %v6110_v46, %v6109_v10  ;;  %v9167_v17 = vld [vmem:[#allocation2 + $0x118] sm:$0xf]  ;;  %v4111_v38 = vld [vmem:[#allocation2 + $0x11c] sm:$0x1] }
 0x292   : > { %4865 = vmatmul.mubr.bf16.gmra.mxu1 %v5731_v16  ;;  %v4025_v41 = vrot.slane %v9679_v63, 7  ;;  %v6115_v6 = vpop.f32.mrf.mxu1  ;;  %v5717_v51 = vrot.slane %v4009_v29, 11  ;;  %v9680_v14 = vshll.u32 %v8880_v55, 16  ;;  %v6189_v54 = vpop.f32.mrf.mxu0  ;;  %v5749_v37 = vcombine.low %v8880_v55, %v9678_v61  ;;  %v9684_v55 = vld [vmem:[#allocation35_spill] sm:$0xff]  ;;  %v9686_v63 = vld [vmem:[#allocation36_spill] sm:$0xff] }
 0x293   : > { %4872 = vmatprep.mubr.bf16.mxu1 %v5748_v36  ;;  %v9160_v0 = vadd.f32 %v9681_v57, %v6108_v43  ;;  %v9162_v7 = vadd.f32 %v6189_v54, %v6188_v19  ;;  %v9165_v59 = vadd.f32 %v9682_v9, %v6111_v30  ;;  %v5732_v46 = vcombine.low %v3998_v20, %v4007_v47 }
 0x294   : > { %v4019_v5 = vor.u32 %v9680_v14, %v4016_v62  ;;  %v6116_v10 = vpop.f32.mrf.mxu1  ;;  %v4021_v50 = vrot.slane %v4016_v62, 4  ;;  %v9683_v44 = vshll.u32 %v9678_v61, 16  ;;  %v4031_v21 = vshrl.u32 %v3735_v32, 16  ;;  %v6191_v1 = vpop.f32.mrf.mxu0 }
 0x295   : > { %v9685_v24 = vshrl.u32 %v9684_v55, 16  ;;  %v6114_v35 = vadd.f32 %v6113_v40, %v6112_v33  ;;  %v9575_v16 = vshrl.u32 %v9155_v23, 16  ;;  %v9573_v29 = vshll.u32 %v9155_v23, 16  ;;  %v9688_v33 = vld [vmem:[#allocation32_spill] sm:$0xff] }
 0x296   : > { %v4028_v60 = vor.u32 %v9683_v44, %v4025_v41  ;;  %v6118_v45 = vpop.f32.mrf.mxu1  ;;  %v4020_v25 = vsel %vm7317_vm6, %v5717_v51, %v4019_v5  ;;  %v6192_v36 = vpop.f32.mrf.mxu0  ;;  %v9574_v62 = vshrl.u32 %v9167_v17, 16  ;;  %v9572_v26 = vshll.u32 %v9167_v17, 16 }
 0x297   : > { %v4038_v22 = vrot.slane %v9685_v24, 7  ;;  %v4332_v61 = vshll.u32 %v4111_v38, 16  ;;  %v9687_v41 = vshrl.u32 %v9686_v63, 16  ;;  %v9181_v20 = vadd.f32 %v6192_v36, %v6191_v1  ;;  %v3738_v36 = vld [vmem:[#allocation2 + $0x100] sm:$0x8] }
 0x298   : > { %v9184_v40 = vadd.f32 %v6114_v35, %v9688_v33  ;;  %v4322_v47 = vrot.slane %v9575_v16, 4  ;;  %v6119_v32 = vpop.f32.mrf.mxu1  ;;  %v4029_v43 = vsel %vm7317_vm6, %v4021_v50, %v4028_v60  ;;  %v6194_v30 = vpop.f32.mrf.mxu0  ;;  %v4323_v51 = vrot.slane %v9573_v29, 5  ;;  %v9690_v33 = vld [vmem:[#allocation37_spill] sm:$0xff] }
 0x299   : > { %v4047_v19 = vrot.slane %v9687_v41, 7  ;;  %v4326_v14 = vrot.slane %v9572_v26, 5  ;;  %v4328_v5 = vrot.slane %v9574_v62, 4  ;;  %v9196_v54 = vrot.slane %v4031_v21, 11 }
 0x29a   : > { %4873 = vmatmul.mubr.bf16.gmra.mxu1 %v5732_v46  ;;  %v9689_v57 = vshll.u32 %v9684_v55, 16  ;;  %v6117_v38 = vadd.f32 %v6116_v10, %v6115_v6  ;;  %v6121_v46 = vpop.f32.mrf.mxu1  ;;  %v5750_v50 = vcombine.low %v9684_v55, %v9686_v63  ;;  %v4324_v44 = vor.u32 %v4323_v51, %v4322_v47  ;;  %v6195_v24 = vpop.f32.mrf.mxu0  ;;  %v9694_v51 = vld [vmem:[#allocation17_spill] sm:$0xff] }
 0x29b   : > { %4880 = vmatprep.mubr.bf16.mxu1 %v5749_v37  ;;  %v4329_v60 = vor.u32 %v4328_v5, %v4326_v14  ;;  %v4334_v1 = vrot.slane %v4332_v61, 5  ;;  %v5733_v35 = vcombine.low %v4020_v25, %v4029_v43  ;;  %v6196_v41 = vadd.f32 %v6195_v24, %v6194_v30  ;;  %v9692_v25 = vld [vmem:[#allocation31_spill] sm:$0xff]  ;;  %v9693_v43 = vld [vmem:[#allocation16_spill] sm:$0xff] }
 0x29c   : > { %v9200_v9 = vor.u32 %v9689_v57, %v4038_v22  ;;  %v9205_v37 = vadd.f32 %v6117_v38, %v9690_v33  ;;  %v6120_v21 = vadd.f32 %v6119_v32, %v6118_v45  ;;  %v6122_v26 = vpop.f32.mrf.mxu1  ;;  %v4043_v29 = vrot.slane %v4038_v22, 4  ;;  %v6197_v16 = vpop.f32.mrf.mxu0 }
 0x29d   : > { %v9691_v57 = vshll.u32 %v9686_v63, 16  ;;  %v4325_v10 = vrot.slane %v4324_v44, 4  ;;  %v4330_v62 = vrot.slane %v4329_v60, 4  ;;  %v6123_v47 = vadd.f32 %v6122_v26, %v6121_v46  ;;  %v9697_v46 = vld [vmem:[#allocation34_spill] sm:$0xff] }
 0x29e   : > { %v4042_v55 = vsel %vm7317_vm6, %v9196_v54, %v9200_v9  ;;  %v9214_v61 = vadd.f32 %v9692_v25, %v6120_v21  ;;  %v3416_v45 = vadd.f32 %v9088_v49, %v9693_v43  ;;  %v6528_v32 = vpop.f32.mrf.mxu1  ;;  %v4053_v22 = vshrl.u32 %v3738_v36, 16  ;;  %v6198_v30 = vpop.f32.mrf.mxu0  ;;  %v9695_v54 = vld [vmem:[#allocation38_spill] sm:$0xff]  ;;  %v9699_v36 = vld [vmem:[#allocation39_spill] sm:$0xff] }
 0x29f   : > { %v4050_v6 = vor.u32 %v9691_v57, %v4047_v19  ;;  %v4327_v63 = vsel %vm7354_vm7, %v4325_v10, %v4326_v14  ;;  %v4335_v19 = vsel %vm7354_vm7, %v4330_v62, %v4334_v1  ;;  %v3408_v5 = vadd.f32 %v9065_v52, %v9694_v51  ;;  %v9698_v1 = vld [vmem:[#allocation14_spill] sm:$0xff]  ;;  %v9701_v57 = vld [vmem:[#allocation13_spill] sm:$0xff]  ;;  %v9702_v10 = vld [vmem:[#allocation19_spill] sm:$0xff] }
 0x2a0   : > { %v9696_v9 = vshrl.u32 %v9695_v54, 16  ;;  %v5768_v44 = vcombine.low %v4327_v63, %v4335_v19  ;;  %v6199_v26 = vadd.f32 %v6198_v30, %v6197_v16  ;;  %v9227_v60 = vadd.f32 %v9697_v46, %v6123_v47  ;;  %v3568_v49 = vpop.f32.mrf.mxu1  ;;  %v6200_v24 = vpop.f32.mrf.mxu0  ;;  %v9706_v63 = vld [vmem:[#allocation24_spill] sm:$0xff] }
 0x2a1   : > { %v4051_v14 = vsel %vm7317_vm6, %v4043_v29, %v4050_v6  ;;  %v9231_v27 = vadd.f32 %v6528_v32, %v3416_v45  ;;  %v9233_v62 = vadd.f32 %v3568_v49, %v3408_v5  ;;  %v3419_v52 = vadd.f32 %v9092_v12, %v9698_v1  ;;  %v9703_v6 = vld [vmem:[#allocation15_spill] sm:$0xff]  ;;  %v9704_v45 = vld [vmem:[#allocation21_spill] sm:$0xff]  ;;  %v9710_v1 = vld [vmem:[#allocation20_spill] sm:$0xff] }
 0x2a2   : > { %v4060_v38 = vrot.slane %v9696_v9, 7  ;;  %4881 = vmatmul.mubr.bf16.gmra.mxu1 %v5733_v35  ;;  %v9700_v33 = vshrl.u32 %v9699_v36, 16  ;;  %6603 = vmatmul.mubr.bf16.gmra.mxu0 %v5768_v44  ;;  %v6529_v21 = vpop.f32.mrf.mxu1  ;;  %v3411_v35 = vadd.f32 %v9073_v42, %v9701_v57  ;;  %v3432_v29 = vadd.f32 %v9133_v15, %v9702_v10  ;;  %v6201_v47 = vpop.f32.mrf.mxu0  ;;  %v9707_v42 = vld [vmem:[#allocation22_spill] sm:$0xff]  ;;  %v9709_v44 = vld [vmem:[#allocation23_spill] sm:$0xff] }
 0x2a3   : > { %4888 = vmatprep.mubr.bf16.mxu1 %v5750_v50  ;;  %v3424_v25 = vadd.f32 %v9112_v2, %v9703_v6  ;;  %v9245_v43 = vadd.f32 %v6529_v21, %v3419_v52  ;;  %v3435_v12 = vadd.f32 %v9145_v11, %v9704_v45  ;;  %v9705_v50 = vld [vmem:[#allocation18_spill] sm:$0xff]  ;;  %v3448_v19 = vadd.f32 %v6196_v41, %v9706_v63  ;;  %v9711_v11 = vld [vmem:[#allocation33_spill] sm:$0xff] }
 0x2a4   : > { %v4069_v16 = vrot.slane %v9700_v33, 7  ;;  %v3427_v32 = vadd.f32 %v9116_v34, %v9705_v50  ;;  %v6202_v30 = vadd.f32 %v6201_v47, %v6200_v24  ;;  %v3571_v51 = vpop.f32.mrf.mxu1  ;;  %v3440_v5 = vadd.f32 %v9162_v7, %v9707_v42  ;;  %v9708_v15 = vld [vmem:[#allocation26_spill] sm:$0xff]  ;;  %v6203_v46 = vpop.f32.mrf.mxu0  ;;  %v3741_v33 = vld [vmem:[#allocation2 + $0x110] sm:$0x8]  ;;  %v9712_v21 = vld [vmem:[#allocation29_spill] sm:$0xff] }
 0x2a5   : > { %v3451_v9 = vadd.f32 %v6199_v26, %v9708_v15  ;;  %v3443_v2 = vadd.f32 %v9181_v20, %v9709_v44  ;;  %v9257_v49 = vadd.f32 %v3571_v51, %v3411_v35  ;;  %v3154_v52 = vadd.f32 %v9711_v11, %v9710_v1 }
 0x2a6   : > { %v6532_v34 = vpop.f32.mrf.mxu1  ;;  %v9262_v41 = vadd.f32 %v6202_v30, %v9712_v21  ;;  %v5734_v24 = vcombine.low %v4042_v55, %v4051_v14  ;;  %v5751_v7 = vcombine.low %v9695_v54, %v9699_v36  ;;  %v5719_v57 = vrot.slane %v4053_v22, 11  ;;  %v6204_v26 = vpop.f32.mrf.mxu0 }
 0x2a7   : > { %v9266_v10 = vadd.f32 %v6532_v34, %v3432_v29  ;;  %v9713_v20 = vshll.u32 %v9695_v54, 16  ;;  %v4065_v6 = vrot.slane %v4060_v38, 4  ;;  %v9714_v47 = vshll.u32 %v9699_v36, 16 }
 0x2a8   : > { %v6205_v50 = vadd.f32 %v6204_v26, %v6203_v46  ;;  %v3584_v63 = vpop.f32.mrf.mxu1  ;;  %v4075_v30 = vshrl.u32 %v3741_v33, 16  ;;  %v6206_v51 = vpop.f32.mrf.mxu0  ;;  %v9715_v22 = vshrl.u32 %v9155_v23, 16  ;;  %v9716_v29 = vshrl.u32 %v9167_v17, 16  ;;  %v9719_v26 = vld [vmem:[#allocation40_spill] sm:$0xff] }
 0x2a9   : > { %v4063_v35 = vor.u32 %v9713_v20, %v4060_v38  ;;  %v4072_v45 = vor.u32 %v9714_v47, %v4069_v16  ;;  %v9272_v55 = vadd.f32 %v3584_v63, %v3424_v25  ;;  %v5752_v1 = vcombine.low %v9155_v23, %v9167_v17 }
 0x2aa   : > { %4889 = vmatmul.mubr.bf16.gmra.mxu1 %v5734_v24  ;;  %v4082_v14 = vrot.slane %v9715_v22, 7  ;;  %v4091_v42 = vrot.slane %v9716_v29, 7  ;;  %v6533_v54 = vpop.f32.mrf.mxu1  ;;  %v3459_v15 = vadd.f32 %v6205_v50, %v3154_v52  ;;  %v6207_v38 = vpop.f32.mrf.mxu0  ;;  %v5720_v11 = vrot.slane %v4075_v30, 11 }
 0x2ab   : > { %4896 = vmatprep.mubr.bf16.mxu1 %v5751_v7  ;;  %v9278_v44 = vadd.f32 %v6533_v54, %v3435_v12  ;;  %v4064_v36 = vsel %vm7317_vm6, %v5719_v57, %v4063_v35  ;;  %v4073_v16 = vsel %vm7317_vm6, %v4065_v6, %v4072_v45  ;;  %v6208_v25 = vadd.f32 %v6207_v38, %v6206_v51 }
 0x2ac   : > { %v3587_v46 = vpop.f32.mrf.mxu1  ;;  %v6209_v33 = vpop.f32.mrf.mxu0  ;;  %v9717_v52 = vshll.u32 %v9155_v23, 16  ;;  %v4087_v12 = vrot.slane %v4082_v14, 4  ;;  %v9718_v24 = vshll.u32 %v9167_v17, 16  ;;  %v5735_v35 = vcombine.low %v4064_v36, %v4073_v16 }
 0x2ad   : > { %v9286_v34 = vadd.f32 %v3587_v46, %v3427_v32  ;;  %v3464_v20 = vadd.f32 %v6208_v25, %v9719_v26 }
 0x2ae   : > { %v4085_v21 = vor.u32 %v9717_v52, %v4082_v14  ;;  %v4094_v7 = vor.u32 %v9718_v24, %v4091_v42  ;;  %v6536_v57 = vpop.f32.mrf.mxu1  ;;  %v6210_v6 = vpop.f32.mrf.mxu0 }
 0x2af   : > { %v9293_v47 = vadd.f32 %v6536_v57, %v3448_v19  ;;  %v6211_v45 = vadd.f32 %v6210_v6, %v6209_v33 }
 0x2b0   : > { %v3600_v50 = vpop.f32.mrf.mxu1  ;;  %v6212_v63 = vpop.f32.mrf.mxu0  ;;  %v4086_v23 = vsel %vm7317_vm6, %v5720_v11, %v4085_v21  ;;  %v4095_v17 = vsel %vm7317_vm6, %v4087_v12, %v4094_v7 }
 0x2b1   : > { %v9295_v32 = vadd.f32 %v3600_v50, %v3440_v5  ;;  %v3467_v51 = vadd.f32 %v6211_v45, %v9017_v28  ;;  %v5736_v42 = vcombine.low %v4086_v23, %v4095_v17 }
 0x2b2   : > { %4897 = vmatmul.mubr.bf16.gmra.mxu1 %v5735_v35  ;;  %v6537_v30 = vpop.f32.mrf.mxu1  ;;  %v6213_v22 = vpop.f32.mrf.mxu0 }
 0x2b3   : > { %4904 = vmatprep.mubr.bf16.mxu1 %v5752_v1  ;;  %v9302_v14 = vadd.f32 %v6537_v30, %v3451_v9  ;;  %v6214_v19 = vadd.f32 %v6213_v22, %v6212_v63 }
 0x2b4   : > { %v3603_v29 = vpop.f32.mrf.mxu1  ;;  %v6215_v54 = vpop.f32.mrf.mxu0 }
 0x2b5   : > { %v9304_v38 = vadd.f32 %v3603_v29, %v3443_v2  ;;  %v3472_v5 = vadd.f32 %v6214_v19, %v9046_v53 }
 0x2b6   : > { %v6216_v36 = vpop.f32.mrf.mxu0  ;;  %v6540_v25 = vpop.f32.mrf.mxu1 }
 0x2b7   : > { %v6217_v16 = vadd.f32 %v6216_v36, %v6215_v54  ;;  %v9307_v46 = vadd.f32 %v6540_v25, %v3464_v20 }
 0x2b8   : > { %v6218_v3 = vpop.f32.mrf.mxu0  ;;  %v3616_v1 = vpop.f32.mrf.mxu1 }
 0x2b9   : > { %v3475_v28 = vadd.f32 %v6217_v16, %v9055_v13  ;;  %v9311_v11 = vadd.f32 %v3616_v1, %v9262_v41 }
 0x2ba   : > { %4905 = vmatmul.mubr.bf16.gmra.mxu1 %v5736_v42  ;;  %v6219_v9 = vpop.f32.mrf.mxu0  ;;  %v6541_v52 = vpop.f32.mrf.mxu1 }
 0x2bb   : > { %v6220_v33 = vadd.f32 %v6219_v9, %v6218_v3  ;;  %v9313_v21 = vadd.f32 %v6541_v52, %v3467_v51 }
 0x2bc   : > { %v6221_v2 = vpop.f32.mrf.mxu0  ;;  %v3619_v53 = vpop.f32.mrf.mxu1 }
 0x2bd   : > { %v3480_v12 = vadd.f32 %v6220_v33, %v9068_v31  ;;  %v9316_v7 = vadd.f32 %v3619_v53, %v3459_v15 }
 0x2be   : > { %v6222_v24 = vpop.f32.mrf.mxu0 }
 0x2bf   : > { %v6223_v57 = vadd.f32 %v6222_v24, %v6221_v2  ;;  %v6544_v20 = vpop.f32.mrf.mxu1 }
 0x2c0   : > { %v6224_v26 = vpop.f32.mrf.mxu0  ;;  %v9319_v6 = vadd.f32 %v6544_v20, %v3480_v12 }
 0x2c1   : > { %v3483_v13 = vadd.f32 %v6223_v57, %v9080_v56  ;;  %v3632_v45 = vpop.f32.mrf.mxu1 }
 0x2c2   : > { %v6225_v35 = vpop.f32.mrf.mxu0  ;;  %v9321_v63 = vadd.f32 %v3632_v45, %v3472_v5 }
 0x2c3   : > { %v6226_v41 = vadd.f32 %v6225_v35, %v6224_v26  ;;  %v6545_v23 = vpop.f32.mrf.mxu1 }
 0x2c4   : > { %v6227_v50 = vpop.f32.mrf.mxu0  ;;  %v9324_v30 = vadd.f32 %v6545_v23, %v3483_v13 }
 0x2c5   : > { %v3488_v17 = vadd.f32 %v6226_v41, %v9097_v58  ;;  %v3635_v51 = vpop.f32.mrf.mxu1 }
 0x2c6   : > { %v6228_v31 = vpop.f32.mrf.mxu0  ;;  %v9326_v19 = vadd.f32 %v3635_v51, %v3475_v28 }
 0x2c7   : > { %v6229_v15 = vadd.f32 %v6228_v31, %v6227_v50 }
 0x2c8   : > { %v6230_v22 = vpop.f32.mrf.mxu0  ;;  %v6548_v42 = vpop.f32.mrf.mxu1 }
 0x2c9   : > { %v3491_v56 = vadd.f32 %v6229_v15, %v9104_v18 }
 0x2ca   : > { %v6231_v29 = vpop.f32.mrf.mxu0  ;;  %v3648_v16 = vpop.f32.mrf.mxu1 }
 0x2cb   : > { %v6232_v54 = vadd.f32 %v6231_v29, %v6230_v22  ;;  %v9330_v25 = vadd.f32 %v3648_v16, %v3488_v17 }
 0x2cc   : > { %v6233_v36 = vpop.f32.mrf.mxu0  ;;  %v6549_v3 = vpop.f32.mrf.mxu1 }
 0x2cd   : > { %v3496_v5 = vadd.f32 %v6232_v54, %v9119_v39 }
 0x2ce   : > { %v6234_v58 = vpop.f32.mrf.mxu0  ;;  %v3651_v52 = vpop.f32.mrf.mxu1 }
 0x2cf   : > { %v6235_v1 = vadd.f32 %v6234_v58, %v6233_v36  ;;  %v9332_v9 = vadd.f32 %v6548_v42, %v3496_v5  ;;  %v9335_v2 = vadd.f32 %v3651_v52, %v3491_v56 }
 0x2d0   : > { %v6236_v33 = vpop.f32.mrf.mxu0 }
 0x2d1   : > { %v3499_v28 = vadd.f32 %v6235_v1, %v9126_v4 }
 0x2d2   : > { %v6237_v18 = vpop.f32.mrf.mxu0  ;;  %v6552_v57 = vpop.f32.mrf.mxu1 }
 0x2d3   : > { %v6238_v53 = vadd.f32 %v6237_v18, %v6236_v33  ;;  %v9337_v12 = vadd.f32 %v6549_v3, %v3499_v28 }
 0x2d4   : > { %v6239_v24 = vpop.f32.mrf.mxu0  ;;  %v3664_v20 = vpop.f32.mrf.mxu1 }
 0x2d5   : > { %v3504_v39 = vadd.f32 %v6238_v53, %v9140_v8 }
 0x2d6   : > { %v6240_v26 = vpop.f32.mrf.mxu0  ;;  %v6553_v45 = vpop.f32.mrf.mxu1 }
 0x2d7   : > { %v6241_v13 = vadd.f32 %v6240_v26, %v6239_v24  ;;  %v9340_v35 = vadd.f32 %v3664_v20, %v3504_v39 }
 0x2d8   : > { %v6242_v41 = vpop.f32.mrf.mxu0  ;;  %v3667_v23 = vpop.f32.mrf.mxu1 }
 0x2d9   : > { %v3507_v50 = vadd.f32 %v6241_v13, %v9143_v48 }
 0x2da   : > { %v6243_v4 = vpop.f32.mrf.mxu0 }
 0x2db   : > { %v6244_v17 = vadd.f32 %v6243_v4, %v6242_v41  ;;  %v9343_v31 = vadd.f32 %v3667_v23, %v3507_v50  ;;  %v6556_v22 = vpop.f32.mrf.mxu1 }
 0x2dc   : > { %v6245_v15 = vpop.f32.mrf.mxu0 }
 0x2dd   : > { %v3512_v51 = vadd.f32 %v6244_v17, %v9160_v0  ;;  %v3680_v42 = vpop.f32.mrf.mxu1 }
 0x2de   : > { %v6246_v56 = vpop.f32.mrf.mxu0 }
 0x2df   : > { %v9346_v8 = vadd.f32 %v6552_v57, %v3512_v51  ;;  %v6247_v29 = vadd.f32 %v6246_v56, %v6245_v15  ;;  %v6557_v36 = vpop.f32.mrf.mxu1 }
 0x2e0   : > { %v6248_v16 = vpop.f32.mrf.mxu0 }
 0x2e1   : > { %v3515_v54 = vadd.f32 %v6247_v29, %v9165_v59  ;;  %v3683_v48 = vpop.f32.mrf.mxu1 }
 0x2e2   : > { %v6249_v58 = vpop.f32.mrf.mxu0 }
 0x2e3   : > { %v9349_v5 = vadd.f32 %v6553_v45, %v3515_v54  ;;  %v6250_v3 = vadd.f32 %v6249_v58, %v6248_v16  ;;  %v6300_v1 = vpop.f32.mrf.mxu1 }
 0x2e4   : > { %v6251_v33 = vpop.f32.mrf.mxu0 }
 0x2e5   : > { %v3520_v52 = vadd.f32 %v6250_v3, %v9184_v40  ;;  %v6301_v0 = vpop.f32.mrf.mxu1 }
 0x2e6   : > { %v6252_v28 = vpop.f32.mrf.mxu0  ;;  %v6302_v15 = vadd.f32 %v6301_v0, %v6300_v1 }
 0x2e7   : > { %v6253_v18 = vadd.f32 %v6252_v28, %v6251_v33  ;;  %v6303_v53 = vpop.f32.mrf.mxu1  ;;  %v9363_v28 = vld [vmem:[%s9505_s4] ss:$0 sm:$0xff] }
 0x2e8   : > { %v6254_v24 = vpop.f32.mrf.mxu0 }
 0x2e9   : > { %v3523_v57 = vadd.f32 %v6253_v18, %v9205_v37  ;;  %v6304_v39 = vpop.f32.mrf.mxu1 }
 0x2ea   : > { %v6255_v59 = vpop.f32.mrf.mxu0 }
 0x2eb   : > { %v6256_v26 = vadd.f32 %v6255_v59, %v6254_v24 }
 0x2ec   : > { %v6257_v20 = vpop.f32.mrf.mxu0 }
 0x2ed   : > { %v3528_v13 = vadd.f32 %v6256_v26, %v9214_v61  ;;  %v6306_v41 = vpop.f32.mrf.mxu1 }
 0x2ee   : > { %v6258_v45 = vpop.f32.mrf.mxu0 }
 0x2ef   : > { %v9354_v50 = vadd.f32 %v6556_v22, %v3528_v13  ;;  %v6259_v4 = vadd.f32 %v6258_v45, %v6257_v20  ;;  %v6307_v23 = vpop.f32.mrf.mxu1  ;;  %v6305_v22 = vadd.f32 %v6304_v39, %v6303_v53  ;;  %v9370_v20 = vadd.f32 %v3680_v42, %v3520_v52 }
 0x2f0   : > { %v6308_v40 = vadd.f32 %v6307_v23, %v6306_v41  ;;  %v6576_v17 = vpop.f32.mrf.mxu0  ;;  %v9372_v13 = vadd.f32 %v3683_v48, %v3523_v57 }
 0x2f1   : > { %v3531_v51 = vadd.f32 %v6259_v4, %v9227_v60  ;;  %v6309_v56 = vpop.f32.mrf.mxu1 }
 0x2f2   : > { %v4956_v29 = vadd.f32 %v6576_v17, %v6308_v40  ;;  %v4947_v37 = vpop.f32.mrf.mxu0 }
 0x2f3   : > { %v9357_v54 = vadd.f32 %v6557_v36, %v3531_v51  ;;  %v4948_v16 = vadd.f32 %v6302_v15, %v4947_v37  ;;  %v6310_v58 = vpop.f32.mrf.mxu1 }
 0x2f4   : > { %v5076_v61 = vadd.f32 %v4956_v29, %v9231_v27  ;;  %v6311_v3 = vadd.f32 %v6310_v58, %v6309_v56  ;;  %v6577_v33 = vpop.f32.mrf.mxu0 }
 0x2f5   : > { %v5074_v60 = vadd.f32 %v4948_v16, %v9233_v62  ;;  %v6312_v1 = vpop.f32.mrf.mxu1 }
 0x2f6   : > { %v4959_v0 = vadd.f32 %v6577_v33, %v6311_v3  ;;  %v4950_v18 = vpop.f32.mrf.mxu0  ;;  %v5115_v59 = vadd.f32 %v9363_v28, %v5076_v61 }
 0x2f7   : > { %v4951_v36 = vadd.f32 %v6305_v22, %v4950_v18  ;;  %v6313_v24 = vpop.f32.mrf.mxu1  ;;  %v5113_v26 = vadd.f32 %v9363_v28, %v5074_v60 }
 0x2f8   : > { %v5077_v27 = vadd.f32 %v4959_v0, %v9245_v43  ;;  %v5147_v45 = vmax.f32 %v5115_v59, 0.0  ;;  %v6314_v23 = vadd.f32 %v6313_v24, %v6312_v1 }
 0x2f9   : > { %v5075_v53 = vadd.f32 %v4951_v36, %v9257_v49  ;;  %v6315_v39 = vpop.f32.mrf.mxu1  ;;  %v5145_v40 = vmax.f32 %v5113_v26, 0.0 }
 0x2fa   : > { %v5116_v62 = vadd.f32 %v9363_v28, %v5077_v27 }
 0x2fb   : > { %v5114_v41 = vadd.f32 %v9363_v28, %v5075_v53  ;;  %v6316_v15 = vpop.f32.mrf.mxu1 }
 0x2fc   : > { %v5148_v4 = vmax.f32 %v5116_v62, 0.0  ;;  %v6317_v48 = vadd.f32 %v6316_v15, %v6315_v39 }
 0x2fd   : > { %v5146_v17 = vmax.f32 %v5114_v41, 0.0  ;;  %v6580_v43 = vpop.f32.mrf.mxu0 }
 0x2fe   : > { %v5904_v51 = vpack.c.bf16 %v5148_v4, %v5147_v45 }
 0x2ff   : > { %v5899_v56 = vpack.c.bf16 %v5146_v17, %v5145_v40  ;;  %v4963_v49 = vpop.f32.mrf.mxu0 }
 0x300   : > { %5976 = vst [vmem:[%s9377_s13 + $0x8] sm:$0xff] %v5904_v51   ;;  %v4964_v42 = vadd.f32 %v6314_v23, %v4963_v49 }
 0x301   : > { %5900 = vst [vmem:[%s9377_s13] sm:$0xff] %v5899_v56   ;;  %v6581_v52 = vpop.f32.mrf.mxu0  ;;  %v6318_v57 = vpop.f32.mrf.mxu1 }
 0x302   : > { %v5078_v29 = vadd.f32 %v4964_v42, %v9272_v55 }
 0x303   : > { %v4966_v37 = vpop.f32.mrf.mxu0  ;;  %v6319_v16 = vpop.f32.mrf.mxu1 }
 0x304   : > { %v4967_v58 = vadd.f32 %v6317_v48, %v4966_v37  ;;  %v6320_v61 = vadd.f32 %v6319_v16, %v6318_v57  ;;  %v5117_v33 = vadd.f32 %v9363_v28, %v5078_v29 }
 0x305   : > { %v6321_v3 = vpop.f32.mrf.mxu1 }
 0x306   : > { %v5079_v22 = vadd.f32 %v4967_v58, %v9286_v34  ;;  %v4972_v60 = vadd.f32 %v6580_v43, %v6320_v61  ;;  %v5149_v24 = vmax.f32 %v5117_v33, 0.0 }
 0x307   : > { %v6322_v1 = vpop.f32.mrf.mxu1 }
 0x308   : > { %v5118_v0 = vadd.f32 %v9363_v28, %v5079_v22  ;;  %v5080_v18 = vadd.f32 %v4972_v60, %v9266_v10  ;;  %v6323_v36 = vadd.f32 %v6322_v1, %v6321_v3 }
 0x30a   : > { %v5150_v59 = vmax.f32 %v5118_v0, 0.0  ;;  %v6584_v55 = vpop.f32.mrf.mxu0  ;;  %v4975_v27 = vadd.f32 %v6581_v52, %v6323_v36  ;;  %v5119_v53 = vadd.f32 %v9363_v28, %v5080_v18 }
 0x30c   : > { %v5909_v26 = vpack.c.bf16 %v5150_v59, %v5149_v24  ;;  %v5081_v39 = vadd.f32 %v4975_v27, %v9278_v44  ;;  %v4979_v62 = vpop.f32.mrf.mxu0  ;;  %v5151_v4 = vmax.f32 %v5119_v53, 0.0 }
 0x30d   : > { %v6324_v41 = vpop.f32.mrf.mxu1 }
 0x30e   : > { %5977 = vst [vmem:[%s9377_s13 + $0x10] sm:$0xff] %v5909_v26   ;;  %v5120_v34 = vadd.f32 %v9363_v28, %v5081_v39  ;;  %v6585_v40 = vpop.f32.mrf.mxu0 }
 0x30f   : > { %v6325_v45 = vpop.f32.mrf.mxu1 }
 0x310   : > { %v5152_v23 = vmax.f32 %v5120_v34, 0.0  ;;  %v6326_v10 = vadd.f32 %v6325_v45, %v6324_v41  ;;  %v4982_v44 = vpop.f32.mrf.mxu0 }
 0x311   : > { %v6327_v17 = vpop.f32.mrf.mxu1 }
 0x312   : > { %v5914_v43 = vpack.c.bf16 %v5152_v23, %v5151_v4  ;;  %v4980_v15 = vadd.f32 %v6326_v10, %v4979_v62 }
 0x313   : > { %v6328_v51 = vpop.f32.mrf.mxu1 }
 0x314   : > { %5978 = vst [vmem:[%s9377_s13 + $0x18] sm:$0xff] %v5914_v43   ;;  %v5082_v56 = vadd.f32 %v4980_v15, %v9295_v32  ;;  %v6329_v49 = vadd.f32 %v6328_v51, %v6327_v17 }
 0x316   : > { %v4983_v42 = vadd.f32 %v6329_v49, %v4982_v44  ;;  %v5121_v48 = vadd.f32 %v9363_v28, %v5082_v56  ;;  %v6588_v32 = vpop.f32.mrf.mxu0 }
 0x318   : > { %v5083_v52 = vadd.f32 %v4983_v42, %v9304_v38  ;;  %v5153_v37 = vmax.f32 %v5121_v48, 0.0  ;;  %v4995_v36 = vpop.f32.mrf.mxu0 }
 0x31a   : > { %v5122_v57 = vadd.f32 %v9363_v28, %v5083_v52  ;;  %v6589_v39 = vpop.f32.mrf.mxu0 }
 0x31c   : > { %v5154_v16 = vmax.f32 %v5122_v57, 0.0  ;;  %v4998_v10 = vpop.f32.mrf.mxu0 }
 0x31d   : > { %v6330_v29 = vpop.f32.mrf.mxu1 }
 0x31e   : > { %v5919_v61 = vpack.c.bf16 %v5154_v16, %v5153_v37 }
 0x31f   : > { %v6331_v58 = vpop.f32.mrf.mxu1 }
 0x320   : > { %v6332_v3 = vadd.f32 %v6331_v58, %v6330_v29  ;;  %5979 = vst [vmem:[%s9377_s13 + $0x20] sm:$0xff] %v5919_v61  }
 0x321   : > { %v6333_v33 = vpop.f32.mrf.mxu1 }
 0x322   : > { %v4988_v22 = vadd.f32 %v6584_v55, %v6332_v3  ;;  %v6592_v37 = vpop.f32.mrf.mxu0 }
 0x323   : > { %v6334_v60 = vpop.f32.mrf.mxu1 }
 0x324   : > { %v5084_v1 = vadd.f32 %v4988_v22, %v9293_v47  ;;  %v6335_v0 = vadd.f32 %v6334_v60, %v6333_v33  ;;  %v5011_v61 = vpop.f32.mrf.mxu0 }
 0x326   : > { %v4991_v18 = vadd.f32 %v6585_v40, %v6335_v0  ;;  %v5123_v38 = vadd.f32 %v9363_v28, %v5084_v1  ;;  %v6593_v0 = vpop.f32.mrf.mxu0 }
 0x328   : > { %v5085_v24 = vadd.f32 %v4991_v18, %v9302_v14  ;;  %v5155_v62 = vmax.f32 %v5123_v38, 0.0 }
 0x329   : > { %v6336_v59 = vpop.f32.mrf.mxu1 }
 0x32a   : > { %v5124_v27 = vadd.f32 %v9363_v28, %v5085_v24 }
 0x32b   : > { %v6337_v26 = vpop.f32.mrf.mxu1 }
 0x32c   : > { %v6338_v53 = vadd.f32 %v6337_v26, %v6336_v59  ;;  %v5156_v55 = vmax.f32 %v5124_v27, 0.0  ;;  %v5014_v27 = vpop.f32.mrf.mxu0 }
 0x32d   : > { %v6339_v41 = vpop.f32.mrf.mxu1 }
 0x32e   : > { %v4996_v34 = vadd.f32 %v6338_v53, %v4995_v36  ;;  %v5924_v45 = vpack.c.bf16 %v5156_v55, %v5155_v62 }
 0x32f   : > { %v6340_v47 = vpop.f32.mrf.mxu1 }
 0x330   : > { %v5086_v4 = vadd.f32 %v4996_v34, %v9311_v11  ;;  %v6341_v23 = vadd.f32 %v6340_v47, %v6339_v41  ;;  %5980 = vst [vmem:[%s9377_s13 + $0x28] sm:$0xff] %v5924_v45   ;;  %v6596_v41 = vpop.f32.mrf.mxu0 }
 0x332   : > { %v4999_v40 = vadd.f32 %v6341_v23, %v4998_v10  ;;  %v5125_v14 = vadd.f32 %v9363_v28, %v5086_v4 }
 0x334   : > { %v5087_v17 = vadd.f32 %v4999_v40, %v9316_v7  ;;  %v5157_v56 = vmax.f32 %v5125_v14, 0.0  ;;  %v5027_v14 = vpop.f32.mrf.mxu0 }
 0x336   : > { %v6342_v43 = vpop.f32.mrf.mxu1  ;;  %v5126_v15 = vadd.f32 %v9363_v28, %v5087_v17 }
 0x338   : > { %v6343_v51 = vpop.f32.mrf.mxu1  ;;  %v5158_v49 = vmax.f32 %v5126_v15, 0.0 }
 0x339   : > { %v6344_v44 = vadd.f32 %v6343_v51, %v6342_v43 }
 0x33a   : > { %v6345_v42 = vpop.f32.mrf.mxu1  ;;  %v5929_v48 = vpack.c.bf16 %v5158_v49, %v5157_v56 }
 0x33b   : > { %v5004_v52 = vadd.f32 %v6588_v32, %v6344_v44  ;;  %v6597_v44 = vpop.f32.mrf.mxu0 }
 0x33c   : > { %v6346_v11 = vpop.f32.mrf.mxu1  ;;  %5981 = vst [vmem:[%s9377_s13 + $0x30] sm:$0xff] %v5929_v48  }
 0x33d   : > { %v5088_v57 = vadd.f32 %v5004_v52, %v9307_v46  ;;  %v6347_v29 = vadd.f32 %v6346_v11, %v6345_v42 }
 0x33f   : > { %v5007_v16 = vadd.f32 %v6589_v39, %v6347_v29  ;;  %v5127_v7 = vadd.f32 %v9363_v28, %v5088_v57 }
 0x341   : > { %v5089_v58 = vadd.f32 %v5007_v16, %v9313_v21  ;;  %v5159_v60 = vmax.f32 %v5127_v7, 0.0  ;;  %v5030_v16 = vpop.f32.mrf.mxu0 }
 0x342   : > { %v6348_v3 = vpop.f32.mrf.mxu1 }
 0x343   : > { %v5128_v33 = vadd.f32 %v9363_v28, %v5089_v58 }
 0x344   : > { %v6349_v22 = vpop.f32.mrf.mxu1 }
 0x345   : > { %v5160_v1 = vmax.f32 %v5128_v33, 0.0  ;;  %v6350_v32 = vadd.f32 %v6349_v22, %v6348_v3 }
 0x346   : > { %v6351_v18 = vpop.f32.mrf.mxu1 }
 0x347   : > { %v5934_v36 = vpack.c.bf16 %v5160_v1, %v5159_v60  ;;  %v5012_v46 = vadd.f32 %v6350_v32, %v5011_v61  ;;  %v6600_v60 = vpop.f32.mrf.mxu0 }
 0x348   : > { %v6352_v38 = vpop.f32.mrf.mxu1 }
 0x349   : > { %5982 = vst [vmem:[%s9377_s13 + $0x38] sm:$0xff] %v5934_v36   ;;  %v5090_v24 = vadd.f32 %v5012_v46, %v9321_v63  ;;  %v6353_v59 = vadd.f32 %v6352_v38, %v6351_v18 }
 0x34a   : > { %v6354_v26 = vpop.f32.mrf.mxu1 }
 0x34b   : > { %v5015_v21 = vadd.f32 %v6353_v59, %v5014_v27  ;;  %v5129_v39 = vadd.f32 %v9363_v28, %v5090_v24  ;;  %v5043_v24 = vpop.f32.mrf.mxu0 }
 0x34c   : > { %v6355_v53 = vpop.f32.mrf.mxu1 }
 0x34d   : > { %v5091_v62 = vadd.f32 %v5015_v21, %v9326_v19  ;;  %v6356_v55 = vadd.f32 %v6355_v53, %v6354_v26  ;;  %v5161_v23 = vmax.f32 %v5129_v39, 0.0 }
 0x34e   : > { %v6357_v34 = vpop.f32.mrf.mxu1 }
 0x34f   : > { %v5130_v45 = vadd.f32 %v9363_v28, %v5091_v62  ;;  %v5020_v47 = vadd.f32 %v6592_v37, %v6356_v55  ;;  %v6601_v62 = vpop.f32.mrf.mxu0 }
 0x350   : > { %v6358_v4 = vpop.f32.mrf.mxu1 }
 0x351   : > { %v5162_v10 = vmax.f32 %v5130_v45, 0.0  ;;  %v5092_v63 = vadd.f32 %v5020_v47, %v9319_v6  ;;  %v6359_v40 = vadd.f32 %v6358_v4, %v6357_v34 }
 0x352   : > { %v6360_v17 = vpop.f32.mrf.mxu1 }
 0x353   : > { %v5939_v43 = vpack.c.bf16 %v5162_v10, %v5161_v23  ;;  %v5023_v15 = vadd.f32 %v6593_v0, %v6359_v40  ;;  %v5131_v19 = vadd.f32 %v9363_v28, %v5092_v63  ;;  %v5046_v10 = vpop.f32.mrf.mxu0 }
 0x354   : > { %v6361_v51 = vpop.f32.mrf.mxu1 }
 0x355   : > { %5983 = vst [vmem:[%s9377_s13 + $0x40] sm:$0xff] %v5939_v43   ;;  %v5093_v56 = vadd.f32 %v5023_v15, %v9324_v30  ;;  %v6362_v49 = vadd.f32 %v6361_v51, %v6360_v17  ;;  %v5163_v6 = vmax.f32 %v5131_v19, 0.0 }
 0x356   : > { %v6363_v42 = vpop.f32.mrf.mxu1 }
 0x357   : > { %v5132_v48 = vadd.f32 %v9363_v28, %v5093_v56  ;;  %v5028_v52 = vadd.f32 %v6362_v49, %v5027_v14 }
 0x358   : > { %v6364_v11 = vpop.f32.mrf.mxu1 }
 0x359   : > { %v5164_v57 = vmax.f32 %v5132_v48, 0.0  ;;  %v5094_v29 = vadd.f32 %v5028_v52, %v9330_v25  ;;  %v6365_v37 = vadd.f32 %v6364_v11, %v6363_v42 }
 0x35a   : > { %v6366_v7 = vpop.f32.mrf.mxu1 }
 0x35b   : > { %v5944_v58 = vpack.c.bf16 %v5164_v57, %v5163_v6  ;;  %v5031_v61 = vadd.f32 %v6365_v37, %v5030_v16  ;;  %v5133_v30 = vadd.f32 %v9363_v28, %v5094_v29 }
 0x35c   : > { %v6367_v3 = vpop.f32.mrf.mxu1 }
 0x35d   : > { %5984 = vst [vmem:[%s9377_s13 + $0x48] sm:$0xff] %v5944_v58   ;;  %v5095_v33 = vadd.f32 %v5031_v61, %v9335_v2  ;;  %v6368_v22 = vadd.f32 %v6367_v3, %v6366_v7  ;;  %v5165_v25 = vmax.f32 %v5133_v30, 0.0 }
 0x35e   : > { %v6369_v1 = vpop.f32.mrf.mxu1 }
 0x35f   : > { %v5134_v32 = vadd.f32 %v9363_v28, %v5095_v33  ;;  %v5036_v0 = vadd.f32 %v6596_v41, %v6368_v22 }
 0x360   : > { %v6370_v18 = vpop.f32.mrf.mxu1 }
 0x361   : > { %v5166_v36 = vmax.f32 %v5134_v32, 0.0  ;;  %v5096_v46 = vadd.f32 %v5036_v0, %v9332_v9  ;;  %v6371_v38 = vadd.f32 %v6370_v18, %v6369_v1 }
 0x362   : > { %v6372_v59 = vpop.f32.mrf.mxu1  ;;  %v6604_v43 = vpop.f32.mrf.mxu0 }
 0x363   : > { %v5949_v27 = vpack.c.bf16 %v5166_v36, %v5165_v25  ;;  %v5039_v26 = vadd.f32 %v6597_v44, %v6371_v38  ;;  %v5135_v2 = vadd.f32 %v9363_v28, %v5096_v46 }
 0x364   : > { %v6373_v21 = vpop.f32.mrf.mxu1 }
 0x365   : > { %5985 = vst [vmem:[%s9377_s13 + $0x50] sm:$0xff] %v5949_v27   ;;  %v5097_v53 = vadd.f32 %v5039_v26, %v9337_v12  ;;  %v6374_v39 = vadd.f32 %v6373_v21, %v6372_v59  ;;  %v5167_v9 = vmax.f32 %v5135_v2, 0.0 }
 0x366   : > { %v6375_v55 = vpop.f32.mrf.mxu1 }
 0x367   : > { %v5136_v41 = vadd.f32 %v9363_v28, %v5097_v53  ;;  %v5044_v34 = vadd.f32 %v6374_v39, %v5043_v24 }
 0x368   : > { %v6376_v45 = vpop.f32.mrf.mxu1 }
 0x369   : > { %v5168_v47 = vmax.f32 %v5136_v41, 0.0  ;;  %v5098_v4 = vadd.f32 %v5044_v34, %v9340_v35  ;;  %v6377_v23 = vadd.f32 %v6376_v45, %v6375_v55  ;;  %v5059_v35 = vpop.f32.mrf.mxu0 }
 0x36a   : > { %v6378_v63 = vpop.f32.mrf.mxu1 }
 0x36b   : > { %v5954_v40 = vpack.c.bf16 %v5168_v47, %v5167_v9  ;;  %v5047_v14 = vadd.f32 %v6377_v23, %v5046_v10  ;;  %v5137_v12 = vadd.f32 %v9363_v28, %v5098_v4  ;;  %v6605_v16 = vpop.f32.mrf.mxu0 }
 0x36c   : > { %v6379_v17 = vpop.f32.mrf.mxu1 }
 0x36d   : > { %5986 = vst [vmem:[%s9377_s13 + $0x58] sm:$0xff] %v5954_v40   ;;  %v5099_v15 = vadd.f32 %v5047_v14, %v9343_v31  ;;  %v6380_v51 = vadd.f32 %v6379_v17, %v6378_v63  ;;  %v5169_v42 = vmax.f32 %v5137_v12, 0.0  ;;  %v5062_v22 = vpop.f32.mrf.mxu0 }
 0x36e   : > { %v6381_v19 = vpop.f32.mrf.mxu1 }
 0x36f   : > { %v5138_v56 = vadd.f32 %v9363_v28, %v5099_v15  ;;  %v5052_v49 = vadd.f32 %v6600_v60, %v6380_v51 }
 0x370   : > { %v6382_v44 = vpop.f32.mrf.mxu1 }
 0x371   : > { %v5170_v48 = vmax.f32 %v5138_v56, 0.0  ;;  %v5100_v52 = vadd.f32 %v5052_v49, %v9346_v8  ;;  %v6383_v11 = vadd.f32 %v6382_v44, %v6381_v19 }
 0x372   : > { %v6384_v6 = vpop.f32.mrf.mxu1 }
 0x373   : > { %v5959_v57 = vpack.c.bf16 %v5170_v48, %v5169_v42  ;;  %v5055_v29 = vadd.f32 %v6601_v62, %v6383_v11  ;;  %v5139_v31 = vadd.f32 %v9363_v28, %v5100_v52 }
 0x374   : > { %v6385_v37 = vpop.f32.mrf.mxu1 }
 0x375   : > { %5987 = vst [vmem:[%s9377_s13 + $0x60] sm:$0xff] %v5959_v57   ;;  %v5101_v7 = vadd.f32 %v5055_v29, %v9349_v5  ;;  %v6386_v58 = vadd.f32 %v6385_v37, %v6384_v6  ;;  %v5171_v8 = vmax.f32 %v5139_v31, 0.0 }
 0x376   : > { %v6387_v61 = vpop.f32.mrf.mxu1 }
 0x377   : > { %v5140_v3 = vadd.f32 %v9363_v28, %v5101_v7  ;;  %v5060_v30 = vadd.f32 %v6386_v58, %v5059_v35 }
 0x378   : > { %v6388_v33 = vpop.f32.mrf.mxu1 }
 0x379   : > { %v5172_v60 = vmax.f32 %v5140_v3, 0.0  ;;  %v5102_v1 = vadd.f32 %v5060_v30, %v9370_v20  ;;  %v6389_v32 = vadd.f32 %v6388_v33, %v6387_v61 }
 0x37a   : > { %v6390_v0 = vpop.f32.mrf.mxu1 }
 0x37b   : > { %v5964_v18 = vpack.c.bf16 %v5172_v60, %v5171_v8  ;;  %v5063_v25 = vadd.f32 %v6389_v32, %v5062_v22  ;;  %v5141_v5 = vadd.f32 %v9363_v28, %v5102_v1 }
 0x37c   : > { %v6391_v36 = vpop.f32.mrf.mxu1 }
 0x37d   : > { %5988 = vst [vmem:[%s9377_s13 + $0x68] sm:$0xff] %v5964_v18   ;;  %v5103_v46 = vadd.f32 %v5063_v25, %v9372_v13  ;;  %v6392_v38 = vadd.f32 %v6391_v36, %v6390_v0  ;;  %v5173_v20 = vmax.f32 %v5141_v5, 0.0 }
 0x37e   : > { %v6393_v24 = vpop.f32.mrf.mxu1 }
 0x37f   : > { %v5142_v59 = vadd.f32 %v9363_v28, %v5103_v46  ;;  %v5068_v27 = vadd.f32 %v6604_v43, %v6392_v38 }
 0x380   : > { %v6394_v26 = vpop.f32.mrf.mxu1 }
 0x381   : > { %v5174_v21 = vmax.f32 %v5142_v59, 0.0  ;;  %v5104_v2 = vadd.f32 %v5068_v27, %v9354_v50  ;;  %v6395_v53 = vadd.f32 %v6394_v26, %v6393_v24 }
 0x383   : > { %v5969_v39 = vpack.c.bf16 %v5174_v21, %v5173_v20  ;;  %v5071_v62 = vadd.f32 %v6605_v16, %v6395_v53  ;;  %v5143_v13 = vadd.f32 %v9363_v28, %v5104_v2 }
 0x385   : > { %5989 = vst [vmem:[%s9377_s13 + $0x70] sm:$0xff] %v5969_v39   ;;  %v5105_v55 = vadd.f32 %v5071_v62, %v9357_v54  ;;  %v5175_v34 = vmax.f32 %v5143_v13, 0.0 }
 0x387   : > { %v5144_v41 = vadd.f32 %v9363_v28, %v5105_v55 }
 0x389   : > { %v5176_v45 = vmax.f32 %v5144_v41, 0.0 }
 0x38b   : > { %v5974_v50 = vpack.c.bf16 %v5176_v45, %v5175_v34 }
 0x38d   : > { %5990 = vst [vmem:[%s9377_s13 + $0x78] sm:$0xff] %v5974_v50  }
 0x38e   : > { %6917 = shalt.err (!%p6914_p3)
}
 0x38f   : > { %s6918_s24 = scalar_lea.hbm %s9455_s17, 2048  ;;  %s6922_s6 = scalar_lea.hbm %s9506_s5, 4096 }
 0x390   : > { %p6919_p2 = scmp.ne.s32.totalorder %s9455_s17, %s6918_s24  ;;  %p6923_p4 = scmp.lt.s32.totalorder %s9455_s17, %s9506_s5 }
 0x391   : > { %p6924_p6 = scmp.lt.s32.totalorder %s6922_s6, %s6918_s24 }
 0x392   : > { %p6920_p9 = pnand %p6919_p2, %p9720_p11 }
 0x393   : > { %p6925_p8 = por %p6924_p6, %p6923_p4 }
 0x394   : > { %p6921_p1 = pneg %p6920_p9 }
 0x396   : > { %p6926_p5 = pnand %p6925_p8, %p6921_p1 }
 0x398   : > { %6929 = shalt.err (!%p6926_p5)
}
 0x399   : > { %s6981_s14 = smov 64   ;;  %s6982_s29 = smov 4  }
 0x39a   : > { %6620 = dma.vmem_to_hbm [thread:$0]  (%p9720_p11), %s9457_s28, 2048, %s9455_s17, %s5338_s8, %s6981_s14, %s6981_s14, %s6982_s29  }
 0x39b PF: > { %s5366_s12 = sand.u32 1, %s6960_s18   ;;  %p9721_p7 = scmp.ne.s32.totalorder %s9577_s25, 0 }
 0x39c   : > { %p9722_p12 = scmp.ge.s32.totalorder %s6972_s21, 2  ;;  %s5367_s7 = scalar_lea.sflag [#allocation5], %s5366_s12 }
 0x39e   : > { %p6634_p13 = pnand %p9722_p12, %p9721_p7 }
 0x3a0   : > { %p6635_p0 = pneg %p6634_p13 }
 0x3a2   : > { %6955 = dma.done.wait (%p6635_p0), %s5367_s7, 2048  }
 0x3a3   : > { %6957 = vsyncadd (%p6635_p0), %s5367_s7, 4294965248  ;;  %p19_p10 = scmp.ge.s32.totalorder %s7091_s15, 4   ;;  %s9723_s18 = smov %s6964_s19 }
 0x3a4   : > { %s9724_s19 = smov %s6968_s20  ;;  %s9725_s20 = smov %s7107_s27 }
 0x3a5   : > { %s9726_s21 = smov %s7091_s15  ;;  %21 = sbr.rel (!%p19_p10) target bundleno = 6 (0x6), region = 95 }
 0x3aa   :  { %5372 = vsyncpa [#allocation4], 1 }
 0x3ab   :  { %5374 = vsyncpa [#allocation4 + $0x1], 1 }
 0x3ac   :  { %5375 = vsyncpa [#allocation7], 1 }
 0x3ad   :  { %5376 = vsyncpa [#allocation5], 1 }
 0x3ae   :  { %5378 = vsyncpa [#allocation5 + $0x1], 1 }

</bundles_post_ra>
